<compile_context>
chip_gen: v6e
topology: v6e:2x2x1
jax: 0.10.0
libtpu: 0.0.40
codegen_flags: <defaults>
</compile_context>

<pallas_src>
import functools

import jax
import jax.numpy as jnp
from jax.experimental import pallas as pl
from jax.experimental.pallas import tpu as pltpu


# ----------------------------------------------------------------------------
# In-kernel GRU gate math. Gate order [r, z, n] matches torch.nn.GRU.
# gi (bf16) already contains b_ih + b_hh[r|z]; only b_hn is added here.
# ----------------------------------------------------------------------------
def _gates(gi, gh, h, bhn_b, H):
    """gi: (TB,3H) bf16, gh: (TB,3H) f32, h: (TB,H) f32 -> new h (TB,H) f32."""
    # sigmoid(x) == 0.5*tanh(0.5*x)+0.5 : single EUP op per gate
    r = 0.5 * jnp.tanh(0.5 * (gi[:, :H] + gh[:, :H])) + 0.5
    z = 0.5 * jnp.tanh(0.5 * (gi[:, H:2 * H] + gh[:, H:2 * H])) + 0.5
    n = jnp.tanh(gi[:, 2 * H:] + r * (gh[:, 2 * H:] + bhn_b))
    return (1.0 - z) * n + z * h


# ----------------------------------------------------------------------------
# Kernel 1: intermediate GRU layer with the NEXT layer's input projection
# fused in.  Emits gi^{l+1} (bf16) directly -- no (T,B,H) HBM round trip.
# grid = (batch_tiles, time_tiles); the time axis carries the recurrence.
# ----------------------------------------------------------------------------
def gru_seq_fused_kernel(maxlast_ref,                    # SMEM (nb,) int32
                         gi_ref,                         # (TT,TB,3H) bf16
                         whh_hbm, bhn_hbm,               # ANY: (H,3H) bf16, (1,H) f32
                         wih_hbm, bnext_hbm,             # ANY: (H,3H) bf16, (1,3H) f32
                         gi_next_ref,                    # out (TT,TB,3H) bf16
                         h_ref, whh_ref, bhn_ref, wih_ref, bnext_ref, sem):
    b_blk = pl.program_id(0)
    t_blk = pl.program_id(1)

    @pl.when(t_blk == 0)
    def _():
        copies = (pltpu.make_async_copy(whh_hbm, whh_ref, sem.at[0]),
                  pltpu.make_async_copy(bhn_hbm, bhn_ref, sem.at[1]),
                  pltpu.make_async_copy(wih_hbm, wih_ref, sem.at[2]),
                  pltpu.make_async_copy(bnext_hbm, bnext_ref, sem.at[3]))
        for c in copies:
            c.start()
        for c in copies:
            c.wait()
        h_ref[...] = jnp.zeros_like(h_ref)

    TT, TB, G = gi_ref.shape
    H = h_ref.shape[-1]
    t0 = t_blk * TT
    active = t0 <= maxlast_ref[b_blk]       # lengths are descending per tile

    @pl.when(active)
    def _():
        whh = whh_ref[...]                                   # (H,3H) bf16
        wih = wih_ref[...]                                   # (H,3H) bf16
        bhn_b = jnp.broadcast_to(bhn_ref[...], (TB, H))      # hoisted once
        bnext_b = jnp.broadcast_to(bnext_ref[...], (TB, G))  # hoisted once

        def step(t, h):
            gi = gi_ref[t]                                   # (TB,3H) bf16
            gh = jnp.dot(h.astype(jnp.bfloat16), whh,
                         preferred_element_type=jnp.float32)
            h_new = _gates(gi, gh, h, bhn_b, H)
            # fused next-layer input projection (off the serial h chain)
            gi_n = jnp.dot(h_new.astype(jnp.bfloat16), wih,
                           preferred_element_type=jnp.float32) + bnext_b
            gi_next_ref[t] = gi_n.astype(gi_next_ref.dtype)
            return h_new

        # h carried in vregs across the unrolled block; one store at block end
        h_ref[...] = jax.lax.fori_loop(0, TT, step, h_ref[...], unroll=True)

    @pl.when(jnp.logical_not(active))
    def _():
        # fully-padded time tile: skip all recurrence work; emit zeros so the
        # (also-skipped) next-layer tile reads defined data
        gi_next_ref[...] = jnp.zeros_like(gi_next_ref)


# ----------------------------------------------------------------------------
# Kernel 2: LAST GRU layer with the lengths-gather + L2-norm fused in.
# ----------------------------------------------------------------------------
def gru_last_kernel(maxlast_ref, gi_ref, last_ref, whh_hbm, bhn_hbm, out_ref,
                    h_ref, sel_ref, whh_ref, bhn_ref, sem):
    b_blk = pl.program_id(0)
    t_blk = pl.program_id(1)

    @pl.when(t_blk == 0)
    def _():
        cw = pltpu.make_async_copy(whh_hbm, whh_ref, sem.at[0])
        cb = pltpu.make_async_copy(bhn_hbm, bhn_ref, sem.at[1])
        cw.start(); cb.start()
        cw.wait(); cb.wait()
        h_ref[...] = jnp.zeros_like(h_ref)
        sel_ref[...] = jnp.zeros_like(sel_ref)

    TT, TB, G = gi_ref.shape
    H = h_ref.shape[-1]
    t0 = t_blk * TT
    active = t0 <= maxlast_ref[b_blk]
    last_t = last_ref[...]                    # (TB,1) int32 == lengths - 1

    @pl.when(active)
    def _():
        whh = whh_ref[...]
        bhn_b = jnp.broadcast_to(bhn_ref[...], (TB, H))

        def step(t, carry):
            h, sel = carry
            gi = gi_ref[t]
            gh = jnp.dot(h.astype(jnp.bfloat16), whh,
                         preferred_element_type=jnp.float32)
            h_new = _gates(gi, gh, h, bhn_b, H)
            # keep h at t == lengths-1 per batch row (rows whose lengths-1 is
            # out of range yield zeros, as before; pack_padded would reject)
            sel = jnp.where(last_t == (t0 + t), h_new, sel)
            return (h_new, sel)

        h_last, sel_last = jax.lax.fori_loop(
            0, TT, step, (h_ref[...], sel_ref[...]), unroll=True)
        h_ref[...] = h_last
        sel_ref[...] = sel_last

    @pl.when(t_blk == pl.num_programs(1) - 1)
    def _():
        sel = sel_ref[...]
        # l2norm: X / (sqrt(sum X^2) + eps)  (eps outside the sqrt, as in torch)
        norm = jnp.sqrt(jnp.sum(sel * sel, axis=1, keepdims=True)) + 1e-8
        out_ref[...] = (sel / norm).astype(out_ref.dtype)


# ----------------------------------------------------------------------------
# Wrappers
# ----------------------------------------------------------------------------
def _default_batch_tile(B):
    # Prefer >=2 MXU-aligned batch tiles so v7x's second TensorCore gets work
    # (harmless on v5e/v6e, which have one TC); fall back to the whole batch.
    for tb in (512, 384, 256, 128):
        if B % tb == 0 and B // tb >= 2:
            return tb
    return B


def _vmem_limit(bytes_needed):
    # Explicit VMEM budget with headroom (v7x physical VMEM is only 64 MiB).
    return int(min(100 * 1024 * 1024, max(32 * 1024 * 1024, int(bytes_needed * 1.5))))


def _fold_bias(b_ih, b_hh, H):
    """b_ih + [b_hh_r | b_hh_z | 0]: r/z use gi+gh symmetrically so their b_hh
    folds into gi; b_hn must stay inside r*(gh_n + b_hn) in-kernel."""
    return b_ih + jnp.concatenate(
        [b_hh[:, :2 * H], jnp.zeros((1, H), b_hh.dtype)], axis=1)


def _gru_input_proj(x_tm, w_ih, bias_f32):
    """Hoisted input projection: one big bf16 GEMM over all T.
    x_tm: (T,B,Din) -> gi (T,B,3H) bf16 (bias added in f32 before the cast)."""
    T, B, Din = x_tm.shape
    gi = jnp.dot(x_tm.reshape(T * B, Din).astype(jnp.bfloat16),
                 w_ih.astype(jnp.bfloat16),
                 preferred_element_type=jnp.float32)
    gi = gi + bias_f32.astype(jnp.float32)
    return gi.reshape(T, B, -1).astype(jnp.bfloat16)


def gru_layer_seq_fused(gi, w_hh, b_hn, w_ih_next, bias_next, max_last, *,
                        time_tile, batch_tile):
    T, B, G = gi.shape
    H = G // 3
    TT, TB = time_tile, batch_tile
    assert T % TT == 0 and B % TB == 0
    nb, nt = B // TB, T // TT
    need = (4 * TT * TB * G * 2        # gi + gi_next double-buffers (bf16)
            + TB * H * 4               # h carry
            + 2 * H * G * 2            # W_hh, W_ih_next (bf16)
            + (H + G) * 4)             # b_hn, bias_next
    return pl.pallas_call(
        gru_seq_fused_kernel,
        out_shape=jax.ShapeDtypeStruct((T, B, G), jnp.bfloat16),
        grid_spec=pltpu.PrefetchScalarGridSpec(
            num_scalar_prefetch=1,
            grid=(nb, nt),
            in_specs=[pl.BlockSpec((TT, TB, G), lambda b, t, ml: (t, b, 0)),
                      pl.BlockSpec(memory_space=pl.ANY),    # W_hh (copied once)
                      pl.BlockSpec(memory_space=pl.ANY),    # b_hn
                      pl.BlockSpec(memory_space=pl.ANY),    # W_ih (next layer)
                      pl.BlockSpec(memory_space=pl.ANY)],   # folded bias (next)
            out_specs=pl.BlockSpec((TT, TB, G), lambda b, t, ml: (t, b, 0)),
            scratch_shapes=[
                pltpu.VMEM((TB, H), jnp.float32),      # hidden state carry
                pltpu.VMEM((H, G), jnp.bfloat16),      # W_hh (single-buffered)
                pltpu.VMEM((1, H), jnp.float32),       # b_hn
                pltpu.VMEM((H, G), jnp.bfloat16),      # W_ih next layer
                pltpu.VMEM((1, G), jnp.float32),       # folded next-layer bias
                pltpu.SemaphoreType.DMA((4,)),
            ]),
        compiler_params=pltpu.CompilerParams(
            dimension_semantics=("parallel", "arbitrary"),
            vmem_limit_bytes=_vmem_limit(need)),
    )(max_last, gi,
      w_hh.astype(jnp.bfloat16), b_hn.astype(jnp.float32),
      w_ih_next.astype(jnp.bfloat16), bias_next.astype(jnp.float32))


def gru_layer_last(gi, w_hh, b_hn, lengths, max_last, *, time_tile, batch_tile):
    T, B, G = gi.shape
    H = G // 3
    TT, TB = time_tile, batch_tile
    assert T % TT == 0 and B % TB == 0
    nb, nt = B // TB, T // TT
    last_idx = (lengths.astype(jnp.int32) - 1).reshape(B, 1)
    need = (2 * TT * TB * G * 2 + 2 * TB * 4 + 2 * TB * H * 4
            + 2 * TB * H * 4 + H * G * 2 + H * 4)
    return pl.pallas_call(
        gru_last_kernel,
        out_shape=jax.ShapeDtypeStruct((B, H), jnp.float32),
        grid_spec=pltpu.PrefetchScalarGridSpec(
            num_scalar_prefetch=1,
            grid=(nb, nt),
            in_specs=[pl.BlockSpec((TT, TB, G), lambda b, t, ml: (t, b, 0)),
                      pl.BlockSpec((TB, 1), lambda b, t, ml: (b, 0)),
                      pl.BlockSpec(memory_space=pl.ANY),    # W_hh
                      pl.BlockSpec(memory_space=pl.ANY)],   # b_hn
            out_specs=pl.BlockSpec((TB, H), lambda b, t, ml: (b, 0)),
            scratch_shapes=[
                pltpu.VMEM((TB, H), jnp.float32),      # hidden state carry
                pltpu.VMEM((TB, H), jnp.float32),      # selected h at lengths-1
                pltpu.VMEM((H, G), jnp.bfloat16),      # W_hh (single-buffered)
                pltpu.VMEM((1, H), jnp.float32),       # b_hn
                pltpu.SemaphoreType.DMA((2,)),
            ]),
        compiler_params=pltpu.CompilerParams(
            dimension_semantics=("parallel", "arbitrary"),
            vmem_limit_bytes=_vmem_limit(need)),
    )(max_last, gi, last_idx, w_hh.astype(jnp.bfloat16), b_hn.astype(jnp.float32))


def init_params(key, vocab_size, word_dim, embed_size, num_layers):
    keys = jax.random.split(key, 1 + 4 * num_layers)
    embed = jax.random.uniform(keys[0], (vocab_size, word_dim),
                               jnp.float32, -0.1, 0.1)
    k = 1.0 / jnp.sqrt(embed_size)
    layers = []
    for l in range(num_layers):
        in_dim = word_dim if l == 0 else embed_size
        kw = keys[1 + 4 * l: 1 + 4 * (l + 1)]
        # gates packed [r|z|n] along the lane dim, stored transposed so the
        # projections are x @ W (matches torch.nn.GRU weight rows)
        w_ih = jax.random.uniform(kw[0], (in_dim, 3 * embed_size), jnp.float32, -k, k)
        w_hh = jax.random.uniform(kw[1], (embed_size, 3 * embed_size), jnp.float32, -k, k)
        b_ih = jax.random.uniform(kw[2], (1, 3 * embed_size), jnp.float32, -k, k)
        b_hh = jax.random.uniform(kw[3], (1, 3 * embed_size), jnp.float32, -k, k)
        layers.append((w_ih, w_hh, b_ih, b_hh))
    return embed, layers


@functools.partial(jax.jit, static_argnames=("use_abs", "time_tile", "batch_tile"))
def encoder_text_forward(params, x, lengths, use_abs=False, time_tile=16,
                         batch_tile=None):
    """x: (B, T) int32 token ids; lengths: (B,) int32 (descending, 1<=len<=T)."""
    embed, layers = params
    B, T = x.shape
    H = layers[0][1].shape[0]                     # w_hh is (H, 3H)

    TB = batch_tile or _default_batch_tile(B)
    assert B % TB == 0
    nb = B // TB
    TT = int(time_tile)
    T_pad = ((T + TT - 1) // TT) * TT             # pad T instead of shrinking TT

    lengths = lengths.astype(jnp.int32)
    # last valid step per batch tile (lengths descending) -> kernels skip
    # fully-padded time tiles
    max_last = jnp.max(lengths.reshape(nb, TB), axis=1) - 1   # (nb,)

    # Time-major embedding gather, zero-padded in time. Padded steps are past
    # every lengths-1 so they never influence the gathered output.
    h_seq = jnp.take(embed, x.T, axis=0)                       # (T, B, D)
    if T_pad != T:
        h_seq = jnp.pad(h_seq, ((0, T_pad - T), (0, 0), (0, 0)))

    n_layers = len(layers)
    w_ih0, _, b_ih0, b_hh0 = layers[0]
    gi = _gru_input_proj(h_seq, w_ih0, _fold_bias(b_ih0, b_hh0, H))   # bf16

    out = None
    for li in range(n_layers):
        _, w_hh, _, b_hh = layers[li]
        b_hn = b_hh[:, 2 * H:]
        if li + 1 < n_layers:
            w_ih_n, _, b_ih_n, b_hh_n = layers[li + 1]
            gi = gru_layer_seq_fused(gi, w_hh, b_hn, w_ih_n,
                                     _fold_bias(b_ih_n, b_hh_n, H), max_last,
                                     time_tile=TT, batch_tile=TB)
        else:
            out = gru_layer_last(gi, w_hh, b_hn, lengths, max_last,
                                 time_tile=TT, batch_tile=TB)
    if use_abs:
        out = jnp.abs(out)
    return out


# ----------------------------------------------------------------------------
# Pure-JAX f32 reference (for verification)
# ----------------------------------------------------------------------------
def gru_layer_ref(x_seq, w_ih, w_hh, b_ih, b_hh):
    H = w_hh.shape[0]

    def step(h, x):
        gi = x @ w_ih + b_ih
        gh = h @ w_hh + b_hh
        r = jax.nn.sigmoid(gi[:, :H] + gh[:, :H])
        z = jax.nn.sigmoid(gi[:, H:2 * H] + gh[:, H:2 * H])
        n = jnp.tanh(gi[:, 2 * H:] + r * gh[:, 2 * H:])
        h_new = (1.0 - z) * n + z * h
        return h_new, h_new

    h0 = jnp.zeros((x_seq.shape[1], H), jnp.float32)
    _, outs = jax.lax.scan(step, h0, x_seq)
    return outs


def encoder_text_ref(params, x, lengths, use_abs=False):
    embed, layers = params
    h_seq = jnp.take(embed, x.T, axis=0)
    for (w_ih, w_hh, b_ih, b_hh) in layers:
        h_seq = gru_layer_ref(h_seq, w_ih, w_hh, b_ih, b_hh)
    B = x.shape[0]
    sel = h_seq[lengths - 1, jnp.arange(B)]                   # (B, H)
    norm = jnp.sqrt(jnp.sum(sel * sel, axis=1, keepdims=True)) + 1e-8
    out = sel / norm
    return jnp.abs(out) if use_abs else out


# ----------------------------------------------------------------------------
if __name__ == "__main__":
    vocab_size, word_dim, embed_size, num_layers = 50, 16, 32, 2
    # T=20 with time_tile=8 -> padded to 24 (3 time tiles): exercises the
    # cross-tile hidden carry, the time padding, and the fully-padded-tile
    # skip path (max length 14 < 16, so the last tile is skipped).
    B, T = 2, 20

    key = jax.random.PRNGKey(0)
    kp, kx = jax.random.split(key)
    params = init_params(kp, vocab_size, word_dim, embed_size, num_layers)

    x = jax.random.randint(kx, (B, T), 0, vocab_size, dtype=jnp.int32)
    lengths = jnp.array([14, 5], dtype=jnp.int32)  # descending, as pack_padded requires

    out = encoder_text_forward(params, x, lengths, use_abs=False, time_tile=8)
    out = jax.block_until_ready(out)

    ref = encoder_text_ref(params, x, lengths, use_abs=False)
    assert out.shape == (B, embed_size)
    # kernel uses bf16 gi stream and bf16 MXU operands with f32 accumulation;
    # the reference is pure f32
    assert jnp.allclose(out, ref, atol=3e-2, rtol=3e-2), "mismatch vs JAX reference"

    print("KERNEL_OK")
</pallas_src>

<mosaic_0001>
module attributes {stable_mosaic.version = 11 : i64} {
  func.func @gru_last_kernel(%arg0: i32, %arg1: i32, %arg2: memref<1xi32, #tpu.memory_space<smem>>, %arg3: memref<8x2x96xbf16, #tpu.memory_space<vmem>>, %arg4: memref<2x1xi32, #tpu.memory_space<vmem>>, %arg5: memref<32x96xbf16, #tpu.memory_space<any>>, %arg6: memref<1x32xf32, #tpu.memory_space<any>>, %arg7: memref<2x32xf32, #tpu.memory_space<vmem>>, %arg8: memref<2x32xf32, #tpu.memory_space<vmem>>, %arg9: memref<2x32xf32, #tpu.memory_space<vmem>>, %arg10: memref<32x96xbf16, #tpu.memory_space<vmem>>, %arg11: memref<1x32xf32, #tpu.memory_space<vmem>>, %arg12: memref<2x!tpu.dma_semaphore, #tpu.memory_space<semaphore_mem>>) attributes {dimension_semantics = [#tpu.dimension_semantics<parallel>, #tpu.dimension_semantics<arbitrary>], iteration_bounds = array<i64: 1, 3>, scalar_prefetch = 1 : i64, scratch_operands = 5 : i64, tpu.core_type = #tpu.core_type<tc>, window_params = [{transform_indices = @transform_0, window_bounds = array<i64: 8, 2, 96>}, {transform_indices = @transform_1, window_bounds = array<i64: 2, 1>}, {}, {}, {transform_indices = @transform_4, window_bounds = array<i64: 2, 32>}]} {
    %c0_i32 = arith.constant 0 : i32
    %0 = arith.cmpi eq, %arg1, %c0_i32 : i32
    %1 = arith.extui %0 : i1 to i32
    %c0_i32_0 = arith.constant 0 : i32
    %2 = arith.cmpi ne, %1, %c0_i32_0 : i32
    scf.if %2 {
      %c0_i32_4 = arith.constant 0 : i32
      %13 = tpu.memref_slice %arg12[%c0_i32_4] : memref<2x!tpu.dma_semaphore, #tpu.memory_space<semaphore_mem>> -> memref<1x!tpu.dma_semaphore, #tpu.memory_space<semaphore_mem>>
      %14 = tpu.memref_squeeze %13 : memref<1x!tpu.dma_semaphore, #tpu.memory_space<semaphore_mem>> -> memref<!tpu.dma_semaphore, #tpu.memory_space<semaphore_mem>>
      tpu.enqueue_dma source(%arg5 : memref<32x96xbf16, #tpu.memory_space<any>>) target(%arg10 : memref<32x96xbf16, #tpu.memory_space<vmem>>) target_semaphore(%14 : memref<!tpu.dma_semaphore, #tpu.memory_space<semaphore_mem>>)
      %c1_i32 = arith.constant 1 : i32
      %15 = tpu.memref_slice %arg12[%c1_i32] : memref<2x!tpu.dma_semaphore, #tpu.memory_space<semaphore_mem>> -> memref<1x!tpu.dma_semaphore, #tpu.memory_space<semaphore_mem>>
      %16 = tpu.memref_squeeze %15 : memref<1x!tpu.dma_semaphore, #tpu.memory_space<semaphore_mem>> -> memref<!tpu.dma_semaphore, #tpu.memory_space<semaphore_mem>>
      tpu.enqueue_dma source(%arg6 : memref<1x32xf32, #tpu.memory_space<any>>) target(%arg11 : memref<1x32xf32, #tpu.memory_space<vmem>>) target_semaphore(%16 : memref<!tpu.dma_semaphore, #tpu.memory_space<semaphore_mem>>)
      %c0_i32_5 = arith.constant 0 : i32
      %17 = tpu.memref_slice %arg12[%c0_i32_5] : memref<2x!tpu.dma_semaphore, #tpu.memory_space<semaphore_mem>> -> memref<1x!tpu.dma_semaphore, #tpu.memory_space<semaphore_mem>>
      %18 = tpu.memref_squeeze %17 : memref<1x!tpu.dma_semaphore, #tpu.memory_space<semaphore_mem>> -> memref<!tpu.dma_semaphore, #tpu.memory_space<semaphore_mem>>
      tpu.wait_dma2 semaphore(%18 : memref<!tpu.dma_semaphore, #tpu.memory_space<semaphore_mem>>) src(%arg5 : memref<32x96xbf16, #tpu.memory_space<any>>) dst(%arg10 : memref<32x96xbf16, #tpu.memory_space<vmem>>)
      %c1_i32_6 = arith.constant 1 : i32
      %19 = tpu.memref_slice %arg12[%c1_i32_6] : memref<2x!tpu.dma_semaphore, #tpu.memory_space<semaphore_mem>> -> memref<1x!tpu.dma_semaphore, #tpu.memory_space<semaphore_mem>>
      %20 = tpu.memref_squeeze %19 : memref<1x!tpu.dma_semaphore, #tpu.memory_space<semaphore_mem>> -> memref<!tpu.dma_semaphore, #tpu.memory_space<semaphore_mem>>
      tpu.wait_dma2 semaphore(%20 : memref<!tpu.dma_semaphore, #tpu.memory_space<semaphore_mem>>) src(%arg6 : memref<1x32xf32, #tpu.memory_space<any>>) dst(%arg11 : memref<1x32xf32, #tpu.memory_space<vmem>>)
      %cst = arith.constant 0.000000e+00 : f32
      %21 = vector.broadcast %cst : f32 to vector<2x32xf32>
      %c0_7 = arith.constant 0 : index
      %c0_8 = arith.constant 0 : index
      %22 = vector.load %arg8[%c0_7, %c0_8] : memref<2x32xf32, #tpu.memory_space<vmem>>, vector<2x32xf32>
      tpu.vector_store %arg8[%c0_7, %c0_8], %21 {strides = array<i32>} : memref<2x32xf32, #tpu.memory_space<vmem>>, vector<2x32xf32>,
      %cst_9 = arith.constant 0.000000e+00 : f32
      %23 = vector.broadcast %cst_9 : f32 to vector<2x32xf32>
      %c0_10 = arith.constant 0 : index
      %c0_11 = arith.constant 0 : index
      %24 = vector.load %arg9[%c0_10, %c0_11] : memref<2x32xf32, #tpu.memory_space<vmem>>, vector<2x32xf32>
      tpu.vector_store %arg9[%c0_10, %c0_11], %23 {strides = array<i32>} : memref<2x32xf32, #tpu.memory_space<vmem>>, vector<2x32xf32>,
    } else {
    }
    %c8_i32 = arith.constant 8 : i32
    %3 = arith.muli %arg1, %c8_i32 : i32
    %4 = arith.index_cast %arg0 : i32 to index
    %5 = memref.load %arg2[%4] : memref<1xi32, #tpu.memory_space<smem>>
    %6 = arith.cmpi sle, %3, %5 : i32
    %c0 = arith.constant 0 : index
    %c0_1 = arith.constant 0 : index
    %7 = vector.load %arg4[%c0, %c0_1] : memref<2x1xi32, #tpu.memory_space<vmem>>, vector<2x1xi32>
    %8 = arith.extui %6 : i1 to i32
    %c0_i32_2 = arith.constant 0 : i32
    %9 = arith.cmpi ne, %8, %c0_i32_2 : i32
    scf.if %9 {
      %c0_4 = arith.constant 0 : index
      %c0_5 = arith.constant 0 : index
      %13 = vector.load %arg10[%c0_4, %c0_5] : memref<32x96xbf16, #tpu.memory_space<vmem>>, vector<32x96xbf16>
      %c0_6 = arith.constant 0 : index
      %c0_7 = arith.constant 0 : index
      %14 = vector.load %arg11[%c0_6, %c0_7] : memref<1x32xf32, #tpu.memory_space<vmem>>, vector<1x32xf32>
      %15 = vector.shape_cast %14 : vector<1x32xf32> to vector<1x32xf32>
      %16 = vector.broadcast %15 : vector<1x32xf32> to vector<2x32xf32>
      %c0_8 = arith.constant 0 : index
      %c0_9 = arith.constant 0 : index
      %17 = vector.load %arg8[%c0_8, %c0_9] : memref<2x32xf32, #tpu.memory_space<vmem>>, vector<2x32xf32>
      %c0_10 = arith.constant 0 : index
      %c0_11 = arith.constant 0 : index
      %18 = vector.load %arg9[%c0_10, %c0_11] : memref<2x32xf32, #tpu.memory_space<vmem>>, vector<2x32xf32>
      %c0_i32_12 = arith.constant 0 : i32
      %19 = arith.index_cast %c0_i32_12 : i32 to index
      %c0_13 = arith.constant 0 : index
      %c0_14 = arith.constant 0 : index
      %20 = vector.load %arg3[%19, %c0_13, %c0_14] : memref<8x2x96xbf16, #tpu.memory_space<vmem>>, vector<1x2x96xbf16>
      %21 = vector.shape_cast %20 : vector<1x2x96xbf16> to vector<2x96xbf16>
      %22 = arith.truncf %17 : vector<2x32xf32> to vector<2x32xbf16>
      %cst = arith.constant dense<0.000000e+00> : vector<2x96xf32>
      %23 = tpu.matmul %22, %13, %cst {dimension_numbers = #tpu.dot_dimension_numbers<[1], [0], [0], [1], [0, 0, 1, 1], [], []>} : vector<2x32xbf16>, vector<32x96xbf16>, vector<2x96xf32> -> vector<2x96xf32>
      %24 = vector.extract_strided_slice %21 {offsets = [0, 0], sizes = [2, 32], strides = [1, 1]} : vector<2x96xbf16> to vector<2x32xbf16>
      %25 = vector.extract_strided_slice %23 {offsets = [0, 0], sizes = [2, 32], strides = [1, 1]} : vector<2x96xf32> to vector<2x32xf32>
      %26 = arith.extf %24 : vector<2x32xbf16> to vector<2x32xf32>
      %27 = arith.addf %26, %25 : vector<2x32xf32>
      %cst_15 = arith.constant 5.000000e-01 : f32
      %28 = vector.broadcast %cst_15 : f32 to vector<2x32xf32>
      %29 = arith.mulf %28, %27 : vector<2x32xf32>
      %30 = math.tanh %29 : vector<2x32xf32>
      %cst_16 = arith.constant 5.000000e-01 : f32
      %31 = vector.broadcast %cst_16 : f32 to vector<2x32xf32>
      %32 = arith.mulf %31, %30 : vector<2x32xf32>
      %cst_17 = arith.constant 5.000000e-01 : f32
      %33 = vector.broadcast %cst_17 : f32 to vector<2x32xf32>
      %34 = arith.addf %32, %33 : vector<2x32xf32>
      %35 = vector.extract_strided_slice %21 {offsets = [0, 32], sizes = [2, 32], strides = [1, 1]} : vector<2x96xbf16> to vector<2x32xbf16>
      %36 = vector.extract_strided_slice %23 {offsets = [0, 32], sizes = [2, 32], strides = [1, 1]} : vector<2x96xf32> to vector<2x32xf32>
      %37 = arith.extf %35 : vector<2x32xbf16> to vector<2x32xf32>
      %38 = arith.addf %37, %36 : vector<2x32xf32>
      %cst_18 = arith.constant 5.000000e-01 : f32
      %39 = vector.broadcast %cst_18 : f32 to vector<2x32xf32>
      %40 = arith.mulf %39, %38 : vector<2x32xf32>
      %41 = math.tanh %40 : vector<2x32xf32>
      %cst_19 = arith.constant 5.000000e-01 : f32
      %42 = vector.broadcast %cst_19 : f32 to vector<2x32xf32>
      %43 = arith.mulf %42, %41 : vector<2x32xf32>
      %cst_20 = arith.constant 5.000000e-01 : f32
      %44 = vector.broadcast %cst_20 : f32 to vector<2x32xf32>
      %45 = arith.addf %43, %44 : vector<2x32xf32>
      %46 = vector.extract_strided_slice %21 {offsets = [0, 64], sizes = [2, 32], strides = [1, 1]} : vector<2x96xbf16> to vector<2x32xbf16>
      %47 = vector.extract_strided_slice %23 {offsets = [0, 64], sizes = [2, 32], strides = [1, 1]} : vector<2x96xf32> to vector<2x32xf32>
      %48 = arith.addf %47, %16 : vector<2x32xf32>
      %49 = arith.mulf %34, %48 : vector<2x32xf32>
      %50 = arith.extf %46 : vector<2x32xbf16> to vector<2x32xf32>
      %51 = arith.addf %50, %49 : vector<2x32xf32>
      %52 = math.tanh %51 : vector<2x32xf32>
      %cst_21 = arith.constant 1.000000e+00 : f32
      %53 = vector.broadcast %cst_21 : f32 to vector<2x32xf32>
      %54 = arith.subf %53, %45 : vector<2x32xf32>
      %55 = arith.mulf %54, %52 : vector<2x32xf32>
      %56 = arith.mulf %45, %17 : vector<2x32xf32>
      %57 = arith.addf %55, %56 : vector<2x32xf32>
      %58 = arith.addi %3, %c0_i32_12 : i32
      %59 = vector.broadcast %58 : i32 to vector<2x1xi32>
      %60 = arith.cmpi eq, %7, %59 : vector<2x1xi32>
      %61 = vector.shape_cast %60 : vector<2x1xi1> to vector<2x1xi1>
      %62 = vector.broadcast %61 : vector<2x1xi1> to vector<2x32xi1>
      %63 = arith.select %62, %57, %18 : vector<2x32xi1>, vector<2x32xf32>
      %c1_i32 = arith.constant 1 : i32
      %64 = arith.index_cast %c1_i32 : i32 to index
      %c0_22 = arith.constant 0 : index
      %c0_23 = arith.constant 0 : index
      %65 = vector.load %arg3[%64, %c0_22, %c0_23] : memref<8x2x96xbf16, #tpu.memory_space<vmem>>, vector<1x2x96xbf16>
      %66 = vector.shape_cast %65 : vector<1x2x96xbf16> to vector<2x96xbf16>
      %67 = arith.truncf %57 : vector<2x32xf32> to vector<2x32xbf16>
      %cst_24 = arith.constant dense<0.000000e+00> : vector<2x96xf32>
      %68 = tpu.matmul %67, %13, %cst_24 {dimension_numbers = #tpu.dot_dimension_numbers<[1], [0], [0], [1], [0, 0, 1, 1], [], []>} : vector<2x32xbf16>, vector<32x96xbf16>, vector<2x96xf32> -> vector<2x96xf32>
      %69 = vector.extract_strided_slice %66 {offsets = [0, 0], sizes = [2, 32], strides = [1, 1]} : vector<2x96xbf16> to vector<2x32xbf16>
      %70 = vector.extract_strided_slice %68 {offsets = [0, 0], sizes = [2, 32], strides = [1, 1]} : vector<2x96xf32> to vector<2x32xf32>
      %71 = arith.extf %69 : vector<2x32xbf16> to vector<2x32xf32>
      %72 = arith.addf %71, %70 : vector<2x32xf32>
      %cst_25 = arith.constant 5.000000e-01 : f32
      %73 = vector.broadcast %cst_25 : f32 to vector<2x32xf32>
      %74 = arith.mulf %73, %72 : vector<2x32xf32>
      %75 = math.tanh %74 : vector<2x32xf32>
      %cst_26 = arith.constant 5.000000e-01 : f32
      %76 = vector.broadcast %cst_26 : f32 to vector<2x32xf32>
      %77 = arith.mulf %76, %75 : vector<2x32xf32>
      %cst_27 = arith.constant 5.000000e-01 : f32
      %78 = vector.broadcast %cst_27 : f32 to vector<2x32xf32>
      %79 = arith.addf %77, %78 : vector<2x32xf32>
      %80 = vector.extract_strided_slice %66 {offsets = [0, 32], sizes = [2, 32], strides = [1, 1]} : vector<2x96xbf16> to vector<2x32xbf16>
      %81 = vector.extract_strided_slice %68 {offsets = [0, 32], sizes = [2, 32], strides = [1, 1]} : vector<2x96xf32> to vector<2x32xf32>
      %82 = arith.extf %80 : vector<2x32xbf16> to vector<2x32xf32>
      %83 = arith.addf %82, %81 : vector<2x32xf32>
      %cst_28 = arith.constant 5.000000e-01 : f32
      %84 = vector.broadcast %cst_28 : f32 to vector<2x32xf32>
      %85 = arith.mulf %84, %83 : vector<2x32xf32>
      %86 = math.tanh %85 : vector<2x32xf32>
      %cst_29 = arith.constant 5.000000e-01 : f32
      %87 = vector.broadcast %cst_29 : f32 to vector<2x32xf32>
      %88 = arith.mulf %87, %86 : vector<2x32xf32>
      %cst_30 = arith.constant 5.000000e-01 : f32
      %89 = vector.broadcast %cst_30 : f32 to vector<2x32xf32>
      %90 = arith.addf %88, %89 : vector<2x32xf32>
      %91 = vector.extract_strided_slice %66 {offsets = [0, 64], sizes = [2, 32], strides = [1, 1]} : vector<2x96xbf16> to vector<2x32xbf16>
      %92 = vector.extract_strided_slice %68 {offsets = [0, 64], sizes = [2, 32], strides = [1, 1]} : vector<2x96xf32> to vector<2x32xf32>
      %93 = arith.addf %92, %16 : vector<2x32xf32>
      %94 = arith.mulf %79, %93 : vector<2x32xf32>
      %95 = arith.extf %91 : vector<2x32xbf16> to vector<2x32xf32>
      %96 = arith.addf %95, %94 : vector<2x32xf32>
      %97 = math.tanh %96 : vector<2x32xf32>
      %cst_31 = arith.constant 1.000000e+00 : f32
      %98 = vector.broadcast %cst_31 : f32 to vector<2x32xf32>
      %99 = arith.subf %98, %90 : vector<2x32xf32>
      %100 = arith.mulf %99, %97 : vector<2x32xf32>
      %101 = arith.mulf %90, %57 : vector<2x32xf32>
      %102 = arith.addf %100, %101 : vector<2x32xf32>
      %103 = arith.addi %3, %c1_i32 : i32
      %104 = vector.broadcast %103 : i32 to vector<2x1xi32>
      %105 = arith.cmpi eq, %7, %104 : vector<2x1xi32>
      %106 = vector.shape_cast %105 : vector<2x1xi1> to vector<2x1xi1>
      %107 = vector.broadcast %106 : vector<2x1xi1> to vector<2x32xi1>
      %108 = arith.select %107, %102, %63 : vector<2x32xi1>, vector<2x32xf32>
      %c2_i32_32 = arith.constant 2 : i32
      %109 = arith.index_cast %c2_i32_32 : i32 to index
      %c0_33 = arith.constant 0 : index
      %c0_34 = arith.constant 0 : index
      %110 = vector.load %arg3[%109, %c0_33, %c0_34] : memref<8x2x96xbf16, #tpu.memory_space<vmem>>, vector<1x2x96xbf16>
      %111 = vector.shape_cast %110 : vector<1x2x96xbf16> to vector<2x96xbf16>
      %112 = arith.truncf %102 : vector<2x32xf32> to vector<2x32xbf16>
      %cst_35 = arith.constant dense<0.000000e+00> : vector<2x96xf32>
      %113 = tpu.matmul %112, %13, %cst_35 {dimension_numbers = #tpu.dot_dimension_numbers<[1], [0], [0], [1], [0, 0, 1, 1], [], []>} : vector<2x32xbf16>, vector<32x96xbf16>, vector<2x96xf32> -> vector<2x96xf32>
      %114 = vector.extract_strided_slice %111 {offsets = [0, 0], sizes = [2, 32], strides = [1, 1]} : vector<2x96xbf16> to vector<2x32xbf16>
      %115 = vector.extract_strided_slice %113 {offsets = [0, 0], sizes = [2, 32], strides = [1, 1]} : vector<2x96xf32> to vector<2x32xf32>
      %116 = arith.extf %114 : vector<2x32xbf16> to vector<2x32xf32>
      %117 = arith.addf %116, %115 : vector<2x32xf32>
      %cst_36 = arith.constant 5.000000e-01 : f32
      %118 = vector.broadcast %cst_36 : f32 to vector<2x32xf32>
      %119 = arith.mulf %118, %117 : vector<2x32xf32>
      %120 = math.tanh %119 : vector<2x32xf32>
      %cst_37 = arith.constant 5.000000e-01 : f32
      %121 = vector.broadcast %cst_37 : f32 to vector<2x32xf32>
      %122 = arith.mulf %121, %120 : vector<2x32xf32>
      %cst_38 = arith.constant 5.000000e-01 : f32
      %123 = vector.broadcast %cst_38 : f32 to vector<2x32xf32>
      %124 = arith.addf %122, %123 : vector<2x32xf32>
      %125 = vector.extract_strided_slice %111 {offsets = [0, 32], sizes = [2, 32], strides = [1, 1]} : vector<2x96xbf16> to vector<2x32xbf16>
      %126 = vector.extract_strided_slice %113 {offsets = [0, 32], sizes = [2, 32], strides = [1, 1]} : vector<2x96xf32> to vector<2x32xf32>
      %127 = arith.extf %125 : vector<2x32xbf16> to vector<2x32xf32>
      %128 = arith.addf %127, %126 : vector<2x32xf32>
      %cst_39 = arith.constant 5.000000e-01 : f32
      %129 = vector.broadcast %cst_39 : f32 to vector<2x32xf32>
      %130 = arith.mulf %129, %128 : vector<2x32xf32>
      %131 = math.tanh %130 : vector<2x32xf32>
      %cst_40 = arith.constant 5.000000e-01 : f32
      %132 = vector.broadcast %cst_40 : f32 to vector<2x32xf32>
      %133 = arith.mulf %132, %131 : vector<2x32xf32>
      %cst_41 = arith.constant 5.000000e-01 : f32
      %134 = vector.broadcast %cst_41 : f32 to vector<2x32xf32>
      %135 = arith.addf %133, %134 : vector<2x32xf32>
      %136 = vector.extract_strided_slice %111 {offsets = [0, 64], sizes = [2, 32], strides = [1, 1]} : vector<2x96xbf16> to vector<2x32xbf16>
      %137 = vector.extract_strided_slice %113 {offsets = [0, 64], sizes = [2, 32], strides = [1, 1]} : vector<2x96xf32> to vector<2x32xf32>
      %138 = arith.addf %137, %16 : vector<2x32xf32>
      %139 = arith.mulf %124, %138 : vector<2x32xf32>
      %140 = arith.extf %136 : vector<2x32xbf16> to vector<2x32xf32>
      %141 = arith.addf %140, %139 : vector<2x32xf32>
      %142 = math.tanh %141 : vector<2x32xf32>
      %cst_42 = arith.constant 1.000000e+00 : f32
      %143 = vector.broadcast %cst_42 : f32 to vector<2x32xf32>
      %144 = arith.subf %143, %135 : vector<2x32xf32>
      %145 = arith.mulf %144, %142 : vector<2x32xf32>
      %146 = arith.mulf %135, %102 : vector<2x32xf32>
      %147 = arith.addf %145, %146 : vector<2x32xf32>
      %148 = arith.addi %3, %c2_i32_32 : i32
      %149 = vector.broadcast %148 : i32 to vector<2x1xi32>
      %150 = arith.cmpi eq, %7, %149 : vector<2x1xi32>
      %151 = vector.shape_cast %150 : vector<2x1xi1> to vector<2x1xi1>
      %152 = vector.broadcast %151 : vector<2x1xi1> to vector<2x32xi1>
      %153 = arith.select %152, %147, %108 : vector<2x32xi1>, vector<2x32xf32>
      %c3_i32 = arith.constant 3 : i32
      %154 = arith.index_cast %c3_i32 : i32 to index
      %c0_43 = arith.constant 0 : index
      %c0_44 = arith.constant 0 : index
      %155 = vector.load %arg3[%154, %c0_43, %c0_44] : memref<8x2x96xbf16, #tpu.memory_space<vmem>>, vector<1x2x96xbf16>
      %156 = vector.shape_cast %155 : vector<1x2x96xbf16> to vector<2x96xbf16>
      %157 = arith.truncf %147 : vector<2x32xf32> to vector<2x32xbf16>
      %cst_45 = arith.constant dense<0.000000e+00> : vector<2x96xf32>
      %158 = tpu.matmul %157, %13, %cst_45 {dimension_numbers = #tpu.dot_dimension_numbers<[1], [0], [0], [1], [0, 0, 1, 1], [], []>} : vector<2x32xbf16>, vector<32x96xbf16>, vector<2x96xf32> -> vector<2x96xf32>
      %159 = vector.extract_strided_slice %156 {offsets = [0, 0], sizes = [2, 32], strides = [1, 1]} : vector<2x96xbf16> to vector<2x32xbf16>
      %160 = vector.extract_strided_slice %158 {offsets = [0, 0], sizes = [2, 32], strides = [1, 1]} : vector<2x96xf32> to vector<2x32xf32>
      %161 = arith.extf %159 : vector<2x32xbf16> to vector<2x32xf32>
      %162 = arith.addf %161, %160 : vector<2x32xf32>
      %cst_46 = arith.constant 5.000000e-01 : f32
      %163 = vector.broadcast %cst_46 : f32 to vector<2x32xf32>
      %164 = arith.mulf %163, %162 : vector<2x32xf32>
      %165 = math.tanh %164 : vector<2x32xf32>
      %cst_47 = arith.constant 5.000000e-01 : f32
      %166 = vector.broadcast %cst_47 : f32 to vector<2x32xf32>
      %167 = arith.mulf %166, %165 : vector<2x32xf32>
      %cst_48 = arith.constant 5.000000e-01 : f32
      %168 = vector.broadcast %cst_48 : f32 to vector<2x32xf32>
      %169 = arith.addf %167, %168 : vector<2x32xf32>
      %170 = vector.extract_strided_slice %156 {offsets = [0, 32], sizes = [2, 32], strides = [1, 1]} : vector<2x96xbf16> to vector<2x32xbf16>
      %171 = vector.extract_strided_slice %158 {offsets = [0, 32], sizes = [2, 32], strides = [1, 1]} : vector<2x96xf32> to vector<2x32xf32>
      %172 = arith.extf %170 : vector<2x32xbf16> to vector<2x32xf32>
      %173 = arith.addf %172, %171 : vector<2x32xf32>
      %cst_49 = arith.constant 5.000000e-01 : f32
      %174 = vector.broadcast %cst_49 : f32 to vector<2x32xf32>
      %175 = arith.mulf %174, %173 : vector<2x32xf32>
      %176 = math.tanh %175 : vector<2x32xf32>
      %cst_50 = arith.constant 5.000000e-01 : f32
      %177 = vector.broadcast %cst_50 : f32 to vector<2x32xf32>
      %178 = arith.mulf %177, %176 : vector<2x32xf32>
      %cst_51 = arith.constant 5.000000e-01 : f32
      %179 = vector.broadcast %cst_51 : f32 to vector<2x32xf32>
      %180 = arith.addf %178, %179 : vector<2x32xf32>
      %181 = vector.extract_strided_slice %156 {offsets = [0, 64], sizes = [2, 32], strides = [1, 1]} : vector<2x96xbf16> to vector<2x32xbf16>
      %182 = vector.extract_strided_slice %158 {offsets = [0, 64], sizes = [2, 32], strides = [1, 1]} : vector<2x96xf32> to vector<2x32xf32>
      %183 = arith.addf %182, %16 : vector<2x32xf32>
      %184 = arith.mulf %169, %183 : vector<2x32xf32>
      %185 = arith.extf %181 : vector<2x32xbf16> to vector<2x32xf32>
      %186 = arith.addf %185, %184 : vector<2x32xf32>
      %187 = math.tanh %186 : vector<2x32xf32>
      %cst_52 = arith.constant 1.000000e+00 : f32
      %188 = vector.broadcast %cst_52 : f32 to vector<2x32xf32>
      %189 = arith.subf %188, %180 : vector<2x32xf32>
      %190 = arith.mulf %189, %187 : vector<2x32xf32>
      %191 = arith.mulf %180, %147 : vector<2x32xf32>
      %192 = arith.addf %190, %191 : vector<2x32xf32>
      %193 = arith.addi %3, %c3_i32 : i32
      %194 = vector.broadcast %193 : i32 to vector<2x1xi32>
      %195 = arith.cmpi eq, %7, %194 : vector<2x1xi32>
      %196 = vector.shape_cast %195 : vector<2x1xi1> to vector<2x1xi1>
      %197 = vector.broadcast %196 : vector<2x1xi1> to vector<2x32xi1>
      %198 = arith.select %197, %192, %153 : vector<2x32xi1>, vector<2x32xf32>
      %c4_i32 = arith.constant 4 : i32
      %199 = arith.index_cast %c4_i32 : i32 to index
      %c0_53 = arith.constant 0 : index
      %c0_54 = arith.constant 0 : index
      %200 = vector.load %arg3[%199, %c0_53, %c0_54] : memref<8x2x96xbf16, #tpu.memory_space<vmem>>, vector<1x2x96xbf16>
      %201 = vector.shape_cast %200 : vector<1x2x96xbf16> to vector<2x96xbf16>
      %202 = arith.truncf %192 : vector<2x32xf32> to vector<2x32xbf16>
      %cst_55 = arith.constant dense<0.000000e+00> : vector<2x96xf32>
      %203 = tpu.matmul %202, %13, %cst_55 {dimension_numbers = #tpu.dot_dimension_numbers<[1], [0], [0], [1], [0, 0, 1, 1], [], []>} : vector<2x32xbf16>, vector<32x96xbf16>, vector<2x96xf32> -> vector<2x96xf32>
      %204 = vector.extract_strided_slice %201 {offsets = [0, 0], sizes = [2, 32], strides = [1, 1]} : vector<2x96xbf16> to vector<2x32xbf16>
      %205 = vector.extract_strided_slice %203 {offsets = [0, 0], sizes = [2, 32], strides = [1, 1]} : vector<2x96xf32> to vector<2x32xf32>
      %206 = arith.extf %204 : vector<2x32xbf16> to vector<2x32xf32>
      %207 = arith.addf %206, %205 : vector<2x32xf32>
      %cst_56 = arith.constant 5.000000e-01 : f32
      %208 = vector.broadcast %cst_56 : f32 to vector<2x32xf32>
      %209 = arith.mulf %208, %207 : vector<2x32xf32>
      %210 = math.tanh %209 : vector<2x32xf32>
      %cst_57 = arith.constant 5.000000e-01 : f32
      %211 = vector.broadcast %cst_57 : f32 to vector<2x32xf32>
      %212 = arith.mulf %211, %210 : vector<2x32xf32>
      %cst_58 = arith.constant 5.000000e-01 : f32
      %213 = vector.broadcast %cst_58 : f32 to vector<2x32xf32>
      %214 = arith.addf %212, %213 : vector<2x32xf32>
      %215 = vector.extract_strided_slice %201 {offsets = [0, 32], sizes = [2, 32], strides = [1, 1]} : vector<2x96xbf16> to vector<2x32xbf16>
      %216 = vector.extract_strided_slice %203 {offsets = [0, 32], sizes = [2, 32], strides = [1, 1]} : vector<2x96xf32> to vector<2x32xf32>
      %217 = arith.extf %215 : vector<2x32xbf16> to vector<2x32xf32>
      %218 = arith.addf %217, %216 : vector<2x32xf32>
      %cst_59 = arith.constant 5.000000e-01 : f32
      %219 = vector.broadcast %cst_59 : f32 to vector<2x32xf32>
      %220 = arith.mulf %219, %218 : vector<2x32xf32>
      %221 = math.tanh %220 : vector<2x32xf32>
      %cst_60 = arith.constant 5.000000e-01 : f32
      %222 = vector.broadcast %cst_60 : f32 to vector<2x32xf32>
      %223 = arith.mulf %222, %221 : vector<2x32xf32>
      %cst_61 = arith.constant 5.000000e-01 : f32
      %224 = vector.broadcast %cst_61 : f32 to vector<2x32xf32>
      %225 = arith.addf %223, %224 : vector<2x32xf32>
      %226 = vector.extract_strided_slice %201 {offsets = [0, 64], sizes = [2, 32], strides = [1, 1]} : vector<2x96xbf16> to vector<2x32xbf16>
      %227 = vector.extract_strided_slice %203 {offsets = [0, 64], sizes = [2, 32], strides = [1, 1]} : vector<2x96xf32> to vector<2x32xf32>
      %228 = arith.addf %227, %16 : vector<2x32xf32>
      %229 = arith.mulf %214, %228 : vector<2x32xf32>
      %230 = arith.extf %226 : vector<2x32xbf16> to vector<2x32xf32>
      %231 = arith.addf %230, %229 : vector<2x32xf32>
      %232 = math.tanh %231 : vector<2x32xf32>
      %cst_62 = arith.constant 1.000000e+00 : f32
      %233 = vector.broadcast %cst_62 : f32 to vector<2x32xf32>
      %234 = arith.subf %233, %225 : vector<2x32xf32>
      %235 = arith.mulf %234, %232 : vector<2x32xf32>
      %236 = arith.mulf %225, %192 : vector<2x32xf32>
      %237 = arith.addf %235, %236 : vector<2x32xf32>
      %238 = arith.addi %3, %c4_i32 : i32
      %239 = vector.broadcast %238 : i32 to vector<2x1xi32>
      %240 = arith.cmpi eq, %7, %239 : vector<2x1xi32>
      %241 = vector.shape_cast %240 : vector<2x1xi1> to vector<2x1xi1>
      %242 = vector.broadcast %241 : vector<2x1xi1> to vector<2x32xi1>
      %243 = arith.select %242, %237, %198 : vector<2x32xi1>, vector<2x32xf32>
      %c5_i32 = arith.constant 5 : i32
      %244 = arith.index_cast %c5_i32 : i32 to index
      %c0_63 = arith.constant 0 : index
      %c0_64 = arith.constant 0 : index
      %245 = vector.load %arg3[%244, %c0_63, %c0_64] : memref<8x2x96xbf16, #tpu.memory_space<vmem>>, vector<1x2x96xbf16>
      %246 = vector.shape_cast %245 : vector<1x2x96xbf16> to vector<2x96xbf16>
      %247 = arith.truncf %237 : vector<2x32xf32> to vector<2x32xbf16>
      %cst_65 = arith.constant dense<0.000000e+00> : vector<2x96xf32>
      %248 = tpu.matmul %247, %13, %cst_65 {dimension_numbers = #tpu.dot_dimension_numbers<[1], [0], [0], [1], [0, 0, 1, 1], [], []>} : vector<2x32xbf16>, vector<32x96xbf16>, vector<2x96xf32> -> vector<2x96xf32>
      %249 = vector.extract_strided_slice %246 {offsets = [0, 0], sizes = [2, 32], strides = [1, 1]} : vector<2x96xbf16> to vector<2x32xbf16>
      %250 = vector.extract_strided_slice %248 {offsets = [0, 0], sizes = [2, 32], strides = [1, 1]} : vector<2x96xf32> to vector<2x32xf32>
      %251 = arith.extf %249 : vector<2x32xbf16> to vector<2x32xf32>
      %252 = arith.addf %251, %250 : vector<2x32xf32>
      %cst_66 = arith.constant 5.000000e-01 : f32
      %253 = vector.broadcast %cst_66 : f32 to vector<2x32xf32>
      %254 = arith.mulf %253, %252 : vector<2x32xf32>
      %255 = math.tanh %254 : vector<2x32xf32>
      %cst_67 = arith.constant 5.000000e-01 : f32
      %256 = vector.broadcast %cst_67 : f32 to vector<2x32xf32>
      %257 = arith.mulf %256, %255 : vector<2x32xf32>
      %cst_68 = arith.constant 5.000000e-01 : f32
      %258 = vector.broadcast %cst_68 : f32 to vector<2x32xf32>
      %259 = arith.addf %257, %258 : vector<2x32xf32>
      %260 = vector.extract_strided_slice %246 {offsets = [0, 32], sizes = [2, 32], strides = [1, 1]} : vector<2x96xbf16> to vector<2x32xbf16>
      %261 = vector.extract_strided_slice %248 {offsets = [0, 32], sizes = [2, 32], strides = [1, 1]} : vector<2x96xf32> to vector<2x32xf32>
      %262 = arith.extf %260 : vector<2x32xbf16> to vector<2x32xf32>
      %263 = arith.addf %262, %261 : vector<2x32xf32>
      %cst_69 = arith.constant 5.000000e-01 : f32
      %264 = vector.broadcast %cst_69 : f32 to vector<2x32xf32>
      %265 = arith.mulf %264, %263 : vector<2x32xf32>
      %266 = math.tanh %265 : vector<2x32xf32>
      %cst_70 = arith.constant 5.000000e-01 : f32
      %267 = vector.broadcast %cst_70 : f32 to vector<2x32xf32>
      %268 = arith.mulf %267, %266 : vector<2x32xf32>
      %cst_71 = arith.constant 5.000000e-01 : f32
      %269 = vector.broadcast %cst_71 : f32 to vector<2x32xf32>
      %270 = arith.addf %268, %269 : vector<2x32xf32>
      %271 = vector.extract_strided_slice %246 {offsets = [0, 64], sizes = [2, 32], strides = [1, 1]} : vector<2x96xbf16> to vector<2x32xbf16>
      %272 = vector.extract_strided_slice %248 {offsets = [0, 64], sizes = [2, 32], strides = [1, 1]} : vector<2x96xf32> to vector<2x32xf32>
      %273 = arith.addf %272, %16 : vector<2x32xf32>
      %274 = arith.mulf %259, %273 : vector<2x32xf32>
      %275 = arith.extf %271 : vector<2x32xbf16> to vector<2x32xf32>
      %276 = arith.addf %275, %274 : vector<2x32xf32>
      %277 = math.tanh %276 : vector<2x32xf32>
      %cst_72 = arith.constant 1.000000e+00 : f32
      %278 = vector.broadcast %cst_72 : f32 to vector<2x32xf32>
      %279 = arith.subf %278, %270 : vector<2x32xf32>
      %280 = arith.mulf %279, %277 : vector<2x32xf32>
      %281 = arith.mulf %270, %237 : vector<2x32xf32>
      %282 = arith.addf %280, %281 : vector<2x32xf32>
      %283 = arith.addi %3, %c5_i32 : i32
      %284 = vector.broadcast %283 : i32 to vector<2x1xi32>
      %285 = arith.cmpi eq, %7, %284 : vector<2x1xi32>
      %286 = vector.shape_cast %285 : vector<2x1xi1> to vector<2x1xi1>
      %287 = vector.broadcast %286 : vector<2x1xi1> to vector<2x32xi1>
      %288 = arith.select %287, %282, %243 : vector<2x32xi1>, vector<2x32xf32>
      %c6_i32 = arith.constant 6 : i32
      %289 = arith.index_cast %c6_i32 : i32 to index
      %c0_73 = arith.constant 0 : index
      %c0_74 = arith.constant 0 : index
      %290 = vector.load %arg3[%289, %c0_73, %c0_74] : memref<8x2x96xbf16, #tpu.memory_space<vmem>>, vector<1x2x96xbf16>
      %291 = vector.shape_cast %290 : vector<1x2x96xbf16> to vector<2x96xbf16>
      %292 = arith.truncf %282 : vector<2x32xf32> to vector<2x32xbf16>
      %cst_75 = arith.constant dense<0.000000e+00> : vector<2x96xf32>
      %293 = tpu.matmul %292, %13, %cst_75 {dimension_numbers = #tpu.dot_dimension_numbers<[1], [0], [0], [1], [0, 0, 1, 1], [], []>} : vector<2x32xbf16>, vector<32x96xbf16>, vector<2x96xf32> -> vector<2x96xf32>
      %294 = vector.extract_strided_slice %291 {offsets = [0, 0], sizes = [2, 32], strides = [1, 1]} : vector<2x96xbf16> to vector<2x32xbf16>
      %295 = vector.extract_strided_slice %293 {offsets = [0, 0], sizes = [2, 32], strides = [1, 1]} : vector<2x96xf32> to vector<2x32xf32>
      %296 = arith.extf %294 : vector<2x32xbf16> to vector<2x32xf32>
      %297 = arith.addf %296, %295 : vector<2x32xf32>
      %cst_76 = arith.constant 5.000000e-01 : f32
      %298 = vector.broadcast %cst_76 : f32 to vector<2x32xf32>
      %299 = arith.mulf %298, %297 : vector<2x32xf32>
      %300 = math.tanh %299 : vector<2x32xf32>
      %cst_77 = arith.constant 5.000000e-01 : f32
      %301 = vector.broadcast %cst_77 : f32 to vector<2x32xf32>
      %302 = arith.mulf %301, %300 : vector<2x32xf32>
      %cst_78 = arith.constant 5.000000e-01 : f32
      %303 = vector.broadcast %cst_78 : f32 to vector<2x32xf32>
      %304 = arith.addf %302, %303 : vector<2x32xf32>
      %305 = vector.extract_strided_slice %291 {offsets = [0, 32], sizes = [2, 32], strides = [1, 1]} : vector<2x96xbf16> to vector<2x32xbf16>
      %306 = vector.extract_strided_slice %293 {offsets = [0, 32], sizes = [2, 32], strides = [1, 1]} : vector<2x96xf32> to vector<2x32xf32>
      %307 = arith.extf %305 : vector<2x32xbf16> to vector<2x32xf32>
      %308 = arith.addf %307, %306 : vector<2x32xf32>
      %cst_79 = arith.constant 5.000000e-01 : f32
      %309 = vector.broadcast %cst_79 : f32 to vector<2x32xf32>
      %310 = arith.mulf %309, %308 : vector<2x32xf32>
      %311 = math.tanh %310 : vector<2x32xf32>
      %cst_80 = arith.constant 5.000000e-01 : f32
      %312 = vector.broadcast %cst_80 : f32 to vector<2x32xf32>
      %313 = arith.mulf %312, %311 : vector<2x32xf32>
      %cst_81 = arith.constant 5.000000e-01 : f32
      %314 = vector.broadcast %cst_81 : f32 to vector<2x32xf32>
      %315 = arith.addf %313, %314 : vector<2x32xf32>
      %316 = vector.extract_strided_slice %291 {offsets = [0, 64], sizes = [2, 32], strides = [1, 1]} : vector<2x96xbf16> to vector<2x32xbf16>
      %317 = vector.extract_strided_slice %293 {offsets = [0, 64], sizes = [2, 32], strides = [1, 1]} : vector<2x96xf32> to vector<2x32xf32>
      %318 = arith.addf %317, %16 : vector<2x32xf32>
      %319 = arith.mulf %304, %318 : vector<2x32xf32>
      %320 = arith.extf %316 : vector<2x32xbf16> to vector<2x32xf32>
      %321 = arith.addf %320, %319 : vector<2x32xf32>
      %322 = math.tanh %321 : vector<2x32xf32>
      %cst_82 = arith.constant 1.000000e+00 : f32
      %323 = vector.broadcast %cst_82 : f32 to vector<2x32xf32>
      %324 = arith.subf %323, %315 : vector<2x32xf32>
      %325 = arith.mulf %324, %322 : vector<2x32xf32>
      %326 = arith.mulf %315, %282 : vector<2x32xf32>
      %327 = arith.addf %325, %326 : vector<2x32xf32>
      %328 = arith.addi %3, %c6_i32 : i32
      %329 = vector.broadcast %328 : i32 to vector<2x1xi32>
      %330 = arith.cmpi eq, %7, %329 : vector<2x1xi32>
      %331 = vector.shape_cast %330 : vector<2x1xi1> to vector<2x1xi1>
      %332 = vector.broadcast %331 : vector<2x1xi1> to vector<2x32xi1>
      %333 = arith.select %332, %327, %288 : vector<2x32xi1>, vector<2x32xf32>
      %c7_i32 = arith.constant 7 : i32
      %334 = arith.index_cast %c7_i32 : i32 to index
      %c0_83 = arith.constant 0 : index
      %c0_84 = arith.constant 0 : index
      %335 = vector.load %arg3[%334, %c0_83, %c0_84] : memref<8x2x96xbf16, #tpu.memory_space<vmem>>, vector<1x2x96xbf16>
      %336 = vector.shape_cast %335 : vector<1x2x96xbf16> to vector<2x96xbf16>
      %337 = arith.truncf %327 : vector<2x32xf32> to vector<2x32xbf16>
      %cst_85 = arith.constant dense<0.000000e+00> : vector<2x96xf32>
      %338 = tpu.matmul %337, %13, %cst_85 {dimension_numbers = #tpu.dot_dimension_numbers<[1], [0], [0], [1], [0, 0, 1, 1], [], []>} : vector<2x32xbf16>, vector<32x96xbf16>, vector<2x96xf32> -> vector<2x96xf32>
      %339 = vector.extract_strided_slice %336 {offsets = [0, 0], sizes = [2, 32], strides = [1, 1]} : vector<2x96xbf16> to vector<2x32xbf16>
      %340 = vector.extract_strided_slice %338 {offsets = [0, 0], sizes = [2, 32], strides = [1, 1]} : vector<2x96xf32> to vector<2x32xf32>
      %341 = arith.extf %339 : vector<2x32xbf16> to vector<2x32xf32>
      %342 = arith.addf %341, %340 : vector<2x32xf32>
      %cst_86 = arith.constant 5.000000e-01 : f32
      %343 = vector.broadcast %cst_86 : f32 to vector<2x32xf32>
      %344 = arith.mulf %343, %342 : vector<2x32xf32>
      %345 = math.tanh %344 : vector<2x32xf32>
      %cst_87 = arith.constant 5.000000e-01 : f32
      %346 = vector.broadcast %cst_87 : f32 to vector<2x32xf32>
      %347 = arith.mulf %346, %345 : vector<2x32xf32>
      %cst_88 = arith.constant 5.000000e-01 : f32
      %348 = vector.broadcast %cst_88 : f32 to vector<2x32xf32>
      %349 = arith.addf %347, %348 : vector<2x32xf32>
      %350 = vector.extract_strided_slice %336 {offsets = [0, 32], sizes = [2, 32], strides = [1, 1]} : vector<2x96xbf16> to vector<2x32xbf16>
      %351 = vector.extract_strided_slice %338 {offsets = [0, 32], sizes = [2, 32], strides = [1, 1]} : vector<2x96xf32> to vector<2x32xf32>
      %352 = arith.extf %350 : vector<2x32xbf16> to vector<2x32xf32>
      %353 = arith.addf %352, %351 : vector<2x32xf32>
      %cst_89 = arith.constant 5.000000e-01 : f32
      %354 = vector.broadcast %cst_89 : f32 to vector<2x32xf32>
      %355 = arith.mulf %354, %353 : vector<2x32xf32>
      %356 = math.tanh %355 : vector<2x32xf32>
      %cst_90 = arith.constant 5.000000e-01 : f32
      %357 = vector.broadcast %cst_90 : f32 to vector<2x32xf32>
      %358 = arith.mulf %357, %356 : vector<2x32xf32>
      %cst_91 = arith.constant 5.000000e-01 : f32
      %359 = vector.broadcast %cst_91 : f32 to vector<2x32xf32>
      %360 = arith.addf %358, %359 : vector<2x32xf32>
      %361 = vector.extract_strided_slice %336 {offsets = [0, 64], sizes = [2, 32], strides = [1, 1]} : vector<2x96xbf16> to vector<2x32xbf16>
      %362 = vector.extract_strided_slice %338 {offsets = [0, 64], sizes = [2, 32], strides = [1, 1]} : vector<2x96xf32> to vector<2x32xf32>
      %363 = arith.addf %362, %16 : vector<2x32xf32>
      %364 = arith.mulf %349, %363 : vector<2x32xf32>
      %365 = arith.extf %361 : vector<2x32xbf16> to vector<2x32xf32>
      %366 = arith.addf %365, %364 : vector<2x32xf32>
      %367 = math.tanh %366 : vector<2x32xf32>
      %cst_92 = arith.constant 1.000000e+00 : f32
      %368 = vector.broadcast %cst_92 : f32 to vector<2x32xf32>
      %369 = arith.subf %368, %360 : vector<2x32xf32>
      %370 = arith.mulf %369, %367 : vector<2x32xf32>
      %371 = arith.mulf %360, %327 : vector<2x32xf32>
      %372 = arith.addf %370, %371 : vector<2x32xf32>
      %373 = arith.addi %3, %c7_i32 : i32
      %374 = vector.broadcast %373 : i32 to vector<2x1xi32>
      %375 = arith.cmpi eq, %7, %374 : vector<2x1xi32>
      %376 = vector.shape_cast %375 : vector<2x1xi1> to vector<2x1xi1>
      %377 = vector.broadcast %376 : vector<2x1xi1> to vector<2x32xi1>
      %378 = arith.select %377, %372, %333 : vector<2x32xi1>, vector<2x32xf32>
      %c8_i32_93 = arith.constant 8 : i32
      %c0_94 = arith.constant 0 : index
      %c0_95 = arith.constant 0 : index
      %379 = vector.load %arg8[%c0_94, %c0_95] : memref<2x32xf32, #tpu.memory_space<vmem>>, vector<2x32xf32>
      tpu.vector_store %arg8[%c0_94, %c0_95], %372 {strides = array<i32>} : memref<2x32xf32, #tpu.memory_space<vmem>>, vector<2x32xf32>,
      %c0_96 = arith.constant 0 : index
      %c0_97 = arith.constant 0 : index
      %380 = vector.load %arg9[%c0_96, %c0_97] : memref<2x32xf32, #tpu.memory_space<vmem>>, vector<2x32xf32>
      tpu.vector_store %arg9[%c0_96, %c0_97], %378 {strides = array<i32>} : memref<2x32xf32, #tpu.memory_space<vmem>>, vector<2x32xf32>,
    } else {
    }
    %c2_i32 = arith.constant 2 : i32
    %10 = arith.cmpi eq, %arg1, %c2_i32 : i32
    %11 = arith.extui %10 : i1 to i32
    %c0_i32_3 = arith.constant 0 : i32
    %12 = arith.cmpi ne, %11, %c0_i32_3 : i32
    scf.if %12 {
      %c0_4 = arith.constant 0 : index
      %c0_5 = arith.constant 0 : index
      %13 = vector.load %arg9[%c0_4, %c0_5] : memref<2x32xf32, #tpu.memory_space<vmem>>, vector<2x32xf32>
      %14 = arith.mulf %13, %13 : vector<2x32xf32>
      %cst = arith.constant dense<0.000000e+00> : vector<2xf32>
      %15 = vector.multi_reduction <add>, %14, %cst [1] : vector<2x32xf32> to vector<2xf32>
      %16 = vector.shape_cast %15 : vector<2xf32> to vector<2x1xf32>
      %17 = math.sqrt %16 : vector<2x1xf32>
      %cst_6 = arith.constant 9.99999993E-9 : f32
      %18 = vector.broadcast %cst_6 : f32 to vector<2x1xf32>
      %19 = arith.addf %17, %18 : vector<2x1xf32>
      %20 = vector.broadcast %19 : vector<2x1xf32> to vector<2x32xf32>
      %21 = arith.divf %13, %20 : vector<2x32xf32>
      %c0_7 = arith.constant 0 : index
      %c0_8 = arith.constant 0 : index
      %22 = vector.load %arg7[%c0_7, %c0_8] : memref<2x32xf32, #tpu.memory_space<vmem>>, vector<2x32xf32>
      tpu.vector_store %arg7[%c0_7, %c0_8], %21 {strides = array<i32>} : memref<2x32xf32, #tpu.memory_space<vmem>>, vector<2x32xf32>,
    } else {
    }
    return
  }
  func.func @transform_0(%arg0: i32, %arg1: i32, %arg2: memref<1xi32, #tpu.memory_space<smem>>) -> (i32, i32, i32) {
    %c0_i32 = arith.constant 0 : i32
    %c0_i32_0 = arith.constant 0 : i32
    return %arg1, %arg0, %c0_i32 : i32, i32, i32
  }
  func.func @transform_1(%arg0: i32, %arg1: i32, %arg2: memref<1xi32, #tpu.memory_space<smem>>) -> (i32, i32) {
    %c0_i32 = arith.constant 0 : i32
    %c0_i32_0 = arith.constant 0 : i32
    return %arg0, %c0_i32 : i32, i32
  }
  func.func @transform_4(%arg0: i32, %arg1: i32, %arg2: memref<1xi32, #tpu.memory_space<smem>>) -> (i32, i32) {
    %c0_i32 = arith.constant 0 : i32
    %c0_i32_0 = arith.constant 0 : i32
    return %arg0, %c0_i32 : i32, i32
  }
}

module attributes {stable_mosaic.version = 11 : i64} {
  func.func @gru_seq_fused_kernel(%arg0: i32, %arg1: i32, %arg2: memref<1xi32, #tpu.memory_space<smem>>, %arg3: memref<8x2x96xbf16, #tpu.memory_space<vmem>>, %arg4: memref<32x96xbf16, #tpu.memory_space<any>>, %arg5: memref<1x32xf32, #tpu.memory_space<any>>, %arg6: memref<32x96xbf16, #tpu.memory_space<any>>, %arg7: memref<1x96xf32, #tpu.memory_space<any>>, %arg8: memref<8x2x96xbf16, #tpu.memory_space<vmem>>, %arg9: memref<2x32xf32, #tpu.memory_space<vmem>>, %arg10: memref<32x96xbf16, #tpu.memory_space<vmem>>, %arg11: memref<1x32xf32, #tpu.memory_space<vmem>>, %arg12: memref<32x96xbf16, #tpu.memory_space<vmem>>, %arg13: memref<1x96xf32, #tpu.memory_space<vmem>>, %arg14: memref<4x!tpu.dma_semaphore, #tpu.memory_space<semaphore_mem>>) attributes {dimension_semantics = [#tpu.dimension_semantics<parallel>, #tpu.dimension_semantics<arbitrary>], iteration_bounds = array<i64: 1, 3>, scalar_prefetch = 1 : i64, scratch_operands = 6 : i64, tpu.core_type = #tpu.core_type<tc>, window_params = [{transform_indices = @transform_0, window_bounds = array<i64: 8, 2, 96>}, {}, {}, {}, {}, {transform_indices = @transform_5, window_bounds = array<i64: 8, 2, 96>}]} {
    %c0_i32 = arith.constant 0 : i32
    %0 = arith.cmpi eq, %arg1, %c0_i32 : i32
    %1 = arith.extui %0 : i1 to i32
    %c0_i32_0 = arith.constant 0 : i32
    %2 = arith.cmpi ne, %1, %c0_i32_0 : i32
    scf.if %2 {
      %c0_i32_3 = arith.constant 0 : i32
      %12 = tpu.memref_slice %arg14[%c0_i32_3] : memref<4x!tpu.dma_semaphore, #tpu.memory_space<semaphore_mem>> -> memref<1x!tpu.dma_semaphore, #tpu.memory_space<semaphore_mem>>
      %13 = tpu.memref_squeeze %12 : memref<1x!tpu.dma_semaphore, #tpu.memory_space<semaphore_mem>> -> memref<!tpu.dma_semaphore, #tpu.memory_space<semaphore_mem>>
      tpu.enqueue_dma source(%arg4 : memref<32x96xbf16, #tpu.memory_space<any>>) target(%arg10 : memref<32x96xbf16, #tpu.memory_space<vmem>>) target_semaphore(%13 : memref<!tpu.dma_semaphore, #tpu.memory_space<semaphore_mem>>)
      %c1_i32 = arith.constant 1 : i32
      %14 = tpu.memref_slice %arg14[%c1_i32] : memref<4x!tpu.dma_semaphore, #tpu.memory_space<semaphore_mem>> -> memref<1x!tpu.dma_semaphore, #tpu.memory_space<semaphore_mem>>
      %15 = tpu.memref_squeeze %14 : memref<1x!tpu.dma_semaphore, #tpu.memory_space<semaphore_mem>> -> memref<!tpu.dma_semaphore, #tpu.memory_space<semaphore_mem>>
      tpu.enqueue_dma source(%arg5 : memref<1x32xf32, #tpu.memory_space<any>>) target(%arg11 : memref<1x32xf32, #tpu.memory_space<vmem>>) target_semaphore(%15 : memref<!tpu.dma_semaphore, #tpu.memory_space<semaphore_mem>>)
      %c2_i32 = arith.constant 2 : i32
      %16 = tpu.memref_slice %arg14[%c2_i32] : memref<4x!tpu.dma_semaphore, #tpu.memory_space<semaphore_mem>> -> memref<1x!tpu.dma_semaphore, #tpu.memory_space<semaphore_mem>>
      %17 = tpu.memref_squeeze %16 : memref<1x!tpu.dma_semaphore, #tpu.memory_space<semaphore_mem>> -> memref<!tpu.dma_semaphore, #tpu.memory_space<semaphore_mem>>
      tpu.enqueue_dma source(%arg6 : memref<32x96xbf16, #tpu.memory_space<any>>) target(%arg12 : memref<32x96xbf16, #tpu.memory_space<vmem>>) target_semaphore(%17 : memref<!tpu.dma_semaphore, #tpu.memory_space<semaphore_mem>>)
      %c3_i32 = arith.constant 3 : i32
      %18 = tpu.memref_slice %arg14[%c3_i32] : memref<4x!tpu.dma_semaphore, #tpu.memory_space<semaphore_mem>> -> memref<1x!tpu.dma_semaphore, #tpu.memory_space<semaphore_mem>>
      %19 = tpu.memref_squeeze %18 : memref<1x!tpu.dma_semaphore, #tpu.memory_space<semaphore_mem>> -> memref<!tpu.dma_semaphore, #tpu.memory_space<semaphore_mem>>
      tpu.enqueue_dma source(%arg7 : memref<1x96xf32, #tpu.memory_space<any>>) target(%arg13 : memref<1x96xf32, #tpu.memory_space<vmem>>) target_semaphore(%19 : memref<!tpu.dma_semaphore, #tpu.memory_space<semaphore_mem>>)
      %c0_i32_4 = arith.constant 0 : i32
      %20 = tpu.memref_slice %arg14[%c0_i32_4] : memref<4x!tpu.dma_semaphore, #tpu.memory_space<semaphore_mem>> -> memref<1x!tpu.dma_semaphore, #tpu.memory_space<semaphore_mem>>
      %21 = tpu.memref_squeeze %20 : memref<1x!tpu.dma_semaphore, #tpu.memory_space<semaphore_mem>> -> memref<!tpu.dma_semaphore, #tpu.memory_space<semaphore_mem>>
      tpu.wait_dma2 semaphore(%21 : memref<!tpu.dma_semaphore, #tpu.memory_space<semaphore_mem>>) src(%arg4 : memref<32x96xbf16, #tpu.memory_space<any>>) dst(%arg10 : memref<32x96xbf16, #tpu.memory_space<vmem>>)
      %c1_i32_5 = arith.constant 1 : i32
      %22 = tpu.memref_slice %arg14[%c1_i32_5] : memref<4x!tpu.dma_semaphore, #tpu.memory_space<semaphore_mem>> -> memref<1x!tpu.dma_semaphore, #tpu.memory_space<semaphore_mem>>
      %23 = tpu.memref_squeeze %22 : memref<1x!tpu.dma_semaphore, #tpu.memory_space<semaphore_mem>> -> memref<!tpu.dma_semaphore, #tpu.memory_space<semaphore_mem>>
      tpu.wait_dma2 semaphore(%23 : memref<!tpu.dma_semaphore, #tpu.memory_space<semaphore_mem>>) src(%arg5 : memref<1x32xf32, #tpu.memory_space<any>>) dst(%arg11 : memref<1x32xf32, #tpu.memory_space<vmem>>)
      %c2_i32_6 = arith.constant 2 : i32
      %24 = tpu.memref_slice %arg14[%c2_i32_6] : memref<4x!tpu.dma_semaphore, #tpu.memory_space<semaphore_mem>> -> memref<1x!tpu.dma_semaphore, #tpu.memory_space<semaphore_mem>>
      %25 = tpu.memref_squeeze %24 : memref<1x!tpu.dma_semaphore, #tpu.memory_space<semaphore_mem>> -> memref<!tpu.dma_semaphore, #tpu.memory_space<semaphore_mem>>
      tpu.wait_dma2 semaphore(%25 : memref<!tpu.dma_semaphore, #tpu.memory_space<semaphore_mem>>) src(%arg6 : memref<32x96xbf16, #tpu.memory_space<any>>) dst(%arg12 : memref<32x96xbf16, #tpu.memory_space<vmem>>)
      %c3_i32_7 = arith.constant 3 : i32
      %26 = tpu.memref_slice %arg14[%c3_i32_7] : memref<4x!tpu.dma_semaphore, #tpu.memory_space<semaphore_mem>> -> memref<1x!tpu.dma_semaphore, #tpu.memory_space<semaphore_mem>>
      %27 = tpu.memref_squeeze %26 : memref<1x!tpu.dma_semaphore, #tpu.memory_space<semaphore_mem>> -> memref<!tpu.dma_semaphore, #tpu.memory_space<semaphore_mem>>
      tpu.wait_dma2 semaphore(%27 : memref<!tpu.dma_semaphore, #tpu.memory_space<semaphore_mem>>) src(%arg7 : memref<1x96xf32, #tpu.memory_space<any>>) dst(%arg13 : memref<1x96xf32, #tpu.memory_space<vmem>>)
      %cst = arith.constant 0.000000e+00 : f32
      %28 = vector.broadcast %cst : f32 to vector<2x32xf32>
      %c0 = arith.constant 0 : index
      %c0_8 = arith.constant 0 : index
      %29 = vector.load %arg9[%c0, %c0_8] : memref<2x32xf32, #tpu.memory_space<vmem>>, vector<2x32xf32>
      tpu.vector_store %arg9[%c0, %c0_8], %28 {strides = array<i32>} : memref<2x32xf32, #tpu.memory_space<vmem>>, vector<2x32xf32>,
    } else {
    }
    %c8_i32 = arith.constant 8 : i32
    %3 = arith.muli %arg1, %c8_i32 : i32
    %4 = arith.index_cast %arg0 : i32 to index
    %5 = memref.load %arg2[%4] : memref<1xi32, #tpu.memory_space<smem>>
    %6 = arith.cmpi sle, %3, %5 : i32
    %7 = arith.extui %6 : i1 to i32
    %c0_i32_1 = arith.constant 0 : i32
    %8 = arith.cmpi ne, %7, %c0_i32_1 : i32
    scf.if %8 {
      %c0 = arith.constant 0 : index
      %c0_3 = arith.constant 0 : index
      %12 = vector.load %arg10[%c0, %c0_3] : memref<32x96xbf16, #tpu.memory_space<vmem>>, vector<32x96xbf16>
      %c0_4 = arith.constant 0 : index
      %c0_5 = arith.constant 0 : index
      %13 = vector.load %arg12[%c0_4, %c0_5] : memref<32x96xbf16, #tpu.memory_space<vmem>>, vector<32x96xbf16>
      %c0_6 = arith.constant 0 : index
      %c0_7 = arith.constant 0 : index
      %14 = vector.load %arg11[%c0_6, %c0_7] : memref<1x32xf32, #tpu.memory_space<vmem>>, vector<1x32xf32>
      %15 = vector.shape_cast %14 : vector<1x32xf32> to vector<1x32xf32>
      %16 = vector.broadcast %15 : vector<1x32xf32> to vector<2x32xf32>
      %c0_8 = arith.constant 0 : index
      %c0_9 = arith.constant 0 : index
      %17 = vector.load %arg13[%c0_8, %c0_9] : memref<1x96xf32, #tpu.memory_space<vmem>>, vector<1x96xf32>
      %18 = vector.shape_cast %17 : vector<1x96xf32> to vector<1x96xf32>
      %19 = vector.broadcast %18 : vector<1x96xf32> to vector<2x96xf32>
      %c0_10 = arith.constant 0 : index
      %c0_11 = arith.constant 0 : index
      %20 = vector.load %arg9[%c0_10, %c0_11] : memref<2x32xf32, #tpu.memory_space<vmem>>, vector<2x32xf32>
      %c0_i32_12 = arith.constant 0 : i32
      %21 = arith.index_cast %c0_i32_12 : i32 to index
      %c0_13 = arith.constant 0 : index
      %c0_14 = arith.constant 0 : index
      %22 = vector.load %arg3[%21, %c0_13, %c0_14] : memref<8x2x96xbf16, #tpu.memory_space<vmem>>, vector<1x2x96xbf16>
      %23 = vector.shape_cast %22 : vector<1x2x96xbf16> to vector<2x96xbf16>
      %24 = arith.truncf %20 : vector<2x32xf32> to vector<2x32xbf16>
      %cst = arith.constant dense<0.000000e+00> : vector<2x96xf32>
      %25 = tpu.matmul %24, %12, %cst {dimension_numbers = #tpu.dot_dimension_numbers<[1], [0], [0], [1], [0, 0, 1, 1], [], []>} : vector<2x32xbf16>, vector<32x96xbf16>, vector<2x96xf32> -> vector<2x96xf32>
      %26 = vector.extract_strided_slice %23 {offsets = [0, 0], sizes = [2, 32], strides = [1, 1]} : vector<2x96xbf16> to vector<2x32xbf16>
      %27 = vector.extract_strided_slice %25 {offsets = [0, 0], sizes = [2, 32], strides = [1, 1]} : vector<2x96xf32> to vector<2x32xf32>
      %28 = arith.extf %26 : vector<2x32xbf16> to vector<2x32xf32>
      %29 = arith.addf %28, %27 : vector<2x32xf32>
      %cst_15 = arith.constant 5.000000e-01 : f32
      %30 = vector.broadcast %cst_15 : f32 to vector<2x32xf32>
      %31 = arith.mulf %30, %29 : vector<2x32xf32>
      %32 = math.tanh %31 : vector<2x32xf32>
      %cst_16 = arith.constant 5.000000e-01 : f32
      %33 = vector.broadcast %cst_16 : f32 to vector<2x32xf32>
      %34 = arith.mulf %33, %32 : vector<2x32xf32>
      %cst_17 = arith.constant 5.000000e-01 : f32
      %35 = vector.broadcast %cst_17 : f32 to vector<2x32xf32>
      %36 = arith.addf %34, %35 : vector<2x32xf32>
      %37 = vector.extract_strided_slice %23 {offsets = [0, 32], sizes = [2, 32], strides = [1, 1]} : vector<2x96xbf16> to vector<2x32xbf16>
      %38 = vector.extract_strided_slice %25 {offsets = [0, 32], sizes = [2, 32], strides = [1, 1]} : vector<2x96xf32> to vector<2x32xf32>
      %39 = arith.extf %37 : vector<2x32xbf16> to vector<2x32xf32>
      %40 = arith.addf %39, %38 : vector<2x32xf32>
      %cst_18 = arith.constant 5.000000e-01 : f32
      %41 = vector.broadcast %cst_18 : f32 to vector<2x32xf32>
      %42 = arith.mulf %41, %40 : vector<2x32xf32>
      %43 = math.tanh %42 : vector<2x32xf32>
      %cst_19 = arith.constant 5.000000e-01 : f32
      %44 = vector.broadcast %cst_19 : f32 to vector<2x32xf32>
      %45 = arith.mulf %44, %43 : vector<2x32xf32>
      %cst_20 = arith.constant 5.000000e-01 : f32
      %46 = vector.broadcast %cst_20 : f32 to vector<2x32xf32>
      %47 = arith.addf %45, %46 : vector<2x32xf32>
      %48 = vector.extract_strided_slice %23 {offsets = [0, 64], sizes = [2, 32], strides = [1, 1]} : vector<2x96xbf16> to vector<2x32xbf16>
      %49 = vector.extract_strided_slice %25 {offsets = [0, 64], sizes = [2, 32], strides = [1, 1]} : vector<2x96xf32> to vector<2x32xf32>
      %50 = arith.addf %49, %16 : vector<2x32xf32>
      %51 = arith.mulf %36, %50 : vector<2x32xf32>
      %52 = arith.extf %48 : vector<2x32xbf16> to vector<2x32xf32>
      %53 = arith.addf %52, %51 : vector<2x32xf32>
      %54 = math.tanh %53 : vector<2x32xf32>
      %cst_21 = arith.constant 1.000000e+00 : f32
      %55 = vector.broadcast %cst_21 : f32 to vector<2x32xf32>
      %56 = arith.subf %55, %47 : vector<2x32xf32>
      %57 = arith.mulf %56, %54 : vector<2x32xf32>
      %58 = arith.mulf %47, %20 : vector<2x32xf32>
      %59 = arith.addf %57, %58 : vector<2x32xf32>
      %60 = arith.truncf %59 : vector<2x32xf32> to vector<2x32xbf16>
      %cst_22 = arith.constant dense<0.000000e+00> : vector<2x96xf32>
      %61 = tpu.matmul %60, %13, %cst_22 {dimension_numbers = #tpu.dot_dimension_numbers<[1], [0], [0], [1], [0, 0, 1, 1], [], []>} : vector<2x32xbf16>, vector<32x96xbf16>, vector<2x96xf32> -> vector<2x96xf32>
      %62 = arith.addf %61, %19 : vector<2x96xf32>
      %63 = arith.truncf %62 : vector<2x96xf32> to vector<2x96xbf16>
      %64 = arith.index_cast %c0_i32_12 : i32 to index
      %c0_23 = arith.constant 0 : index
      %c0_24 = arith.constant 0 : index
      %65 = vector.load %arg8[%64, %c0_23, %c0_24] : memref<8x2x96xbf16, #tpu.memory_space<vmem>>, vector<1x2x96xbf16>
      %66 = vector.shape_cast %65 : vector<1x2x96xbf16> to vector<2x96xbf16>
      %67 = vector.shape_cast %63 : vector<2x96xbf16> to vector<1x2x96xbf16>
      tpu.vector_store %arg8[%64, %c0_23, %c0_24], %67 {strides = array<i32>} : memref<8x2x96xbf16, #tpu.memory_space<vmem>>, vector<1x2x96xbf16>,
      %c1_i32 = arith.constant 1 : i32
      %68 = arith.index_cast %c1_i32 : i32 to index
      %c0_25 = arith.constant 0 : index
      %c0_26 = arith.constant 0 : index
      %69 = vector.load %arg3[%68, %c0_25, %c0_26] : memref<8x2x96xbf16, #tpu.memory_space<vmem>>, vector<1x2x96xbf16>
      %70 = vector.shape_cast %69 : vector<1x2x96xbf16> to vector<2x96xbf16>
      %71 = arith.truncf %59 : vector<2x32xf32> to vector<2x32xbf16>
      %cst_27 = arith.constant dense<0.000000e+00> : vector<2x96xf32>
      %72 = tpu.matmul %71, %12, %cst_27 {dimension_numbers = #tpu.dot_dimension_numbers<[1], [0], [0], [1], [0, 0, 1, 1], [], []>} : vector<2x32xbf16>, vector<32x96xbf16>, vector<2x96xf32> -> vector<2x96xf32>
      %73 = vector.extract_strided_slice %70 {offsets = [0, 0], sizes = [2, 32], strides = [1, 1]} : vector<2x96xbf16> to vector<2x32xbf16>
      %74 = vector.extract_strided_slice %72 {offsets = [0, 0], sizes = [2, 32], strides = [1, 1]} : vector<2x96xf32> to vector<2x32xf32>
      %75 = arith.extf %73 : vector<2x32xbf16> to vector<2x32xf32>
      %76 = arith.addf %75, %74 : vector<2x32xf32>
      %cst_28 = arith.constant 5.000000e-01 : f32
      %77 = vector.broadcast %cst_28 : f32 to vector<2x32xf32>
      %78 = arith.mulf %77, %76 : vector<2x32xf32>
      %79 = math.tanh %78 : vector<2x32xf32>
      %cst_29 = arith.constant 5.000000e-01 : f32
      %80 = vector.broadcast %cst_29 : f32 to vector<2x32xf32>
      %81 = arith.mulf %80, %79 : vector<2x32xf32>
      %cst_30 = arith.constant 5.000000e-01 : f32
      %82 = vector.broadcast %cst_30 : f32 to vector<2x32xf32>
      %83 = arith.addf %81, %82 : vector<2x32xf32>
      %84 = vector.extract_strided_slice %70 {offsets = [0, 32], sizes = [2, 32], strides = [1, 1]} : vector<2x96xbf16> to vector<2x32xbf16>
      %85 = vector.extract_strided_slice %72 {offsets = [0, 32], sizes = [2, 32], strides = [1, 1]} : vector<2x96xf32> to vector<2x32xf32>
      %86 = arith.extf %84 : vector<2x32xbf16> to vector<2x32xf32>
      %87 = arith.addf %86, %85 : vector<2x32xf32>
      %cst_31 = arith.constant 5.000000e-01 : f32
      %88 = vector.broadcast %cst_31 : f32 to vector<2x32xf32>
      %89 = arith.mulf %88, %87 : vector<2x32xf32>
      %90 = math.tanh %89 : vector<2x32xf32>
      %cst_32 = arith.constant 5.000000e-01 : f32
      %91 = vector.broadcast %cst_32 : f32 to vector<2x32xf32>
      %92 = arith.mulf %91, %90 : vector<2x32xf32>
      %cst_33 = arith.constant 5.000000e-01 : f32
      %93 = vector.broadcast %cst_33 : f32 to vector<2x32xf32>
      %94 = arith.addf %92, %93 : vector<2x32xf32>
      %95 = vector.extract_strided_slice %70 {offsets = [0, 64], sizes = [2, 32], strides = [1, 1]} : vector<2x96xbf16> to vector<2x32xbf16>
      %96 = vector.extract_strided_slice %72 {offsets = [0, 64], sizes = [2, 32], strides = [1, 1]} : vector<2x96xf32> to vector<2x32xf32>
      %97 = arith.addf %96, %16 : vector<2x32xf32>
      %98 = arith.mulf %83, %97 : vector<2x32xf32>
      %99 = arith.extf %95 : vector<2x32xbf16> to vector<2x32xf32>
      %100 = arith.addf %99, %98 : vector<2x32xf32>
      %101 = math.tanh %100 : vector<2x32xf32>
      %cst_34 = arith.constant 1.000000e+00 : f32
      %102 = vector.broadcast %cst_34 : f32 to vector<2x32xf32>
      %103 = arith.subf %102, %94 : vector<2x32xf32>
      %104 = arith.mulf %103, %101 : vector<2x32xf32>
      %105 = arith.mulf %94, %59 : vector<2x32xf32>
      %106 = arith.addf %104, %105 : vector<2x32xf32>
      %107 = arith.truncf %106 : vector<2x32xf32> to vector<2x32xbf16>
      %cst_35 = arith.constant dense<0.000000e+00> : vector<2x96xf32>
      %108 = tpu.matmul %107, %13, %cst_35 {dimension_numbers = #tpu.dot_dimension_numbers<[1], [0], [0], [1], [0, 0, 1, 1], [], []>} : vector<2x32xbf16>, vector<32x96xbf16>, vector<2x96xf32> -> vector<2x96xf32>
      %109 = arith.addf %108, %19 : vector<2x96xf32>
      %110 = arith.truncf %109 : vector<2x96xf32> to vector<2x96xbf16>
      %111 = arith.index_cast %c1_i32 : i32 to index
      %c0_36 = arith.constant 0 : index
      %c0_37 = arith.constant 0 : index
      %112 = vector.load %arg8[%111, %c0_36, %c0_37] : memref<8x2x96xbf16, #tpu.memory_space<vmem>>, vector<1x2x96xbf16>
      %113 = vector.shape_cast %112 : vector<1x2x96xbf16> to vector<2x96xbf16>
      %114 = vector.shape_cast %110 : vector<2x96xbf16> to vector<1x2x96xbf16>
      tpu.vector_store %arg8[%111, %c0_36, %c0_37], %114 {strides = array<i32>} : memref<8x2x96xbf16, #tpu.memory_space<vmem>>, vector<1x2x96xbf16>,
      %c2_i32 = arith.constant 2 : i32
      %115 = arith.index_cast %c2_i32 : i32 to index
      %c0_38 = arith.constant 0 : index
      %c0_39 = arith.constant 0 : index
      %116 = vector.load %arg3[%115, %c0_38, %c0_39] : memref<8x2x96xbf16, #tpu.memory_space<vmem>>, vector<1x2x96xbf16>
      %117 = vector.shape_cast %116 : vector<1x2x96xbf16> to vector<2x96xbf16>
      %118 = arith.truncf %106 : vector<2x32xf32> to vector<2x32xbf16>
      %cst_40 = arith.constant dense<0.000000e+00> : vector<2x96xf32>
      %119 = tpu.matmul %118, %12, %cst_40 {dimension_numbers = #tpu.dot_dimension_numbers<[1], [0], [0], [1], [0, 0, 1, 1], [], []>} : vector<2x32xbf16>, vector<32x96xbf16>, vector<2x96xf32> -> vector<2x96xf32>
      %120 = vector.extract_strided_slice %117 {offsets = [0, 0], sizes = [2, 32], strides = [1, 1]} : vector<2x96xbf16> to vector<2x32xbf16>
      %121 = vector.extract_strided_slice %119 {offsets = [0, 0], sizes = [2, 32], strides = [1, 1]} : vector<2x96xf32> to vector<2x32xf32>
      %122 = arith.extf %120 : vector<2x32xbf16> to vector<2x32xf32>
      %123 = arith.addf %122, %121 : vector<2x32xf32>
      %cst_41 = arith.constant 5.000000e-01 : f32
      %124 = vector.broadcast %cst_41 : f32 to vector<2x32xf32>
      %125 = arith.mulf %124, %123 : vector<2x32xf32>
      %126 = math.tanh %125 : vector<2x32xf32>
      %cst_42 = arith.constant 5.000000e-01 : f32
      %127 = vector.broadcast %cst_42 : f32 to vector<2x32xf32>
      %128 = arith.mulf %127, %126 : vector<2x32xf32>
      %cst_43 = arith.constant 5.000000e-01 : f32
      %129 = vector.broadcast %cst_43 : f32 to vector<2x32xf32>
      %130 = arith.addf %128, %129 : vector<2x32xf32>
      %131 = vector.extract_strided_slice %117 {offsets = [0, 32], sizes = [2, 32], strides = [1, 1]} : vector<2x96xbf16> to vector<2x32xbf16>
      %132 = vector.extract_strided_slice %119 {offsets = [0, 32], sizes = [2, 32], strides = [1, 1]} : vector<2x96xf32> to vector<2x32xf32>
      %133 = arith.extf %131 : vector<2x32xbf16> to vector<2x32xf32>
      %134 = arith.addf %133, %132 : vector<2x32xf32>
      %cst_44 = arith.constant 5.000000e-01 : f32
      %135 = vector.broadcast %cst_44 : f32 to vector<2x32xf32>
      %136 = arith.mulf %135, %134 : vector<2x32xf32>
      %137 = math.tanh %136 : vector<2x32xf32>
      %cst_45 = arith.constant 5.000000e-01 : f32
      %138 = vector.broadcast %cst_45 : f32 to vector<2x32xf32>
      %139 = arith.mulf %138, %137 : vector<2x32xf32>
      %cst_46 = arith.constant 5.000000e-01 : f32
      %140 = vector.broadcast %cst_46 : f32 to vector<2x32xf32>
      %141 = arith.addf %139, %140 : vector<2x32xf32>
      %142 = vector.extract_strided_slice %117 {offsets = [0, 64], sizes = [2, 32], strides = [1, 1]} : vector<2x96xbf16> to vector<2x32xbf16>
      %143 = vector.extract_strided_slice %119 {offsets = [0, 64], sizes = [2, 32], strides = [1, 1]} : vector<2x96xf32> to vector<2x32xf32>
      %144 = arith.addf %143, %16 : vector<2x32xf32>
      %145 = arith.mulf %130, %144 : vector<2x32xf32>
      %146 = arith.extf %142 : vector<2x32xbf16> to vector<2x32xf32>
      %147 = arith.addf %146, %145 : vector<2x32xf32>
      %148 = math.tanh %147 : vector<2x32xf32>
      %cst_47 = arith.constant 1.000000e+00 : f32
      %149 = vector.broadcast %cst_47 : f32 to vector<2x32xf32>
      %150 = arith.subf %149, %141 : vector<2x32xf32>
      %151 = arith.mulf %150, %148 : vector<2x32xf32>
      %152 = arith.mulf %141, %106 : vector<2x32xf32>
      %153 = arith.addf %151, %152 : vector<2x32xf32>
      %154 = arith.truncf %153 : vector<2x32xf32> to vector<2x32xbf16>
      %cst_48 = arith.constant dense<0.000000e+00> : vector<2x96xf32>
      %155 = tpu.matmul %154, %13, %cst_48 {dimension_numbers = #tpu.dot_dimension_numbers<[1], [0], [0], [1], [0, 0, 1, 1], [], []>} : vector<2x32xbf16>, vector<32x96xbf16>, vector<2x96xf32> -> vector<2x96xf32>
      %156 = arith.addf %155, %19 : vector<2x96xf32>
      %157 = arith.truncf %156 : vector<2x96xf32> to vector<2x96xbf16>
      %158 = arith.index_cast %c2_i32 : i32 to index
      %c0_49 = arith.constant 0 : index
      %c0_50 = arith.constant 0 : index
      %159 = vector.load %arg8[%158, %c0_49, %c0_50] : memref<8x2x96xbf16, #tpu.memory_space<vmem>>, vector<1x2x96xbf16>
      %160 = vector.shape_cast %159 : vector<1x2x96xbf16> to vector<2x96xbf16>
      %161 = vector.shape_cast %157 : vector<2x96xbf16> to vector<1x2x96xbf16>
      tpu.vector_store %arg8[%158, %c0_49, %c0_50], %161 {strides = array<i32>} : memref<8x2x96xbf16, #tpu.memory_space<vmem>>, vector<1x2x96xbf16>,
      %c3_i32 = arith.constant 3 : i32
      %162 = arith.index_cast %c3_i32 : i32 to index
      %c0_51 = arith.constant 0 : index
      %c0_52 = arith.constant 0 : index
      %163 = vector.load %arg3[%162, %c0_51, %c0_52] : memref<8x2x96xbf16, #tpu.memory_space<vmem>>, vector<1x2x96xbf16>
      %164 = vector.shape_cast %163 : vector<1x2x96xbf16> to vector<2x96xbf16>
      %165 = arith.truncf %153 : vector<2x32xf32> to vector<2x32xbf16>
      %cst_53 = arith.constant dense<0.000000e+00> : vector<2x96xf32>
      %166 = tpu.matmul %165, %12, %cst_53 {dimension_numbers = #tpu.dot_dimension_numbers<[1], [0], [0], [1], [0, 0, 1, 1], [], []>} : vector<2x32xbf16>, vector<32x96xbf16>, vector<2x96xf32> -> vector<2x96xf32>
      %167 = vector.extract_strided_slice %164 {offsets = [0, 0], sizes = [2, 32], strides = [1, 1]} : vector<2x96xbf16> to vector<2x32xbf16>
      %168 = vector.extract_strided_slice %166 {offsets = [0, 0], sizes = [2, 32], strides = [1, 1]} : vector<2x96xf32> to vector<2x32xf32>
      %169 = arith.extf %167 : vector<2x32xbf16> to vector<2x32xf32>
      %170 = arith.addf %169, %168 : vector<2x32xf32>
      %cst_54 = arith.constant 5.000000e-01 : f32
      %171 = vector.broadcast %cst_54 : f32 to vector<2x32xf32>
      %172 = arith.mulf %171, %170 : vector<2x32xf32>
      %173 = math.tanh %172 : vector<2x32xf32>
      %cst_55 = arith.constant 5.000000e-01 : f32
      %174 = vector.broadcast %cst_55 : f32 to vector<2x32xf32>
      %175 = arith.mulf %174, %173 : vector<2x32xf32>
      %cst_56 = arith.constant 5.000000e-01 : f32
      %176 = vector.broadcast %cst_56 : f32 to vector<2x32xf32>
      %177 = arith.addf %175, %176 : vector<2x32xf32>
      %178 = vector.extract_strided_slice %164 {offsets = [0, 32], sizes = [2, 32], strides = [1, 1]} : vector<2x96xbf16> to vector<2x32xbf16>
      %179 = vector.extract_strided_slice %166 {offsets = [0, 32], sizes = [2, 32], strides = [1, 1]} : vector<2x96xf32> to vector<2x32xf32>
      %180 = arith.extf %178 : vector<2x32xbf16> to vector<2x32xf32>
      %181 = arith.addf %180, %179 : vector<2x32xf32>
      %cst_57 = arith.constant 5.000000e-01 : f32
      %182 = vector.broadcast %cst_57 : f32 to vector<2x32xf32>
      %183 = arith.mulf %182, %181 : vector<2x32xf32>
      %184 = math.tanh %183 : vector<2x32xf32>
      %cst_58 = arith.constant 5.000000e-01 : f32
      %185 = vector.broadcast %cst_58 : f32 to vector<2x32xf32>
      %186 = arith.mulf %185, %184 : vector<2x32xf32>
      %cst_59 = arith.constant 5.000000e-01 : f32
      %187 = vector.broadcast %cst_59 : f32 to vector<2x32xf32>
      %188 = arith.addf %186, %187 : vector<2x32xf32>
      %189 = vector.extract_strided_slice %164 {offsets = [0, 64], sizes = [2, 32], strides = [1, 1]} : vector<2x96xbf16> to vector<2x32xbf16>
      %190 = vector.extract_strided_slice %166 {offsets = [0, 64], sizes = [2, 32], strides = [1, 1]} : vector<2x96xf32> to vector<2x32xf32>
      %191 = arith.addf %190, %16 : vector<2x32xf32>
      %192 = arith.mulf %177, %191 : vector<2x32xf32>
      %193 = arith.extf %189 : vector<2x32xbf16> to vector<2x32xf32>
      %194 = arith.addf %193, %192 : vector<2x32xf32>
      %195 = math.tanh %194 : vector<2x32xf32>
      %cst_60 = arith.constant 1.000000e+00 : f32
      %196 = vector.broadcast %cst_60 : f32 to vector<2x32xf32>
      %197 = arith.subf %196, %188 : vector<2x32xf32>
      %198 = arith.mulf %197, %195 : vector<2x32xf32>
      %199 = arith.mulf %188, %153 : vector<2x32xf32>
      %200 = arith.addf %198, %199 : vector<2x32xf32>
      %201 = arith.truncf %200 : vector<2x32xf32> to vector<2x32xbf16>
      %cst_61 = arith.constant dense<0.000000e+00> : vector<2x96xf32>
      %202 = tpu.matmul %201, %13, %cst_61 {dimension_numbers = #tpu.dot_dimension_numbers<[1], [0], [0], [1], [0, 0, 1, 1], [], []>} : vector<2x32xbf16>, vector<32x96xbf16>, vector<2x96xf32> -> vector<2x96xf32>
      %203 = arith.addf %202, %19 : vector<2x96xf32>
      %204 = arith.truncf %203 : vector<2x96xf32> to vector<2x96xbf16>
      %205 = arith.index_cast %c3_i32 : i32 to index
      %c0_62 = arith.constant 0 : index
      %c0_63 = arith.constant 0 : index
      %206 = vector.load %arg8[%205, %c0_62, %c0_63] : memref<8x2x96xbf16, #tpu.memory_space<vmem>>, vector<1x2x96xbf16>
      %207 = vector.shape_cast %206 : vector<1x2x96xbf16> to vector<2x96xbf16>
      %208 = vector.shape_cast %204 : vector<2x96xbf16> to vector<1x2x96xbf16>
      tpu.vector_store %arg8[%205, %c0_62, %c0_63], %208 {strides = array<i32>} : memref<8x2x96xbf16, #tpu.memory_space<vmem>>, vector<1x2x96xbf16>,
      %c4_i32 = arith.constant 4 : i32
      %209 = arith.index_cast %c4_i32 : i32 to index
      %c0_64 = arith.constant 0 : index
      %c0_65 = arith.constant 0 : index
      %210 = vector.load %arg3[%209, %c0_64, %c0_65] : memref<8x2x96xbf16, #tpu.memory_space<vmem>>, vector<1x2x96xbf16>
      %211 = vector.shape_cast %210 : vector<1x2x96xbf16> to vector<2x96xbf16>
      %212 = arith.truncf %200 : vector<2x32xf32> to vector<2x32xbf16>
      %cst_66 = arith.constant dense<0.000000e+00> : vector<2x96xf32>
      %213 = tpu.matmul %212, %12, %cst_66 {dimension_numbers = #tpu.dot_dimension_numbers<[1], [0], [0], [1], [0, 0, 1, 1], [], []>} : vector<2x32xbf16>, vector<32x96xbf16>, vector<2x96xf32> -> vector<2x96xf32>
      %214 = vector.extract_strided_slice %211 {offsets = [0, 0], sizes = [2, 32], strides = [1, 1]} : vector<2x96xbf16> to vector<2x32xbf16>
      %215 = vector.extract_strided_slice %213 {offsets = [0, 0], sizes = [2, 32], strides = [1, 1]} : vector<2x96xf32> to vector<2x32xf32>
      %216 = arith.extf %214 : vector<2x32xbf16> to vector<2x32xf32>
      %217 = arith.addf %216, %215 : vector<2x32xf32>
      %cst_67 = arith.constant 5.000000e-01 : f32
      %218 = vector.broadcast %cst_67 : f32 to vector<2x32xf32>
      %219 = arith.mulf %218, %217 : vector<2x32xf32>
      %220 = math.tanh %219 : vector<2x32xf32>
      %cst_68 = arith.constant 5.000000e-01 : f32
      %221 = vector.broadcast %cst_68 : f32 to vector<2x32xf32>
      %222 = arith.mulf %221, %220 : vector<2x32xf32>
      %cst_69 = arith.constant 5.000000e-01 : f32
      %223 = vector.broadcast %cst_69 : f32 to vector<2x32xf32>
      %224 = arith.addf %222, %223 : vector<2x32xf32>
      %225 = vector.extract_strided_slice %211 {offsets = [0, 32], sizes = [2, 32], strides = [1, 1]} : vector<2x96xbf16> to vector<2x32xbf16>
      %226 = vector.extract_strided_slice %213 {offsets = [0, 32], sizes = [2, 32], strides = [1, 1]} : vector<2x96xf32> to vector<2x32xf32>
      %227 = arith.extf %225 : vector<2x32xbf16> to vector<2x32xf32>
      %228 = arith.addf %227, %226 : vector<2x32xf32>
      %cst_70 = arith.constant 5.000000e-01 : f32
      %229 = vector.broadcast %cst_70 : f32 to vector<2x32xf32>
      %230 = arith.mulf %229, %228 : vector<2x32xf32>
      %231 = math.tanh %230 : vector<2x32xf32>
      %cst_71 = arith.constant 5.000000e-01 : f32
      %232 = vector.broadcast %cst_71 : f32 to vector<2x32xf32>
      %233 = arith.mulf %232, %231 : vector<2x32xf32>
      %cst_72 = arith.constant 5.000000e-01 : f32
      %234 = vector.broadcast %cst_72 : f32 to vector<2x32xf32>
      %235 = arith.addf %233, %234 : vector<2x32xf32>
      %236 = vector.extract_strided_slice %211 {offsets = [0, 64], sizes = [2, 32], strides = [1, 1]} : vector<2x96xbf16> to vector<2x32xbf16>
      %237 = vector.extract_strided_slice %213 {offsets = [0, 64], sizes = [2, 32], strides = [1, 1]} : vector<2x96xf32> to vector<2x32xf32>
      %238 = arith.addf %237, %16 : vector<2x32xf32>
      %239 = arith.mulf %224, %238 : vector<2x32xf32>
      %240 = arith.extf %236 : vector<2x32xbf16> to vector<2x32xf32>
      %241 = arith.addf %240, %239 : vector<2x32xf32>
      %242 = math.tanh %241 : vector<2x32xf32>
      %cst_73 = arith.constant 1.000000e+00 : f32
      %243 = vector.broadcast %cst_73 : f32 to vector<2x32xf32>
      %244 = arith.subf %243, %235 : vector<2x32xf32>
      %245 = arith.mulf %244, %242 : vector<2x32xf32>
      %246 = arith.mulf %235, %200 : vector<2x32xf32>
      %247 = arith.addf %245, %246 : vector<2x32xf32>
      %248 = arith.truncf %247 : vector<2x32xf32> to vector<2x32xbf16>
      %cst_74 = arith.constant dense<0.000000e+00> : vector<2x96xf32>
      %249 = tpu.matmul %248, %13, %cst_74 {dimension_numbers = #tpu.dot_dimension_numbers<[1], [0], [0], [1], [0, 0, 1, 1], [], []>} : vector<2x32xbf16>, vector<32x96xbf16>, vector<2x96xf32> -> vector<2x96xf32>
      %250 = arith.addf %249, %19 : vector<2x96xf32>
      %251 = arith.truncf %250 : vector<2x96xf32> to vector<2x96xbf16>
      %252 = arith.index_cast %c4_i32 : i32 to index
      %c0_75 = arith.constant 0 : index
      %c0_76 = arith.constant 0 : index
      %253 = vector.load %arg8[%252, %c0_75, %c0_76] : memref<8x2x96xbf16, #tpu.memory_space<vmem>>, vector<1x2x96xbf16>
      %254 = vector.shape_cast %253 : vector<1x2x96xbf16> to vector<2x96xbf16>
      %255 = vector.shape_cast %251 : vector<2x96xbf16> to vector<1x2x96xbf16>
      tpu.vector_store %arg8[%252, %c0_75, %c0_76], %255 {strides = array<i32>} : memref<8x2x96xbf16, #tpu.memory_space<vmem>>, vector<1x2x96xbf16>,
      %c5_i32 = arith.constant 5 : i32
      %256 = arith.index_cast %c5_i32 : i32 to index
      %c0_77 = arith.constant 0 : index
      %c0_78 = arith.constant 0 : index
      %257 = vector.load %arg3[%256, %c0_77, %c0_78] : memref<8x2x96xbf16, #tpu.memory_space<vmem>>, vector<1x2x96xbf16>
      %258 = vector.shape_cast %257 : vector<1x2x96xbf16> to vector<2x96xbf16>
      %259 = arith.truncf %247 : vector<2x32xf32> to vector<2x32xbf16>
      %cst_79 = arith.constant dense<0.000000e+00> : vector<2x96xf32>
      %260 = tpu.matmul %259, %12, %cst_79 {dimension_numbers = #tpu.dot_dimension_numbers<[1], [0], [0], [1], [0, 0, 1, 1], [], []>} : vector<2x32xbf16>, vector<32x96xbf16>, vector<2x96xf32> -> vector<2x96xf32>
      %261 = vector.extract_strided_slice %258 {offsets = [0, 0], sizes = [2, 32], strides = [1, 1]} : vector<2x96xbf16> to vector<2x32xbf16>
      %262 = vector.extract_strided_slice %260 {offsets = [0, 0], sizes = [2, 32], strides = [1, 1]} : vector<2x96xf32> to vector<2x32xf32>
      %263 = arith.extf %261 : vector<2x32xbf16> to vector<2x32xf32>
      %264 = arith.addf %263, %262 : vector<2x32xf32>
      %cst_80 = arith.constant 5.000000e-01 : f32
      %265 = vector.broadcast %cst_80 : f32 to vector<2x32xf32>
      %266 = arith.mulf %265, %264 : vector<2x32xf32>
      %267 = math.tanh %266 : vector<2x32xf32>
      %cst_81 = arith.constant 5.000000e-01 : f32
      %268 = vector.broadcast %cst_81 : f32 to vector<2x32xf32>
      %269 = arith.mulf %268, %267 : vector<2x32xf32>
      %cst_82 = arith.constant 5.000000e-01 : f32
      %270 = vector.broadcast %cst_82 : f32 to vector<2x32xf32>
      %271 = arith.addf %269, %270 : vector<2x32xf32>
      %272 = vector.extract_strided_slice %258 {offsets = [0, 32], sizes = [2, 32], strides = [1, 1]} : vector<2x96xbf16> to vector<2x32xbf16>
      %273 = vector.extract_strided_slice %260 {offsets = [0, 32], sizes = [2, 32], strides = [1, 1]} : vector<2x96xf32> to vector<2x32xf32>
      %274 = arith.extf %272 : vector<2x32xbf16> to vector<2x32xf32>
      %275 = arith.addf %274, %273 : vector<2x32xf32>
      %cst_83 = arith.constant 5.000000e-01 : f32
      %276 = vector.broadcast %cst_83 : f32 to vector<2x32xf32>
      %277 = arith.mulf %276, %275 : vector<2x32xf32>
      %278 = math.tanh %277 : vector<2x32xf32>
      %cst_84 = arith.constant 5.000000e-01 : f32
      %279 = vector.broadcast %cst_84 : f32 to vector<2x32xf32>
      %280 = arith.mulf %279, %278 : vector<2x32xf32>
      %cst_85 = arith.constant 5.000000e-01 : f32
      %281 = vector.broadcast %cst_85 : f32 to vector<2x32xf32>
      %282 = arith.addf %280, %281 : vector<2x32xf32>
      %283 = vector.extract_strided_slice %258 {offsets = [0, 64], sizes = [2, 32], strides = [1, 1]} : vector<2x96xbf16> to vector<2x32xbf16>
      %284 = vector.extract_strided_slice %260 {offsets = [0, 64], sizes = [2, 32], strides = [1, 1]} : vector<2x96xf32> to vector<2x32xf32>
      %285 = arith.addf %284, %16 : vector<2x32xf32>
      %286 = arith.mulf %271, %285 : vector<2x32xf32>
      %287 = arith.extf %283 : vector<2x32xbf16> to vector<2x32xf32>
      %288 = arith.addf %287, %286 : vector<2x32xf32>
      %289 = math.tanh %288 : vector<2x32xf32>
      %cst_86 = arith.constant 1.000000e+00 : f32
      %290 = vector.broadcast %cst_86 : f32 to vector<2x32xf32>
      %291 = arith.subf %290, %282 : vector<2x32xf32>
      %292 = arith.mulf %291, %289 : vector<2x32xf32>
      %293 = arith.mulf %282, %247 : vector<2x32xf32>
      %294 = arith.addf %292, %293 : vector<2x32xf32>
      %295 = arith.truncf %294 : vector<2x32xf32> to vector<2x32xbf16>
      %cst_87 = arith.constant dense<0.000000e+00> : vector<2x96xf32>
      %296 = tpu.matmul %295, %13, %cst_87 {dimension_numbers = #tpu.dot_dimension_numbers<[1], [0], [0], [1], [0, 0, 1, 1], [], []>} : vector<2x32xbf16>, vector<32x96xbf16>, vector<2x96xf32> -> vector<2x96xf32>
      %297 = arith.addf %296, %19 : vector<2x96xf32>
      %298 = arith.truncf %297 : vector<2x96xf32> to vector<2x96xbf16>
      %299 = arith.index_cast %c5_i32 : i32 to index
      %c0_88 = arith.constant 0 : index
      %c0_89 = arith.constant 0 : index
      %300 = vector.load %arg8[%299, %c0_88, %c0_89] : memref<8x2x96xbf16, #tpu.memory_space<vmem>>, vector<1x2x96xbf16>
      %301 = vector.shape_cast %300 : vector<1x2x96xbf16> to vector<2x96xbf16>
      %302 = vector.shape_cast %298 : vector<2x96xbf16> to vector<1x2x96xbf16>
      tpu.vector_store %arg8[%299, %c0_88, %c0_89], %302 {strides = array<i32>} : memref<8x2x96xbf16, #tpu.memory_space<vmem>>, vector<1x2x96xbf16>,
      %c6_i32 = arith.constant 6 : i32
      %303 = arith.index_cast %c6_i32 : i32 to index
      %c0_90 = arith.constant 0 : index
      %c0_91 = arith.constant 0 : index
      %304 = vector.load %arg3[%303, %c0_90, %c0_91] : memref<8x2x96xbf16, #tpu.memory_space<vmem>>, vector<1x2x96xbf16>
      %305 = vector.shape_cast %304 : vector<1x2x96xbf16> to vector<2x96xbf16>
      %306 = arith.truncf %294 : vector<2x32xf32> to vector<2x32xbf16>
      %cst_92 = arith.constant dense<0.000000e+00> : vector<2x96xf32>
      %307 = tpu.matmul %306, %12, %cst_92 {dimension_numbers = #tpu.dot_dimension_numbers<[1], [0], [0], [1], [0, 0, 1, 1], [], []>} : vector<2x32xbf16>, vector<32x96xbf16>, vector<2x96xf32> -> vector<2x96xf32>
      %308 = vector.extract_strided_slice %305 {offsets = [0, 0], sizes = [2, 32], strides = [1, 1]} : vector<2x96xbf16> to vector<2x32xbf16>
      %309 = vector.extract_strided_slice %307 {offsets = [0, 0], sizes = [2, 32], strides = [1, 1]} : vector<2x96xf32> to vector<2x32xf32>
      %310 = arith.extf %308 : vector<2x32xbf16> to vector<2x32xf32>
      %311 = arith.addf %310, %309 : vector<2x32xf32>
      %cst_93 = arith.constant 5.000000e-01 : f32
      %312 = vector.broadcast %cst_93 : f32 to vector<2x32xf32>
      %313 = arith.mulf %312, %311 : vector<2x32xf32>
      %314 = math.tanh %313 : vector<2x32xf32>
      %cst_94 = arith.constant 5.000000e-01 : f32
      %315 = vector.broadcast %cst_94 : f32 to vector<2x32xf32>
      %316 = arith.mulf %315, %314 : vector<2x32xf32>
      %cst_95 = arith.constant 5.000000e-01 : f32
      %317 = vector.broadcast %cst_95 : f32 to vector<2x32xf32>
      %318 = arith.addf %316, %317 : vector<2x32xf32>
      %319 = vector.extract_strided_slice %305 {offsets = [0, 32], sizes = [2, 32], strides = [1, 1]} : vector<2x96xbf16> to vector<2x32xbf16>
      %320 = vector.extract_strided_slice %307 {offsets = [0, 32], sizes = [2, 32], strides = [1, 1]} : vector<2x96xf32> to vector<2x32xf32>
      %321 = arith.extf %319 : vector<2x32xbf16> to vector<2x32xf32>
      %322 = arith.addf %321, %320 : vector<2x32xf32>
      %cst_96 = arith.constant 5.000000e-01 : f32
      %323 = vector.broadcast %cst_96 : f32 to vector<2x32xf32>
      %324 = arith.mulf %323, %322 : vector<2x32xf32>
      %325 = math.tanh %324 : vector<2x32xf32>
      %cst_97 = arith.constant 5.000000e-01 : f32
      %326 = vector.broadcast %cst_97 : f32 to vector<2x32xf32>
      %327 = arith.mulf %326, %325 : vector<2x32xf32>
      %cst_98 = arith.constant 5.000000e-01 : f32
      %328 = vector.broadcast %cst_98 : f32 to vector<2x32xf32>
      %329 = arith.addf %327, %328 : vector<2x32xf32>
      %330 = vector.extract_strided_slice %305 {offsets = [0, 64], sizes = [2, 32], strides = [1, 1]} : vector<2x96xbf16> to vector<2x32xbf16>
      %331 = vector.extract_strided_slice %307 {offsets = [0, 64], sizes = [2, 32], strides = [1, 1]} : vector<2x96xf32> to vector<2x32xf32>
      %332 = arith.addf %331, %16 : vector<2x32xf32>
      %333 = arith.mulf %318, %332 : vector<2x32xf32>
      %334 = arith.extf %330 : vector<2x32xbf16> to vector<2x32xf32>
      %335 = arith.addf %334, %333 : vector<2x32xf32>
      %336 = math.tanh %335 : vector<2x32xf32>
      %cst_99 = arith.constant 1.000000e+00 : f32
      %337 = vector.broadcast %cst_99 : f32 to vector<2x32xf32>
      %338 = arith.subf %337, %329 : vector<2x32xf32>
      %339 = arith.mulf %338, %336 : vector<2x32xf32>
      %340 = arith.mulf %329, %294 : vector<2x32xf32>
      %341 = arith.addf %339, %340 : vector<2x32xf32>
      %342 = arith.truncf %341 : vector<2x32xf32> to vector<2x32xbf16>
      %cst_100 = arith.constant dense<0.000000e+00> : vector<2x96xf32>
      %343 = tpu.matmul %342, %13, %cst_100 {dimension_numbers = #tpu.dot_dimension_numbers<[1], [0], [0], [1], [0, 0, 1, 1], [], []>} : vector<2x32xbf16>, vector<32x96xbf16>, vector<2x96xf32> -> vector<2x96xf32>
      %344 = arith.addf %343, %19 : vector<2x96xf32>
      %345 = arith.truncf %344 : vector<2x96xf32> to vector<2x96xbf16>
      %346 = arith.index_cast %c6_i32 : i32 to index
      %c0_101 = arith.constant 0 : index
      %c0_102 = arith.constant 0 : index
      %347 = vector.load %arg8[%346, %c0_101, %c0_102] : memref<8x2x96xbf16, #tpu.memory_space<vmem>>, vector<1x2x96xbf16>
      %348 = vector.shape_cast %347 : vector<1x2x96xbf16> to vector<2x96xbf16>
      %349 = vector.shape_cast %345 : vector<2x96xbf16> to vector<1x2x96xbf16>
      tpu.vector_store %arg8[%346, %c0_101, %c0_102], %349 {strides = array<i32>} : memref<8x2x96xbf16, #tpu.memory_space<vmem>>, vector<1x2x96xbf16>,
      %c7_i32 = arith.constant 7 : i32
      %350 = arith.index_cast %c7_i32 : i32 to index
      %c0_103 = arith.constant 0 : index
      %c0_104 = arith.constant 0 : index
      %351 = vector.load %arg3[%350, %c0_103, %c0_104] : memref<8x2x96xbf16, #tpu.memory_space<vmem>>, vector<1x2x96xbf16>
      %352 = vector.shape_cast %351 : vector<1x2x96xbf16> to vector<2x96xbf16>
      %353 = arith.truncf %341 : vector<2x32xf32> to vector<2x32xbf16>
      %cst_105 = arith.constant dense<0.000000e+00> : vector<2x96xf32>
      %354 = tpu.matmul %353, %12, %cst_105 {dimension_numbers = #tpu.dot_dimension_numbers<[1], [0], [0], [1], [0, 0, 1, 1], [], []>} : vector<2x32xbf16>, vector<32x96xbf16>, vector<2x96xf32> -> vector<2x96xf32>
      %355 = vector.extract_strided_slice %352 {offsets = [0, 0], sizes = [2, 32], strides = [1, 1]} : vector<2x96xbf16> to vector<2x32xbf16>
      %356 = vector.extract_strided_slice %354 {offsets = [0, 0], sizes = [2, 32], strides = [1, 1]} : vector<2x96xf32> to vector<2x32xf32>
      %357 = arith.extf %355 : vector<2x32xbf16> to vector<2x32xf32>
      %358 = arith.addf %357, %356 : vector<2x32xf32>
      %cst_106 = arith.constant 5.000000e-01 : f32
      %359 = vector.broadcast %cst_106 : f32 to vector<2x32xf32>
      %360 = arith.mulf %359, %358 : vector<2x32xf32>
      %361 = math.tanh %360 : vector<2x32xf32>
      %cst_107 = arith.constant 5.000000e-01 : f32
      %362 = vector.broadcast %cst_107 : f32 to vector<2x32xf32>
      %363 = arith.mulf %362, %361 : vector<2x32xf32>
      %cst_108 = arith.constant 5.000000e-01 : f32
      %364 = vector.broadcast %cst_108 : f32 to vector<2x32xf32>
      %365 = arith.addf %363, %364 : vector<2x32xf32>
      %366 = vector.extract_strided_slice %352 {offsets = [0, 32], sizes = [2, 32], strides = [1, 1]} : vector<2x96xbf16> to vector<2x32xbf16>
      %367 = vector.extract_strided_slice %354 {offsets = [0, 32], sizes = [2, 32], strides = [1, 1]} : vector<2x96xf32> to vector<2x32xf32>
      %368 = arith.extf %366 : vector<2x32xbf16> to vector<2x32xf32>
      %369 = arith.addf %368, %367 : vector<2x32xf32>
      %cst_109 = arith.constant 5.000000e-01 : f32
      %370 = vector.broadcast %cst_109 : f32 to vector<2x32xf32>
      %371 = arith.mulf %370, %369 : vector<2x32xf32>
      %372 = math.tanh %371 : vector<2x32xf32>
      %cst_110 = arith.constant 5.000000e-01 : f32
      %373 = vector.broadcast %cst_110 : f32 to vector<2x32xf32>
      %374 = arith.mulf %373, %372 : vector<2x32xf32>
      %cst_111 = arith.constant 5.000000e-01 : f32
      %375 = vector.broadcast %cst_111 : f32 to vector<2x32xf32>
      %376 = arith.addf %374, %375 : vector<2x32xf32>
      %377 = vector.extract_strided_slice %352 {offsets = [0, 64], sizes = [2, 32], strides = [1, 1]} : vector<2x96xbf16> to vector<2x32xbf16>
      %378 = vector.extract_strided_slice %354 {offsets = [0, 64], sizes = [2, 32], strides = [1, 1]} : vector<2x96xf32> to vector<2x32xf32>
      %379 = arith.addf %378, %16 : vector<2x32xf32>
      %380 = arith.mulf %365, %379 : vector<2x32xf32>
      %381 = arith.extf %377 : vector<2x32xbf16> to vector<2x32xf32>
      %382 = arith.addf %381, %380 : vector<2x32xf32>
      %383 = math.tanh %382 : vector<2x32xf32>
      %cst_112 = arith.constant 1.000000e+00 : f32
      %384 = vector.broadcast %cst_112 : f32 to vector<2x32xf32>
      %385 = arith.subf %384, %376 : vector<2x32xf32>
      %386 = arith.mulf %385, %383 : vector<2x32xf32>
      %387 = arith.mulf %376, %341 : vector<2x32xf32>
      %388 = arith.addf %386, %387 : vector<2x32xf32>
      %389 = arith.truncf %388 : vector<2x32xf32> to vector<2x32xbf16>
      %cst_113 = arith.constant dense<0.000000e+00> : vector<2x96xf32>
      %390 = tpu.matmul %389, %13, %cst_113 {dimension_numbers = #tpu.dot_dimension_numbers<[1], [0], [0], [1], [0, 0, 1, 1], [], []>} : vector<2x32xbf16>, vector<32x96xbf16>, vector<2x96xf32> -> vector<2x96xf32>
      %391 = arith.addf %390, %19 : vector<2x96xf32>
      %392 = arith.truncf %391 : vector<2x96xf32> to vector<2x96xbf16>
      %393 = arith.index_cast %c7_i32 : i32 to index
      %c0_114 = arith.constant 0 : index
      %c0_115 = arith.constant 0 : index
      %394 = vector.load %arg8[%393, %c0_114, %c0_115] : memref<8x2x96xbf16, #tpu.memory_space<vmem>>, vector<1x2x96xbf16>
      %395 = vector.shape_cast %394 : vector<1x2x96xbf16> to vector<2x96xbf16>
      %396 = vector.shape_cast %392 : vector<2x96xbf16> to vector<1x2x96xbf16>
      tpu.vector_store %arg8[%393, %c0_114, %c0_115], %396 {strides = array<i32>} : memref<8x2x96xbf16, #tpu.memory_space<vmem>>, vector<1x2x96xbf16>,
      %c8_i32_116 = arith.constant 8 : i32
      %c0_117 = arith.constant 0 : index
      %c0_118 = arith.constant 0 : index
      %397 = vector.load %arg9[%c0_117, %c0_118] : memref<2x32xf32, #tpu.memory_space<vmem>>, vector<2x32xf32>
      tpu.vector_store %arg9[%c0_117, %c0_118], %388 {strides = array<i32>} : memref<2x32xf32, #tpu.memory_space<vmem>>, vector<2x32xf32>,
    } else {
    }
    %true = arith.constant true
    %9 = arith.xori %6, %true : i1
    %10 = arith.extui %9 : i1 to i32
    %c0_i32_2 = arith.constant 0 : i32
    %11 = arith.cmpi ne, %10, %c0_i32_2 : i32
    scf.if %11 {
      %cst = arith.constant 0.000000e+00 : bf16
      %12 = vector.broadcast %cst : bf16 to vector<8x2x96xbf16>
      %c0 = arith.constant 0 : index
      %c0_3 = arith.constant 0 : index
      %c0_4 = arith.constant 0 : index
      %13 = vector.load %arg8[%c0, %c0_3, %c0_4] : memref<8x2x96xbf16, #tpu.memory_space<vmem>>, vector<8x2x96xbf16>
      tpu.vector_store %arg8[%c0, %c0_3, %c0_4], %12 {strides = array<i32>} : memref<8x2x96xbf16, #tpu.memory_space<vmem>>, vector<8x2x96xbf16>,
    } else {
    }
    return
  }
  func.func @transform_0(%arg0: i32, %arg1: i32, %arg2: memref<1xi32, #tpu.memory_space<smem>>) -> (i32, i32, i32) {
    %c0_i32 = arith.constant 0 : i32
    %c0_i32_0 = arith.constant 0 : i32
    return %arg1, %arg0, %c0_i32 : i32, i32, i32
  }
  func.func @transform_5(%arg0: i32, %arg1: i32, %arg2: memref<1xi32, #tpu.memory_space<smem>>) -> (i32, i32, i32) {
    %c0_i32 = arith.constant 0 : i32
    %c0_i32_0 = arith.constant 0 : i32
    return %arg1, %arg0, %c0_i32 : i32, i32, i32
  }
}

</mosaic_0001>

<bundles_post_ra>
// kernel: encoder_text_forward.3
= control target key start
LH: loop header
LB: loop body
LE: loop exit
PB: predicated region body
PF: predicated region fallthrough
CT: control target
= control target key end

     0   :  { %s1856_s0 = inlined_call_operand.<no memory space> [shape: s32[1], index: 0, kind: input, shape index: {}]   ;;  %s1857_s1 = inlined_call_operand.vmem [shape: bf16[24,2,96], index: 1, kind: input, shape index: {}]   ;;  %s1858_s2 = inlined_call_operand.vmem [shape: s32[2,1], index: 2, kind: input, shape index: {}]   ;;  %s1859_s3 = inlined_call_operand.vmem [shape: bf16[32,96], index: 3, kind: input, shape index: {}]   ;;  %s1860_s4 = inlined_call_operand.vmem [shape: f32[1,32], index: 4, kind: input, shape index: {}]   ;;  %s1861_s5 = inlined_call_operand.hbm [shape: f32[2,32], index: 5, kind: output, shape index: {}]  }
   0x1   :  { %10 = sst [smem:[#allocation8]] %s1856_s0 }
   0x2   :  { %11 = vsyncpa [#allocation10], 0  ;;  %s1570_s20 = smov 0   ;;  %s1572_s21 = smov 0  }
   0x3   :  { %s1574_s22 = smov 0  }
   0x4 LB: > { %s1271_s0 = sadd.s32 4294967295, %s1526_s22   ;;  %s26_s23 = sadd.s32 1, %s1522_s21  ;;  %s1526_s22 = sphi %s1574_s22, %s17_s22   ;;  %s1522_s21 = sphi %s1572_s21, %s1864_s21   ;;  %s1518_s20 = sphi %s1570_s20, %s1863_s20  }
   0x5   : > { %p27_p0 = scmp.ge.s32.totalorder %s26_s23, 3  ;;  %p1275_p1 = scmp.ge.s32.totalorder %s1526_s22, 1 }
   0x6   : > { %p143_p2 = scmp.lt.s32.totalorder %s1526_s22, 4 }
   0x7   : > { %s1866_s23 = smov (%p27_p0, %s26_s23), 0 }
   0x8   : > { %p144_p3 = pnand %p1275_p1, %p143_p2 }
   0x9   : > { %s1592_s24 = sshll.u32 (!%p144_p3), %s1518_s20, 3  ;;  %p1277_p5 = scmp.ne.s32.totalorder (!%p144_p3), %s1518_s20, 0 }
   0xa   : > { %147 = sbr.rel (%p144_p3) target bundleno = 5704 (0x1648), region = 28  ;;  %p167_p4 = scmp.lt.s32.totalorder (!%p144_p3), %s1592_s24, 23 }
   0xf   : > { %s168_s25 = scalar_select %p167_p4, %s1592_s24, 23 }
  0x10   : > { %182 = sbr.rel (%p1277_p5) target bundleno = 31 (0x1f), region = 32 }
  0x11   : > { %s1599_s28 = scalar_lea.vmem %s1857_s1, %s168_s25 }
  0x15   : > { %v216_v0 = vld [vmem:[%s1859_s3] sm:$0xff]  ;;  %v218_v1 = vld [vmem:[%s1859_s3 + $0x8] sm:$0xff] }
  0x16   : > { %217 = vst [vmem:[#allocation4] sm:$0xff] %v216_v0  ;;  %219 = vst [vmem:[#allocation4 + $0x8] sm:$0xff] %v218_v1 }
  0x17   : > { %227 = vsyncadd [#allocation6], 256  ;;  %v247_v2 = vld [vmem:[%s1860_s4] sm:$0x1] }
  0x18   : > { %248 = vst [vmem:[#allocation5] sm:$0x1] %v247_v2 }
  0x19   : > { %274 = vsyncadd [#allocation6 + $0x1], 16 }
  0x1a   : > { %1508 = dma.done.wait [#allocation6], 256 }
  0x1b   : > { %1509 = vsyncadd [#allocation6], 4294967040 }
  0x1c   : > { %1510 = dma.done.wait [#allocation6 + $0x1], 16 }
  0x1d   : > { %1511 = vsyncadd [#allocation6 + $0x1], 4294967280  ;;  %vm282_vm0 = vcmask 254976   ;;  %v1528_v3 = vmov 0.0  }
  0x1e   : > { %283 = vst.msk [vmem:[#allocation2] sm:$0x3] %vm282_vm0, %v1528_v3  ;;  %284 = vst.msk [vmem:[#allocation3] sm:$0x3] %vm282_vm0, %v1528_v3 }
  0x1f PF: > { %s286_s10 = sld [smem:[#allocation8]]  ;;  %v1614_v4 = vld [vmem:[%s1858_s2] sm:$0x3] }
  0x25   : > { %p1279_p6 = scmp.gt.s32.totalorder %s1592_s24, %s286_s10 }
  0x26   : > { %s1531_s13 = smov (!%p1279_p6), 64   ;;  %s1533_s14 = smov (!%p1279_p6), 32  }
  0x27   : > { %291 = sbr.rel (%p1279_p6) target bundleno = 5503 (0x157f), region = 100  ;;  %s1534_s15 = smov (!%p1279_p6), 96  }
  0x28   : > { %s612_s16 = sadd.s32 (!%p1279_p6), 2, %s1592_s24  ;;  %s714_s17 = sadd.s32 (!%p1279_p6), 3, %s1592_s24 }
  0x29   : > { %s918_s18 = sadd.s32 (!%p1279_p6), 5, %s1592_s24  ;;  %s1020_s19 = sadd.s32 (!%p1279_p6), 6, %s1592_s24 }
  0x2a   : > { %s1122_s25 = sadd.s32 (!%p1279_p6), 7, %s1592_s24  ;;  %s510_s26 = sadd.s32 (!%p1279_p6), 1, %s1592_s24 }
  0x2b   : > { %s816_s27 = sadd.s32 (!%p1279_p6), 4, %s1592_s24 }
  0x2c   : > { %v1617_v5 = vld [vmem:[#allocation4 + $0x8] sm:$0xff]   ;;  %v1529_v6 = vmov 0.0   ;;  %v1622_v7 = vld [vmem:[#allocation4] sm:$0xff]   ;;  %vm1530_vm1 = vmmov 0   ;;  %v302_v8 = vld [vmem:[#allocation2] sm:$0x3]  ;;  %v376_v13 = vlaneseq }
  0x2d   : > { %1329 = vmatprep.subr.bf16.mxu0 %v1529_v6  ;;  %1337 = vmatprep.subr.bf16.mxu1 %v1529_v6  ;;  %v1280_v9 = vld [vmem:[#allocation5] ss:$0 sm:$0xff]  ;;  %v305_v10 = vpack.c.bf16 %v302_v8, %v302_v8  ;;  %vm318_vm2 = vcmask 261120   ;;  %v1532_v11 = vmov 1983009808  }
  0x2e   : > { %1330 = vmatpush3.bf16.msra.mxu0 %v1617_v5  ;;  %1333 = vmatprep.mubr.msk.bf16.mxu0 %vm1530_vm1, %v1529_v6  ;;  %v374_v12 = vunpack.c.l.s4 %v1532_v11  ;;  %v377_v15 = vshrl.u32 %v376_v13, 7  ;;  %v304_v25 = vld [vmem:[%s1599_s28] sm:$0x1]  ;;  %v1284_v51 = vld [vmem:[%s1599_s28 + $0x1] sm:$0x1] }
  0x2f   : > { %1331 = vmatprep.subr.bf16.mxu0 %v1529_v6  ;;  %368 = vrot.lane.b32.xlu0 %v1280_v9, %s1531_s13  ;;  %v362_v26 = vunpack.c.l.bf16 %v304_v25  ;;  %v477_v52 = vunpack.c.l.bf16 %v1284_v51 }
  0x30   : > { %1338 = vmatpush3.bf16.msra.mxu1 %v1617_v5  ;;  %1341 = vmatprep.mubr.msk.bf16.mxu1 %vm1530_vm1, %v1529_v6  ;;  %v375_v14 = vunpack.c.0.s8 %v374_v12 }
  0x31   : > { %1339 = vmatprep.subr.bf16.mxu1 %v1529_v6 }
  0x32   : > { %1332 = vmatpush3.bf16.msra.mxu0 %v1622_v7  ;;  %v1645_v17 = vsub.s32 %v375_v14, %v377_v15 }
  0x33   : > { %1345 = vmatprep.subr.bf16.mxu0 %v1529_v6 }
  0x34   : > { %1340 = vmatpush3.bf16.msra.mxu1 %v1622_v7  ;;  %v403_v23 = vrot.slane %v302_v8, %v1645_v17 }
  0x35   : > { %1334 = vmatmul.mubr.msk.bf16.vlgmr.msra.gmra.mxu0 %vm318_vm2, %v305_v10  ;;  %1353 = vmatprep.subr.bf16.mxu1 %v1529_v6 }
  0x36   : > { %1346 = vmatpush3.bf16.msra.mxu0 %v1617_v5  ;;  %1349 = vmatprep.mubr.msk.bf16.mxu0 %vm1530_vm1, %v1529_v6 }
  0x37   : > { %1347 = vmatprep.subr.bf16.mxu0 %v1529_v6 }
  0x3a   : > { %1348 = vmatpush3.bf16.msra.mxu0 %v1622_v7 }
  0x3b   : > { %1361 = vmatprep.subr.bf16.mxu0 %v1529_v6 }
  0xa1   : > { %v1643_v16 = vpop.permute.xlu0 %368 }
  0xf5   : > { %v356_v18 = vpop.f32.mrf.mxu0 }
  0xf6   : > { %v371_v19 = vadd.f32 %v1643_v16, %v356_v18  ;;  %v363_v27 = vadd.f32 %v362_v26, %v356_v18  ;;  %v1286_v18 = vld [vmem:[%s1599_s28 + $0x2] sm:$0x1] }
  0xf7   : > { %v1335_v20 = vpop.f32.mrf.mxu0 }
  0xf8   : > { %v379_v21 = vrot.slane %v371_v19, %v1645_v17  ;;  %v364_v28 = vmul.f32 0.5, %v363_v27  ;;  %v579_v19 = vunpack.c.l.bf16 %v1286_v18 }
  0xf9   : > { %v359_v22 = vpop.f32.mrf.mxu0 }
  0xfa   : > { %380 = vrot.lane.b32.xlu0 %v379_v21, %s1531_s13  ;;  %1436 = vtanh.f32 %v364_v28 }
  0xfb   : > { %v1336_v24 = vpop.f32.mrf.mxu0 }
  0xfe   : > { %404 = vrot.lane.b32.xlu0 %v403_v23, %s1533_s14 }
 0x107   : > { %v1437_v29 = vpop.eup %1436 }
 0x108   : > { %v366_v30 = vmul.f32 0.5, %v1437_v29 }
 0x10a   : > { %v367_v31 = vadd.f32 0.5, %v366_v30 }
 0x10c   : > { %v390_v38 = vsub.f32 1.0, %v367_v31 }
 0x16c   : > { %v381_v32 = vpop.permute.xlu0 %380 }
 0x16d   : > { %v383_v33 = vmul.f32 %v381_v32, %v367_v31 }
 0x16f   : > { %385 = vrot.lane.b32.xlu1 %v383_v33, %s1531_s13 }
 0x170   : > { %v405_v37 = vpop.permute.xlu0 %404 }
 0x171   : > { %v407_v40 = vmul.f32 %v405_v37, %v367_v31 }
 0x1e1   : > { %v386_v34 = vpop.permute.xlu1 %385 }
 0x1e2   : > { %v388_v35 = vadd.f32 %v386_v34, %v362_v26 }
 0x1e4   : > { %1438 = vtanh.f32 %v388_v35 }
 0x1f1   : > { %v1439_v36 = vpop.eup %1438 }
 0x1f2   : > { %392 = vrot.lane.b32.xlu1 %v1439_v36, %s1534_s15 }
 0x264   : > { %v393_v39 = vpop.permute.xlu1 %392 }
 0x265   : > { %v395_v41 = vmul.f32 %v393_v39, %v390_v38 }
 0x267   : > { %v1654_v42 = vadd.f32 %v407_v40, %v395_v41 }
 0x269   : > { %v430_v43 = vpack.c.bf16 %v1654_v42, %v1654_v42 }
 0x26b   : > { %432 = vrot.lane.b32.xlu1 %v430_v43, %s1534_s15 }
 0x2dd   : > { %v433_v44 = vpop.permute.xlu1 %432 }
 0x2de   : > { %1342 = vmatmul.mubr.msk.bf16.vlgmr.msra.gmra.mxu1 %vm318_vm2, %v433_v44  ;;  %v1288_v44 = vld [vmem:[%s1599_s28 + $0x3] sm:$0x1] }
 0x2df   : > { %1354 = vmatpush3.bf16.msra.mxu1 %v1617_v5  ;;  %1357 = vmatprep.mubr.msk.bf16.mxu1 %vm1530_vm1, %v1529_v6 }
 0x2e0   : > { %1355 = vmatprep.subr.bf16.mxu1 %v1529_v6 }
 0x2e3   : > { %1356 = vmatpush3.bf16.msra.mxu1 %v1622_v7 }
 0x2e4   : > { %1369 = vmatprep.subr.bf16.mxu1 %v1529_v6 }
 0x39e   : > { %v471_v45 = vpop.f32.mrf.mxu1 }
 0x39f   : > { %v483_v46 = vadd.f32 %v471_v45, %v1643_v16  ;;  %v478_v53 = vadd.f32 %v477_v52, %v471_v45  ;;  %v681_v45 = vunpack.c.l.bf16 %v1288_v44 }
 0x3a0   : > { %v1343_v47 = vpop.f32.mrf.mxu1 }
 0x3a1   : > { %v491_v48 = vrot.slane %v483_v46, %v1645_v17  ;;  %v479_v54 = vmul.f32 0.5, %v478_v53 }
 0x3a2   : > { %v474_v49 = vpop.f32.mrf.mxu1 }
 0x3a3   : > { %492 = vrot.lane.b32.xlu0 %v491_v48, %s1531_s13  ;;  %1440 = vtanh.f32 %v479_v54 }
 0x3a4   : > { %v1344_v50 = vpop.f32.mrf.mxu1 }
 0x3b0   : > { %v1441_v55 = vpop.eup %1440 }
 0x3b1   : > { %v481_v56 = vmul.f32 0.5, %v1441_v55 }
 0x3b3   : > { %v482_v57 = vadd.f32 0.5, %v481_v56 }
 0x3b5   : > { %v502_v63 = vsub.f32 1.0, %v482_v57  ;;  %v508_v1 = vmul.f32 %v482_v57, %v1654_v42 }
 0x415   : > { %v493_v58 = vpop.permute.xlu0 %492 }
 0x416   : > { %v495_v59 = vmul.f32 %v493_v58, %v482_v57 }
 0x418   : > { %497 = vrot.lane.b32.xlu1 %v495_v59, %s1531_s13 }
 0x48a   : > { %v498_v60 = vpop.permute.xlu1 %497 }
 0x48b   : > { %v500_v61 = vadd.f32 %v498_v60, %v477_v52 }
 0x48d   : > { %1442 = vtanh.f32 %v500_v61 }
 0x49a   : > { %v1443_v62 = vpop.eup %1442 }
 0x49b   : > { %504 = vrot.lane.b32.xlu0 %v1443_v62, %s1534_s15 }
 0x50d   : > { %v505_v0 = vpop.permute.xlu0 %504 }
 0x50e   : > { %v507_v2 = vmul.f32 %v505_v0, %v502_v63 }
 0x510   : > { %v1673_v3 = vadd.f32 %v508_v1, %v507_v2 }
 0x512   : > { %v532_v8 = vpack.c.bf16 %v1673_v3, %v1673_v3 }
 0x514   : > { %534 = vrot.lane.b32.xlu1 %v532_v8, %s1534_s15 }
 0x586   : > { %v535_v9 = vpop.permute.xlu1 %534 }
 0x587   : > { %1350 = vmatmul.mubr.msk.bf16.vlgmr.msra.gmra.mxu0 %vm318_vm2, %v535_v9 }
 0x588   : > { %1362 = vmatpush3.bf16.msra.mxu0 %v1617_v5  ;;  %1365 = vmatprep.mubr.msk.bf16.mxu0 %vm1530_vm1, %v1529_v6 }
 0x589   : > { %1363 = vmatprep.subr.bf16.mxu0 %v1529_v6 }
 0x58c   : > { %1364 = vmatpush3.bf16.msra.mxu0 %v1622_v7 }
 0x58d   : > { %1377 = vmatprep.subr.bf16.mxu0 %v1529_v6 }
 0x647   : > { %v573_v10 = vpop.f32.mrf.mxu0 }
 0x648   : > { %v585_v11 = vadd.f32 %v573_v10, %v1643_v16  ;;  %v580_v20 = vadd.f32 %v579_v19, %v573_v10  ;;  %v1290_v10 = vld [vmem:[%s1599_s28 + $0x4] sm:$0x1] }
 0x649   : > { %v1351_v12 = vpop.f32.mrf.mxu0 }
 0x64a   : > { %v593_v13 = vrot.slane %v585_v11, %v1645_v17  ;;  %v581_v21 = vmul.f32 0.5, %v580_v20  ;;  %v783_v11 = vunpack.c.l.bf16 %v1290_v10 }
 0x64b   : > { %v576_v14 = vpop.f32.mrf.mxu0 }
 0x64c   : > { %594 = vrot.lane.b32.xlu0 %v593_v13, %s1531_s13  ;;  %1444 = vtanh.f32 %v581_v21 }
 0x64d   : > { %v1352_v15 = vpop.f32.mrf.mxu0 }
 0x659   : > { %v1445_v22 = vpop.eup %1444 }
 0x65a   : > { %v583_v23 = vmul.f32 0.5, %v1445_v22 }
 0x65c   : > { %v584_v24 = vadd.f32 0.5, %v583_v23 }
 0x65e   : > { %v604_v30 = vsub.f32 1.0, %v584_v24  ;;  %v610_v32 = vmul.f32 %v584_v24, %v1673_v3 }
 0x6be   : > { %v595_v25 = vpop.permute.xlu0 %594 }
 0x6bf   : > { %v597_v26 = vmul.f32 %v595_v25, %v584_v24 }
 0x6c1   : > { %599 = vrot.lane.b32.xlu1 %v597_v26, %s1531_s13 }
 0x733   : > { %v600_v27 = vpop.permute.xlu1 %599 }
 0x734   : > { %v602_v28 = vadd.f32 %v600_v27, %v579_v19 }
 0x736   : > { %1446 = vtanh.f32 %v602_v28 }
 0x743   : > { %v1447_v29 = vpop.eup %1446 }
 0x744   : > { %606 = vrot.lane.b32.xlu0 %v1447_v29, %s1534_s15 }
 0x7b6   : > { %v607_v31 = vpop.permute.xlu0 %606 }
 0x7b7   : > { %v609_v33 = vmul.f32 %v607_v31, %v604_v30 }
 0x7b9   : > { %v1692_v34 = vadd.f32 %v610_v32, %v609_v33 }
 0x7bb   : > { %v634_v35 = vpack.c.bf16 %v1692_v34, %v1692_v34 }
 0x7bd   : > { %636 = vrot.lane.b32.xlu1 %v634_v35, %s1534_s15 }
 0x82f   : > { %v637_v36 = vpop.permute.xlu1 %636 }
 0x830   : > { %1358 = vmatmul.mubr.msk.bf16.vlgmr.msra.gmra.mxu1 %vm318_vm2, %v637_v36 }
 0x831   : > { %1370 = vmatpush3.bf16.msra.mxu1 %v1617_v5  ;;  %1373 = vmatprep.mubr.msk.bf16.mxu1 %vm1530_vm1, %v1529_v6 }
 0x832   : > { %1371 = vmatprep.subr.bf16.mxu1 %v1529_v6 }
 0x835   : > { %1372 = vmatpush3.bf16.msra.mxu1 %v1622_v7 }
 0x836   : > { %1385 = vmatprep.subr.bf16.mxu1 %v1529_v6 }
 0x8f0   : > { %v675_v37 = vpop.f32.mrf.mxu1 }
 0x8f1   : > { %v687_v38 = vadd.f32 %v675_v37, %v1643_v16  ;;  %v682_v46 = vadd.f32 %v681_v45, %v675_v37 }
 0x8f2   : > { %v1359_v39 = vpop.f32.mrf.mxu1 }
 0x8f3   : > { %v695_v40 = vrot.slane %v687_v38, %v1645_v17  ;;  %v683_v47 = vmul.f32 0.5, %v682_v46  ;;  %v1292_v38 = vld [vmem:[%s1599_s28 + $0x5] sm:$0x1] }
 0x8f4   : > { %v678_v41 = vpop.f32.mrf.mxu1  ;;  %v885_v39 = vunpack.c.l.bf16 %v1292_v38 }
 0x8f5   : > { %696 = vrot.lane.b32.xlu0 %v695_v40, %s1531_s13  ;;  %1448 = vtanh.f32 %v683_v47 }
 0x8f6   : > { %v1360_v43 = vpop.f32.mrf.mxu1 }
 0x902   : > { %v1449_v48 = vpop.eup %1448 }
 0x903   : > { %v685_v49 = vmul.f32 0.5, %v1449_v48 }
 0x905   : > { %v686_v50 = vadd.f32 0.5, %v685_v49 }
 0x907   : > { %v706_v56 = vsub.f32 1.0, %v686_v50  ;;  %v712_v58 = vmul.f32 %v686_v50, %v1692_v34 }
 0x967   : > { %v697_v51 = vpop.permute.xlu0 %696 }
 0x968   : > { %v699_v52 = vmul.f32 %v697_v51, %v686_v50 }
 0x96a   : > { %701 = vrot.lane.b32.xlu1 %v699_v52, %s1531_s13 }
 0x9dc   : > { %v702_v53 = vpop.permute.xlu1 %701 }
 0x9dd   : > { %v704_v54 = vadd.f32 %v702_v53, %v681_v45 }
 0x9df   : > { %1450 = vtanh.f32 %v704_v54 }
 0x9ec   : > { %v1451_v55 = vpop.eup %1450 }
 0x9ed   : > { %708 = vrot.lane.b32.xlu0 %v1451_v55, %s1534_s15 }
 0xa5f   : > { %v709_v57 = vpop.permute.xlu0 %708 }
 0xa60   : > { %v711_v59 = vmul.f32 %v709_v57, %v706_v56 }
 0xa62   : > { %v1711_v60 = vadd.f32 %v712_v58, %v711_v59 }
 0xa64   : > { %v736_v61 = vpack.c.bf16 %v1711_v60, %v1711_v60 }
 0xa66   : > { %738 = vrot.lane.b32.xlu1 %v736_v61, %s1534_s15 }
 0xad8   : > { %v739_v62 = vpop.permute.xlu1 %738 }
 0xad9   : > { %1366 = vmatmul.mubr.msk.bf16.vlgmr.msra.gmra.mxu0 %vm318_vm2, %v739_v62  ;;  %v1294_v62 = vld [vmem:[%s1599_s28 + $0x6] sm:$0x1] }
 0xada   : > { %1378 = vmatpush3.bf16.msra.mxu0 %v1617_v5  ;;  %1381 = vmatprep.mubr.msk.bf16.mxu0 %vm1530_vm1, %v1529_v6 }
 0xadb   : > { %1379 = vmatprep.subr.bf16.mxu0 %v1529_v6 }
 0xade   : > { %1380 = vmatpush3.bf16.msra.mxu0 %v1622_v7 }
 0xb99   : > { %v777_v63 = vpop.f32.mrf.mxu0 }
 0xb9a   : > { %v789_v0 = vadd.f32 %v777_v63, %v1643_v16  ;;  %v784_v12 = vadd.f32 %v783_v11, %v777_v63  ;;  %v987_v63 = vunpack.c.l.bf16 %v1294_v62  ;;  %v627_v62 = vrot.slane %v1692_v34, %v1645_v17 }
 0xb9b   : > { %v1367_v1 = vpop.f32.mrf.mxu0 }
 0xb9c   : > { %v797_v2 = vrot.slane %v789_v0, %v1645_v17  ;;  %v785_v13 = vmul.f32 0.5, %v784_v12 }
 0xb9d   : > { %v780_v8 = vpop.f32.mrf.mxu0 }
 0xb9e   : > { %798 = vrot.lane.b32.xlu0 %v797_v2, %s1531_s13  ;;  %1452 = vtanh.f32 %v785_v13 }
 0xb9f   : > { %v1368_v9 = vpop.f32.mrf.mxu0 }
 0xbab   : > { %v1453_v14 = vpop.eup %1452 }
 0xbac   : > { %v787_v15 = vmul.f32 0.5, %v1453_v14 }
 0xbae   : > { %v788_v18 = vadd.f32 0.5, %v787_v15 }
 0xbb0   : > { %v808_v24 = vsub.f32 1.0, %v788_v18  ;;  %v814_v26 = vmul.f32 %v788_v18, %v1711_v60 }
 0xc10   : > { %v799_v19 = vpop.permute.xlu0 %798 }
 0xc11   : > { %v801_v20 = vmul.f32 %v799_v19, %v788_v18 }
 0xc13   : > { %803 = vrot.lane.b32.xlu1 %v801_v20, %s1531_s13 }
 0xc85   : > { %v804_v21 = vpop.permute.xlu1 %803 }
 0xc86   : > { %v806_v22 = vadd.f32 %v804_v21, %v783_v11 }
 0xc88   : > { %1454 = vtanh.f32 %v806_v22 }
 0xc95   : > { %v1455_v23 = vpop.eup %1454 }
 0xc96   : > { %810 = vrot.lane.b32.xlu0 %v1455_v23, %s1534_s15 }
 0xd08   : > { %v811_v25 = vpop.permute.xlu0 %810 }
 0xd09   : > { %v813_v27 = vmul.f32 %v811_v25, %v808_v24  ;;  %v1535_v24 = vmov 0  }
 0xd0a   : > { %1432 = vset.pattern.permute.xlu1 %v1535_v24  ;;  %1433 = vset.pattern.permute.xlu0 %v1535_v24 }
 0xd0b   : > { %v1729_v28 = vadd.f32 %v814_v26, %v813_v27 }
 0xd0d   : > { %v838_v29 = vpack.c.bf16 %v1729_v28, %v1729_v28 }
 0xd0f   : > { %840 = vrot.lane.b32.xlu1 %v838_v29, %s1534_s15 }
 0xd81   : > { %v841_v30 = vpop.permute.xlu1 %840 }
 0xd82   : > { %1374 = vmatmul.mubr.msk.bf16.vlgmr.msra.gmra.mxu1 %vm318_vm2, %v841_v30 }
 0xd83   : > { %1386 = vmatpush3.bf16.msra.mxu1 %v1617_v5  ;;  %1389 = vmatprep.mubr.msk.bf16.mxu1 %vm1530_vm1, %v1529_v6 }
 0xd84   : > { %1387 = vmatprep.subr.bf16.mxu1 %v1529_v6 }
 0xd87   : > { %1388 = vmatpush3.bf16.msra.mxu1 %v1622_v7 }
 0xe42   : > { %v879_v31 = vpop.f32.mrf.mxu1 }
 0xe43   : > { %v891_v32 = vadd.f32 %v879_v31, %v1643_v16  ;;  %v886_v5 = vadd.f32 %v885_v39, %v879_v31 }
 0xe44   : > { %v1375_v33 = vpop.f32.mrf.mxu1 }
 0xe45   : > { %v899_v35 = vrot.slane %v891_v32, %v1645_v17  ;;  %v887_v40 = vmul.f32 0.5, %v886_v5  ;;  %v1296_v32 = vld [vmem:[%s1599_s28 + $0x7] sm:$0x1] }
 0xe46   : > { %v882_v36 = vpop.f32.mrf.mxu1  ;;  %v1089_v33 = vunpack.c.l.bf16 %v1296_v32 }
 0xe47   : > { %900 = vrot.lane.b32.xlu0 %v899_v35, %s1531_s13  ;;  %1456 = vtanh.f32 %v887_v40 }
 0xe48   : > { %v1376_v37 = vpop.f32.mrf.mxu1 }
 0xe54   : > { %v1457_v41 = vpop.eup %1456 }
 0xe55   : > { %v889_v43 = vmul.f32 0.5, %v1457_v41  ;;  %v613_v41 = vstv %s612_s16 }
 0xe56   : > { %vm614_vm4 = vcmp.eq.s32.totalorder %v1614_v4, %v613_v41 }
 0xe57   : > { %v890_v6 = vadd.f32 0.5, %v889_v43 }
 0xe59   : > { %v910_v48 = vsub.f32 1.0, %v890_v6  ;;  %v916_v50 = vmul.f32 %v890_v6, %v1729_v28 }
 0xeb9   : > { %v901_v44 = vpop.permute.xlu0 %900 }
 0xeba   : > { %v903_v7 = vmul.f32 %v901_v44, %v890_v6  ;;  %v715_v6 = vstv %s714_s17  ;;  %v615_v44 = vsel %vm614_vm4, 1, %v1535_v24 }
 0xebb   : > { %vm716_vm5 = vcmp.eq.s32.totalorder %v1614_v4, %v715_v6 }
 0xebc   : > { %905 = vrot.lane.b32.xlu1 %v903_v7, %s1531_s13  ;;  %v919_v7 = vstv %s918_s18 }
 0xebd   : > { %vm920_vm6 = vcmp.eq.s32.totalorder %v1614_v4, %v919_v7 }
 0xf2e   : > { %v906_v45 = vpop.permute.xlu1 %905 }
 0xf2f   : > { %v908_v46 = vadd.f32 %v906_v45, %v885_v39  ;;  %v409_v39 = vstv %s1592_s24  ;;  %v717_v45 = vsel %vm716_vm5, 1, %v1535_v24 }
 0xf30   : > { %vm410_vm3 = vcmp.eq.s32.totalorder %v1614_v4, %v409_v39 }
 0xf31   : > { %1458 = vtanh.f32 %v908_v46  ;;  %v411_v43 = vsel %vm410_vm3, 1, %v1535_v24  ;;  %v1021_v46 = vstv %s1020_s19 }
 0xf32   : > { %vm1022_vm7 = vcmp.eq.s32.totalorder %v1614_v4, %v1021_v46 }
 0xf3e   : > { %v1459_v47 = vpop.eup %1458 }
 0xf3f   : > { %912 = vrot.lane.b32.xlu0 %v1459_v47, %s1534_s15  ;;  %v921_v47 = vsel %vm920_vm6, 1, %v1535_v24 }
 0xfb1   : > { %v913_v49 = vpop.permute.xlu0 %912 }
 0xfb2   : > { %v915_v51 = vmul.f32 %v913_v49, %v910_v48  ;;  %v1123_v48 = vstv %s1122_s25  ;;  %v1023_v49 = vsel %vm1022_vm7, 1, %v1535_v24 }
 0xfb3   : > { %vm1124_vm8 = vcmp.eq.s32.totalorder %v1614_v4, %v1123_v48 }
 0xfb4   : > { %v1747_v52 = vadd.f32 %v916_v50, %v915_v51  ;;  %v1125_v50 = vsel %vm1124_vm8, 1, %v1535_v24  ;;  %v729_v51 = vrot.slane %v1711_v60, %v1645_v17 }
 0xfb6   : > { %v940_v53 = vpack.c.bf16 %v1747_v52, %v1747_v52 }
 0xfb8   : > { %942 = vrot.lane.b32.xlu1 %v940_v53, %s1534_s15  ;;  %v933_v53 = vrot.slane %v1747_v52, %v1645_v17 }
0x102a   : > { %v943_v54 = vpop.permute.xlu1 %942 }
0x102b   : > { %1382 = vmatmul.mubr.msk.bf16.vlgmr.msra.gmra.mxu0 %vm318_vm2, %v943_v54 }
0x10eb   : > { %v981_v55 = vpop.f32.mrf.mxu0 }
0x10ec   : > { %v993_v56 = vadd.f32 %v981_v55, %v1643_v16  ;;  %v988_v0 = vadd.f32 %v987_v63, %v981_v55 }
0x10ed   : > { %v1383_v57 = vpop.f32.mrf.mxu0 }
0x10ee   : > { %v1001_v58 = vrot.slane %v993_v56, %v1645_v17  ;;  %v989_v1 = vmul.f32 0.5, %v988_v0  ;;  %v511_v56 = vstv %s510_s26 }
0x10ef   : > { %v984_v59 = vpop.f32.mrf.mxu0  ;;  %vm512_vm9 = vcmp.eq.s32.totalorder %v1614_v4, %v511_v56 }
0x10f0   : > { %1002 = vrot.lane.b32.xlu0 %v1001_v58, %s1531_s13  ;;  %1460 = vtanh.f32 %v989_v1  ;;  %v817_v58 = vstv %s816_s27  ;;  %v513_v60 = vsel %vm512_vm9, 1, %v1535_v24  ;;  %v423_v59 = vrot.slane %v1654_v42, %v1645_v17 }
0x10f1   : > { %v1384_v61 = vpop.f32.mrf.mxu0  ;;  %vm818_vm10 = vcmp.eq.s32.totalorder %v1614_v4, %v817_v58  ;;  %v831_v4 = vrot.slane %v1729_v28, %v1645_v17 }
0x10f2   : > { %v525_v61 = vrot.slane %v1673_v3, %v1645_v17 }
0x10fd   : > { %v1461_v2 = vpop.eup %1460 }
0x10fe   : > { %v991_v8 = vmul.f32 0.5, %v1461_v2 }
0x1100   : > { %v992_v9 = vadd.f32 0.5, %v991_v8 }
0x1102   : > { %v1012_v15 = vsub.f32 1.0, %v992_v9  ;;  %v1018_v19 = vmul.f32 %v992_v9, %v1747_v52  ;;  %v819_v52 = vsel %vm818_vm10, 1, %v1535_v24 }
0x1162   : > { %v1003_v10 = vpop.permute.xlu0 %1002 }
0x1163   : > { %v1005_v11 = vmul.f32 %v1003_v10, %v992_v9 }
0x1165   : > { %1007 = vrot.lane.b32.xlu1 %v1005_v11, %s1531_s13 }
0x11d7   : > { %v1008_v12 = vpop.permute.xlu1 %1007 }
0x11d8   : > { %v1010_v13 = vadd.f32 %v1008_v12, %v987_v63 }
0x11da   : > { %1462 = vtanh.f32 %v1010_v13 }
0x11e7   : > { %v1463_v14 = vpop.eup %1462 }
0x11e8   : > { %1014 = vrot.lane.b32.xlu0 %v1463_v14, %s1534_s15 }
0x125a   : > { %v1015_v18 = vpop.permute.xlu0 %1014 }
0x125b   : > { %v1017_v20 = vmul.f32 %v1015_v18, %v1012_v15 }
0x125d   : > { %v1760_v21 = vadd.f32 %v1018_v19, %v1017_v20  ;;  %v303_v20 = vld [vmem:[#allocation3] sm:$0x3] }
0x125f   : > { %v1042_v22 = vpack.c.bf16 %v1760_v21, %v1760_v21  ;;  %v1035_v42 = vrot.slane %v1760_v21, %v1645_v17 }
0x1261   : > { %1044 = vrot.lane.b32.xlu1 %v1042_v22, %s1534_s15 }
0x12d3   : > { %v1045_v23 = vpop.permute.xlu1 %1044 }
0x12d4   : > { %1390 = vmatmul.mubr.msk.bf16.vlgmr.msra.gmra.mxu1 %vm318_vm2, %v1045_v23  ;;  %vm1142_vm2 = vcmask 254976  }
0x1394   : > { %v1083_v25 = vpop.f32.mrf.mxu1 }
0x1395   : > { %v1095_v26 = vadd.f32 %v1083_v25, %v1643_v16  ;;  %v1090_v35 = vadd.f32 %v1089_v33, %v1083_v25 }
0x1396   : > { %v1391_v27 = vpop.f32.mrf.mxu1 }
0x1397   : > { %v1103_v29 = vrot.slane %v1095_v26, %v1645_v17  ;;  %v1091_v36 = vmul.f32 0.5, %v1090_v35 }
0x1398   : > { %v1086_v30 = vpop.f32.mrf.mxu1 }
0x1399   : > { %1104 = vrot.lane.b32.xlu0 %v1103_v29, %s1531_s13  ;;  %1464 = vtanh.f32 %v1091_v36 }
0x139a   : > { %v1392_v31 = vpop.f32.mrf.mxu1 }
0x13a6   : > { %v1465_v37 = vpop.eup %1464 }
0x13a7   : > { %v1093_v38 = vmul.f32 0.5, %v1465_v37 }
0x13a9   : > { %v1773_v5 = vadd.f32 0.5, %v1093_v38 }
0x13ab   : > { %v1114_v63 = vsub.f32 1.0, %v1773_v5  ;;  %v1120_v0 = vmul.f32 %v1773_v5, %v1760_v21 }
0x140b   : > { %v1105_v16 = vpop.permute.xlu0 %1104 }
0x140c   : > { %v1107_v40 = vmul.f32 %v1105_v16, %v1773_v5 }
0x140e   : > { %1109 = vrot.lane.b32.xlu1 %v1107_v40, %s1531_s13 }
0x1412   : > { %413 = vperm.xlu1 %1432, %v411_v43  }
0x1416   : > { %617 = vperm.xlu1 %1432, %v615_v44  }
0x141a   : > { %719 = vperm.xlu1 %1432, %v717_v45  }
0x141e   : > { %923 = vperm.xlu1 %1432, %v921_v47  }
0x1422   : > { %1025 = vperm.xlu1 %1432, %v1023_v49  }
0x1426   : > { %1127 = vperm.xlu1 %1432, %v1125_v50  }
0x142a   : > { %730 = vrot.lane.b32.xlu1 %v729_v51, %s1534_s15 }
0x142e   : > { %934 = vrot.lane.b32.xlu1 %v933_v53, %s1534_s15 }
0x1480   : > { %v1110_v54 = vpop.permute.xlu1 %1109 }
0x1481   : > { %v1112_v55 = vadd.f32 %v1110_v54, %v1089_v33 }
0x1483   : > { %1466 = vtanh.f32 %v1112_v55 }
0x148d   : > { %v414_v28 = vpop.permute.xlu1 %413 }
0x148e   : > { %vm415_vm11 = vcmp.eq.s32.totalorder %v414_v28, 1 }
0x1490   : > { %v1467_v57 = vpop.eup %1466 }
0x1491   : > { %1116 = vrot.lane.b32.xlu0 %v1467_v57, %s1534_s15  ;;  %v618_v8 = vpop.permute.xlu1 %617 }
0x1492   : > { %vm619_vm13 = vcmp.eq.s32.totalorder %v618_v8, 1 }
0x1495   : > { %515 = vperm.xlu0 %1433, %v513_v60   ;;  %v720_v10 = vpop.permute.xlu1 %719 }
0x1496   : > { %vm721_vm14 = vcmp.eq.s32.totalorder %v720_v10, 1 }
0x1499   : > { %821 = vperm.xlu0 %1433, %v819_v52   ;;  %v924_v12 = vpop.permute.xlu1 %923 }
0x149a   : > { %vm925_vm0 = vcmp.eq.s32.totalorder %v924_v12, 1 }
0x149d   : > { %424 = vrot.lane.b32.xlu0 %v423_v59, %s1534_s15  ;;  %v1026_v14 = vpop.permute.xlu1 %1025 }
0x149e   : > { %vm1027_vm1 = vcmp.eq.s32.totalorder %v1026_v14, 1 }
0x14a1   : > { %526 = vrot.lane.b32.xlu0 %v525_v61, %s1534_s15  ;;  %v1128_v18 = vpop.permute.xlu1 %1127 }
0x14a2   : > { %vm1129_vm3 = vcmp.eq.s32.totalorder %v1128_v18, 1 }
0x14a5   : > { %628 = vrot.lane.b32.xlu0 %v627_v62, %s1534_s15  ;;  %v731_v21 = vpop.permute.xlu1 %730 }
0x14a9   : > { %832 = vrot.lane.b32.xlu0 %v831_v4, %s1534_s15  ;;  %v935_v26 = vpop.permute.xlu1 %934 }
0x14ad   : > { %1036 = vrot.lane.b32.xlu0 %v1035_v42, %s1534_s15 }
0x1503   : > { %v1117_v3 = vpop.permute.xlu0 %1116 }
0x1504   : > { %v1119_v1 = vmul.f32 %v1117_v3, %v1114_v63 }
0x1506   : > { %v1121_v34 = vadd.f32 %v1120_v0, %v1119_v1 }
0x1508   : > { %v1137_v2 = vrot.slane %v1121_v34, %v1645_v17 }
0x150a   : > { %1138 = vrot.lane.b32.xlu1 %v1137_v2, %s1534_s15 }
0x1510   : > { %v516_v9 = vpop.permute.xlu0 %515 }
0x1511   : > { %vm517_vm12 = vcmp.eq.s32.totalorder %v516_v9, 1 }
0x1514   : > { %v822_v11 = vpop.permute.xlu0 %821 }
0x1515   : > { %vm823_vm15 = vcmp.eq.s32.totalorder %v822_v11, 1 }
0x1518   : > { %v425_v13 = vpop.permute.xlu0 %424 }
0x1519   : > { %v427_v22 = vsel %vm415_vm11, %v425_v13, %v303_v20 }
0x151c   : > { %v527_v15 = vpop.permute.xlu0 %526 }
0x151d   : > { %v529_v17 = vsel %vm517_vm12, %v527_v15, %v427_v22 }
0x1520   : > { %v629_v19 = vpop.permute.xlu0 %628 }
0x1521   : > { %v631_v24 = vsel %vm619_vm13, %v629_v19, %v529_v17 }
0x1522   : > { %v733_v25 = vsel %vm721_vm14, %v731_v21, %v631_v24 }
0x1524   : > { %v833_v23 = vpop.permute.xlu0 %832 }
0x1525   : > { %v835_v27 = vsel %vm823_vm15, %v833_v23, %v733_v25 }
0x1526   : > { %v937_v30 = vsel %vm925_vm0, %v935_v26, %v835_v27 }
0x1528   : > { %v1037_v29 = vpop.permute.xlu0 %1036 }
0x1529   : > { %v1039_v31 = vsel %vm1027_vm1, %v1037_v29, %v937_v30 }
0x157c   : > { %v1139_v32 = vpop.permute.xlu1 %1138 }
0x157d   : > { %v1141_v33 = vsel %vm1129_vm3, %v1139_v32, %v1039_v31  ;;  %1143 = vst.msk [vmem:[#allocation2] sm:$0x3] %vm1142_vm2, %v1139_v32 }
0x157e   : > { %1144 = vst.msk [vmem:[#allocation3] sm:$0x3] %vm1142_vm2, %v1141_v33 }
0x157f PF: > { %p1298_p7 = scmp.ne.s32.totalorder %s1518_s20, 2 }
0x1581   : > { %1148 = sbr.rel (%p1298_p7) target bundleno = 5689 (0x1639), region = 104 }
0x1586   : > { %v1149_v35 = vld [vmem:[#allocation3] sm:$0x3]  ;;  %vm1151_vm4 = vcmask 254976  }
0x1587   : > { %v1150_v36 = vmul.f32 %v1149_v35, %v1149_v35 }
0x1589   : > { %v1152_v37 = vsel %vm1151_vm4, %v1150_v36, 0.0 }
0x158a   : > { %1153 = vadd.xlane.f32.xlu0 %v1152_v37 }
0x1613   : > { %v1154_v38 = vpop.xlane.xlu0 %1153 }
0x1614   : > { %1468 = vrsqrt.f32 %v1154_v38  ;;  %vm1157_vm5 = vcmp.eq.f32.partialorder %v1154_v38, inf  ;;  %v1160_v16 = vand.u32 2147483648, %v1154_v38  ;;  %vm1159_vm6 = vcmp.eq.f32.partialorder %v1154_v38, 0.0 }
0x1621   : > { %v1469_v39 = vpop.eup %1468 }
0x1622   : > { %v1156_v5 = vmul.f32 %v1469_v39, %v1154_v38 }
0x1624   : > { %v1158_v40 = vsel %vm1157_vm5, %v1154_v38, %v1156_v5 }
0x1625   : > { %v1161_v41 = vsel %vm1159_vm6, %v1160_v16, %v1158_v40 }
0x1626   : > { %v1162_v43 = vadd.f32 1e-08, %v1161_v41 }
0x1628   : > { %1470 = vrcp.f32 %v1162_v43 }
0x1635   : > { %v1471_v6 = vpop.eup %1470 }
0x1636   : > { %v1164_v44 = vmul.f32 %v1471_v6, %v1149_v35 }
0x1638   : > { %1165 = vst.msk [vmem:[#allocation9] sm:$0x3] %vm1151_vm4, %v1164_v44 }
0x1639 PF: > { %p1832_p8 = scmp.eq.s32.totalorder %s1271_s0, 2  ;;  %s1536_s24 = smov [#allocation9]  }
0x163a   : > { %s1175_s28 = sshll.u32 %s1536_s24, 4  ;;  %s1176_s28 = int_to_ptr.vmem [resolvable:$true] %s1175_s28 }
0x163b   : > { %s1472_s29 = scalar_lea.vmem %s1176_s28, 32  ;;  %p1479_p12 = scmp.lt.s32.totalorder %s1176_s28, %s1176_s28 }
0x163c   : > { %p1473_p9 = scmp.ne.s32.totalorder %s1176_s28, %s1472_s29  ;;  %p1480_p13 = scmp.lt.s32.totalorder %s1472_s29, %s1472_s29 }
0x163e   : > { %p1474_p10 = pnand %p1473_p9, %p1832_p8  ;;  %p1481_p0 = por %p1480_p13, %p1479_p12 }
0x1640   : > { %p1475_p11 = pneg %p1474_p10 }
0x1642   : > { %p1482_p1 = pnand %p1481_p0, %p1475_p11 }
0x1644   : > { %1485 = shalt.err (!%p1482_p1)
}
0x1645   : > { %1394 = dma.vmem_to_hbm [thread:$0]  (%p1832_p8), %s1176_s28, 32, %s1861_s5, [#allocation10]  }
0x1646   : > { %1513 = dma.done.wait (%p1832_p8), [#allocation10], 32  }
0x1647   : > { %1515 = vsyncadd (%p1832_p8), [#allocation10], 4294967264 }
0x1648 PF: > { %s17_s22 = sadd.s32 1, %s1526_s22   ;;  %s1863_s20 = smov %s1522_s21 }
0x1649   : > { %p14_p2 = scmp.ge.s32.totalorder %s17_s22, 5   ;;  %s1864_s21 = smov %s1866_s23 }
0x164b   :  { %16 = sbr.rel (!%p14_p2) target bundleno = 4 (0x4), region = 162 }
0x1650   :  { %1188 = vsyncpa [#allocation10], 1 }
0x1651   :  { %1190 = vsyncpa [#allocation10 + $0x1], 1 }
0x1652   :  { %1191 = vsyncmov [#allocation6] }
0x1655   :  { %s1192_s6 = vpop.sfrf %1191 }
0x1656   :  { %p1303_p3 = scmp.ne.s32.totalorder %s1192_s6, 0 }
0x1658   :  { %1196 = shalt.err (%p1303_p3)  }
0x1659   :  { %1198 = vsyncmov [#allocation6 + $0x1] }
0x165c   :  { %s1199_s7 = vpop.sfrf %1198 }
0x165d   :  { %p1304_p4 = scmp.ne.s32.totalorder %s1199_s7, 0 }
0x165f   :  { %1203 = shalt.err (%p1304_p4)  }

// kernel: encoder_text_forward.2
= control target key start
LH: loop header
LB: loop body
LE: loop exit
PB: predicated region body
PF: predicated region fallthrough
CT: control target
= control target key end

     0   :  { %s1958_s23 = smov 0   ;;  %s1960_s24 = smov 0   ;;  %s2241_s0 = inlined_call_operand.<no memory space> [shape: s32[1], index: 0, kind: input, shape index: {}]   ;;  %s2242_s1 = inlined_call_operand.vmem [shape: bf16[24,2,96], index: 1, kind: input, shape index: {}]   ;;  %s2243_s2 = inlined_call_operand.vmem [shape: bf16[32,96], index: 2, kind: input, shape index: {}]   ;;  %s2244_s3 = inlined_call_operand.vmem [shape: f32[1,32], index: 3, kind: input, shape index: {}]   ;;  %s2245_s4 = inlined_call_operand.vmem [shape: bf16[32,96], index: 4, kind: input, shape index: {}]   ;;  %s2246_s5 = inlined_call_operand.vmem [shape: f32[1,96], index: 5, kind: input, shape index: {}]   ;;  %s2247_s6 = inlined_call_operand.vmem [shape: bf16[24,2,96], index: 6, kind: output, shape index: {}]  }
   0x1   :  { %11 = sst [smem:[#allocation9]] %s2241_s0  ;;  %s1962_s25 = smov 0  }
   0x2 LB: > { %s26_s0 = sadd.s32 1, %s1906_s24  ;;  %p1587_p0 = scmp.ge.s32.totalorder %s1910_s25, 1  ;;  %s1910_s25 = sphi %s1962_s25, %s17_s25   ;;  %s1906_s24 = sphi %s1960_s24, %s2249_s24   ;;  %s1902_s23 = sphi %s1958_s23, %s2248_s23  }
   0x3   : > { %p27_p1 = scmp.ge.s32.totalorder %s26_s0, 3  ;;  %p112_p2 = scmp.lt.s32.totalorder %s1910_s25, 4 }
   0x5   : > { %s2251_s0 = smov (%p27_p1, %s26_s0), 0  ;;  %p113_p3 = pnand %p1587_p0, %p112_p2 }
   0x6   : > { %s1976_s26 = sshll.u32 (!%p113_p3), %s1902_s23, 3  ;;  %p1590_p5 = scmp.ne.s32.totalorder (!%p113_p3), %s1902_s23, 0 }
   0x7   : > { %116 = sbr.rel (%p113_p3) target bundleno = 5717 (0x1655), region = 24  ;;  %p137_p4 = scmp.lt.s32.totalorder (!%p113_p3), %s1976_s26, 23 }
   0xc   : > { %s138_s27 = scalar_select %p137_p4, %s1976_s26, 23 }
   0xd   : > { %156 = sbr.rel (%p1590_p5) target bundleno = 36 (0x24), region = 28 }
   0xe   : > { %s1983_s30 = scalar_lea.vmem %s2242_s1, %s138_s27  ;;  %s1988_s9 = scalar_lea.vmem %s2247_s6, %s138_s27 }
  0x12   : > { %v190_v0 = vld [vmem:[%s2243_s2] sm:$0xff]  ;;  %v192_v1 = vld [vmem:[%s2243_s2 + $0x8] sm:$0xff] }
  0x13   : > { %191 = vst [vmem:[#allocation3] sm:$0xff] %v190_v0  ;;  %193 = vst [vmem:[#allocation3 + $0x8] sm:$0xff] %v192_v1 }
  0x14   : > { %201 = vsyncadd [#allocation7], 256  ;;  %v221_v2 = vld [vmem:[%s2244_s3] sm:$0x1] }
  0x15   : > { %222 = vst [vmem:[#allocation4] sm:$0x1] %v221_v2 }
  0x16   : > { %248 = vsyncadd [#allocation7 + $0x1], 16  ;;  %v283_v3 = vld [vmem:[%s2245_s4] sm:$0xff]  ;;  %v285_v4 = vld [vmem:[%s2245_s4 + $0x8] sm:$0xff] }
  0x17   : > { %284 = vst [vmem:[#allocation5] sm:$0xff] %v283_v3  ;;  %286 = vst [vmem:[#allocation5 + $0x8] sm:$0xff] %v285_v4 }
  0x18   : > { %294 = vsyncadd [#allocation7 + $0x2], 256  ;;  %v314_v5 = vld [vmem:[%s2246_s5] sm:$0x1] }
  0x19   : > { %315 = vst [vmem:[#allocation6] sm:$0x1] %v314_v5 }
  0x1a   : > { %341 = vsyncadd [#allocation7 + $0x3], 16 }
  0x1b   : > { %1892 = dma.done.wait [#allocation7], 256 }
  0x1c   : > { %1893 = vsyncadd [#allocation7], 4294967040 }
  0x1d   : > { %1894 = dma.done.wait [#allocation7 + $0x1], 16 }
  0x1e   : > { %1895 = vsyncadd [#allocation7 + $0x1], 4294967280 }
  0x1f   : > { %1896 = dma.done.wait [#allocation7 + $0x2], 256 }
  0x20   : > { %1897 = vsyncadd [#allocation7 + $0x2], 4294967040 }
  0x21   : > { %1898 = dma.done.wait [#allocation7 + $0x3], 16 }
  0x22   : > { %1899 = vsyncadd [#allocation7 + $0x3], 4294967280  ;;  %vm353_vm0 = vcmask 254976   ;;  %v1912_v6 = vmov 0.0  }
  0x23   : > { %354 = vst.msk [vmem:[#allocation2] sm:$0x3] %vm353_vm0, %v1912_v6 }
  0x24 PF: > { %s2008_s22 = sld [smem:[#allocation9]] }
  0x2a   : > { %p1592_p6 = scmp.gt.s32.totalorder %s1976_s26, %s2008_s22 }
  0x2b   : > { %s1915_s23 = smov (!%p1592_p6), 64   ;;  %s1917_s27 = smov (!%p1592_p6), 32  }
  0x2c   : > { %360 = sbr.rel (%p1592_p6) target bundleno = 5705 (0x1649), region = 160  ;;  %s1918_s28 = smov (!%p1592_p6), 96  }
  0x31   : > { %v2012_v7 = vld [vmem:[#allocation3 + $0x8] sm:$0xff]   ;;  %v1913_v8 = vmov 0.0   ;;  %v2017_v9 = vld [vmem:[#allocation3] sm:$0xff]   ;;  %vm1914_vm1 = vmmov 0   ;;  %v382_v10 = vld [vmem:[#allocation2] sm:$0x3]  ;;  %v455_v15 = vlaneseq }
  0x32   : > { %1684 = vmatprep.subr.bf16.mxu0 %v1913_v8  ;;  %1692 = vmatprep.subr.bf16.mxu1 %v1913_v8  ;;  %v1593_v11 = vld [vmem:[#allocation4] ss:$0 sm:$0xff]  ;;  %v384_v12 = vpack.c.bf16 %v382_v10, %v382_v10  ;;  %vm397_vm2 = vcmask 261120   ;;  %v1916_v13 = vmov 1983009808   ;;  %v2044_v38 = vld [vmem:[#allocation5 + $0x8] sm:$0xff]  }
  0x33   : > { %1685 = vmatpush3.bf16.msra.mxu0 %v2012_v7  ;;  %1688 = vmatprep.mubr.msk.bf16.mxu0 %vm1914_vm1, %v1913_v8  ;;  %v453_v14 = vunpack.c.l.s4 %v1916_v13  ;;  %v456_v17 = vshrl.u32 %v455_v15, 7  ;;  %v383_v27 = vld [vmem:[%s1983_s30] sm:$0x1]  ;;  %v2047_v39 = vld [vmem:[#allocation5] sm:$0xff]   ;;  %v2068_v49 = vld [vmem:[#allocation6] ss:$0 sm:$0xff] }
  0x34   : > { %1686 = vmatprep.subr.bf16.mxu0 %v1913_v8  ;;  %447 = vrot.lane.b32.xlu0 %v1593_v11, %s1915_s23  ;;  %v441_v28 = vunpack.c.l.bf16 %v383_v27  ;;  %vm548_vm3 = vcmask 778240   ;;  %v1601_v62 = vld [vmem:[%s1983_s30 + $0x1] sm:$0x1]  ;;  %vm1436_vm4 = vcmask 254976  }
  0x35   : > { %1696 = vmatprep.mubr.msk.bf16.mxu1 %vm1914_vm1, %v1913_v8  ;;  %v454_v16 = vunpack.c.0.s8 %v453_v14  ;;  %1693 = vmatpush3.bf16.msra.mxu1 %v2044_v38  ;;  %v592_v63 = vunpack.c.l.bf16 %v1601_v62 }
  0x36   : > { %1694 = vmatprep.subr.bf16.mxu1 %v1913_v8 }
  0x37   : > { %1687 = vmatpush3.bf16.msra.mxu0 %v2017_v9  ;;  %v2036_v19 = vsub.s32 %v454_v16, %v456_v17 }
  0x38   : > { %1700 = vmatprep.subr.bf16.mxu0 %v1913_v8 }
  0x39   : > { %v482_v25 = vrot.slane %v382_v10, %v2036_v19  ;;  %1695 = vmatpush3.bf16.msra.mxu1 %v2047_v39 }
  0x3a   : > { %1689 = vmatmul.mubr.msk.bf16.vlgmr.msra.gmra.mxu0 %vm397_vm2, %v384_v12  ;;  %1708 = vmatprep.subr.bf16.mxu1 %v1913_v8 }
  0x3b   : > { %1701 = vmatpush3.bf16.msra.mxu0 %v2012_v7  ;;  %1704 = vmatprep.mubr.msk.bf16.mxu0 %vm1914_vm1, %v1913_v8 }
  0x3c   : > { %1702 = vmatprep.subr.bf16.mxu0 %v1913_v8 }
  0x3f   : > { %1703 = vmatpush3.bf16.msra.mxu0 %v2017_v9 }
  0x40   : > { %1716 = vmatprep.subr.bf16.mxu0 %v1913_v8 }
  0xa6   : > { %v2034_v18 = vpop.permute.xlu0 %447 }
  0xfa   : > { %v435_v20 = vpop.f32.mrf.mxu0 }
  0xfb   : > { %v450_v21 = vadd.f32 %v2034_v18, %v435_v20  ;;  %v442_v29 = vadd.f32 %v441_v28, %v435_v20 }
  0xfc   : > { %v1690_v22 = vpop.f32.mrf.mxu0 }
  0xfd   : > { %v458_v23 = vrot.slane %v450_v21, %v2036_v19  ;;  %v443_v30 = vmul.f32 0.5, %v442_v29 }
  0xfe   : > { %v438_v24 = vpop.f32.mrf.mxu0 }
  0xff   : > { %459 = vrot.lane.b32.xlu0 %v458_v23, %s1915_s23  ;;  %1848 = vtanh.f32 %v443_v30 }
 0x100   : > { %v1691_v26 = vpop.f32.mrf.mxu0 }
 0x103   : > { %483 = vrot.lane.b32.xlu0 %v482_v25, %s1917_s27 }
 0x10c   : > { %v1849_v31 = vpop.eup %1848 }
 0x10d   : > { %v445_v32 = vmul.f32 0.5, %v1849_v31 }
 0x10f   : > { %v446_v33 = vadd.f32 0.5, %v445_v32 }
 0x111   : > { %v469_v42 = vsub.f32 1.0, %v446_v33 }
 0x171   : > { %v460_v34 = vpop.permute.xlu0 %459 }
 0x172   : > { %v462_v35 = vmul.f32 %v460_v34, %v446_v33  ;;  %v1605_v34 = vld [vmem:[%s1983_s30 + $0x2] sm:$0x1] }
 0x174   : > { %464 = vrot.lane.b32.xlu1 %v462_v35, %s1915_s23  ;;  %v717_v35 = vunpack.c.l.bf16 %v1605_v34 }
 0x175   : > { %v484_v41 = vpop.permute.xlu0 %483 }
 0x176   : > { %v486_v44 = vmul.f32 %v484_v41, %v446_v33 }
 0x1e6   : > { %v465_v36 = vpop.permute.xlu1 %464 }
 0x1e7   : > { %v467_v37 = vadd.f32 %v465_v36, %v441_v28 }
 0x1e9   : > { %1850 = vtanh.f32 %v467_v37 }
 0x1f6   : > { %v1851_v40 = vpop.eup %1850 }
 0x1f7   : > { %471 = vrot.lane.b32.xlu1 %v1851_v40, %s1918_s28 }
 0x269   : > { %v472_v43 = vpop.permute.xlu1 %471 }
 0x26a   : > { %v474_v45 = vmul.f32 %v472_v43, %v469_v42 }
 0x26c   : > { %v487_v46 = vadd.f32 %v486_v44, %v474_v45 }
 0x26e   : > { %v488_v47 = vpack.c.bf16 %v487_v46, %v487_v46 }
 0x270   : > { %490 = vrot.lane.b32.xlu1 %v488_v47, %s1918_s28 }
 0x2e2   : > { %v491_v48 = vpop.permute.xlu1 %490 }
 0x2e3   : > { %1697 = vmatmul.mubr.msk.bf16.vlgmr.msra.gmra.mxu1 %vm397_vm2, %v491_v48  ;;  %1705 = vmatmul.mubr.msk.bf16.vlgmr.msra.gmra.mxu0 %vm397_vm2, %v491_v48 }
 0x2e4   : > { %1717 = vmatpush3.bf16.msra.mxu0 %v2012_v7  ;;  %1709 = vmatpush3.bf16.msra.mxu1 %v2044_v38 }
 0x2e5   : > { %1718 = vmatprep.subr.bf16.mxu0 %v1913_v8  ;;  %1710 = vmatprep.subr.bf16.mxu1 %v1913_v8 }
 0x2e6   : > { %1712 = vmatprep.mubr.msk.bf16.mxu1 %vm1914_vm1, %v1913_v8  ;;  %1720 = vmatprep.mubr.msk.bf16.mxu0 %vm1914_vm1, %v1913_v8 }
 0x2e8   : > { %1719 = vmatpush3.bf16.msra.mxu0 %v2017_v9  ;;  %1711 = vmatpush3.bf16.msra.mxu1 %v2047_v39 }
 0x2e9   : > { %1732 = vmatprep.subr.bf16.mxu0 %v1913_v8  ;;  %1724 = vmatprep.subr.bf16.mxu1 %v1913_v8 }
 0x3a3   : > { %v541_v50 = vpop.f32.mrf.mxu1  ;;  %v586_v51 = vpop.f32.mrf.mxu0 }
 0x3a4   : > { %v542_v52 = vadd.f32 %v2068_v49, %v541_v50  ;;  %v598_v53 = vadd.f32 %v586_v51, %v2034_v18  ;;  %v593_v0 = vadd.f32 %v592_v63, %v586_v51 }
 0x3a5   : > { %v1698_v54 = vpop.f32.mrf.mxu1  ;;  %v1706_v55 = vpop.f32.mrf.mxu0 }
 0x3a6   : > { %v547_v56 = vpack.c.bf16 %v542_v52, %v542_v52  ;;  %v606_v57 = vrot.slane %v598_v53, %v2036_v19  ;;  %v594_v1 = vmul.f32 0.5, %v593_v0 }
 0x3a7   : > { %v544_v58 = vpop.f32.mrf.mxu1  ;;  %v589_v59 = vpop.f32.mrf.mxu0 }
 0x3a8   : > { %549 = vst.msk [vmem:[%s1988_s9] sm:$0x1] %vm548_vm3, %v547_v56  ;;  %607 = vrot.lane.b32.xlu0 %v606_v57, %s1915_s23  ;;  %1852 = vtanh.f32 %v594_v1 }
 0x3a9   : > { %v1699_v60 = vpop.f32.mrf.mxu1  ;;  %v1707_v61 = vpop.f32.mrf.mxu0 }
 0x3b5   : > { %v1853_v2 = vpop.eup %1852 }
 0x3b6   : > { %v596_v3 = vmul.f32 0.5, %v1853_v2 }
 0x3b8   : > { %v597_v4 = vadd.f32 0.5, %v596_v3 }
 0x3ba   : > { %v617_v13 = vsub.f32 1.0, %v597_v4  ;;  %v623_v15 = vmul.f32 %v597_v4, %v487_v46 }
 0x41a   : > { %v608_v5 = vpop.permute.xlu0 %607 }
 0x41b   : > { %v610_v6 = vmul.f32 %v608_v5, %v597_v4  ;;  %v1609_v4 = vld [vmem:[%s1983_s30 + $0x3] sm:$0x1] }
 0x41c   : > { %v842_v5 = vunpack.c.l.bf16 %v1609_v4 }
 0x41d   : > { %612 = vrot.lane.b32.xlu1 %v610_v6, %s1915_s23 }
 0x48f   : > { %v613_v10 = vpop.permute.xlu1 %612 }
 0x490   : > { %v615_v11 = vadd.f32 %v613_v10, %v592_v63 }
 0x492   : > { %1854 = vtanh.f32 %v615_v11 }
 0x49f   : > { %v1855_v12 = vpop.eup %1854 }
 0x4a0   : > { %619 = vrot.lane.b32.xlu0 %v1855_v12, %s1918_s28 }
 0x512   : > { %v620_v14 = vpop.permute.xlu0 %619 }
 0x513   : > { %v622_v16 = vmul.f32 %v620_v14, %v617_v13 }
 0x515   : > { %v624_v17 = vadd.f32 %v623_v15, %v622_v16 }
 0x517   : > { %v625_v20 = vpack.c.bf16 %v624_v17, %v624_v17 }
 0x519   : > { %627 = vrot.lane.b32.xlu1 %v625_v20, %s1918_s28 }
 0x58b   : > { %v628_v21 = vpop.permute.xlu1 %627 }
 0x58c   : > { %1713 = vmatmul.mubr.msk.bf16.vlgmr.msra.gmra.mxu1 %vm397_vm2, %v628_v21  ;;  %1721 = vmatmul.mubr.msk.bf16.vlgmr.msra.gmra.mxu0 %vm397_vm2, %v628_v21 }
 0x58d   : > { %1733 = vmatpush3.bf16.msra.mxu0 %v2012_v7  ;;  %1725 = vmatpush3.bf16.msra.mxu1 %v2044_v38 }
 0x58e   : > { %1734 = vmatprep.subr.bf16.mxu0 %v1913_v8  ;;  %1726 = vmatprep.subr.bf16.mxu1 %v1913_v8 }
 0x58f   : > { %1728 = vmatprep.mubr.msk.bf16.mxu1 %vm1914_vm1, %v1913_v8  ;;  %1736 = vmatprep.mubr.msk.bf16.mxu0 %vm1914_vm1, %v1913_v8 }
 0x591   : > { %1735 = vmatpush3.bf16.msra.mxu0 %v2017_v9  ;;  %1727 = vmatpush3.bf16.msra.mxu1 %v2047_v39 }
 0x592   : > { %1748 = vmatprep.subr.bf16.mxu0 %v1913_v8  ;;  %1740 = vmatprep.subr.bf16.mxu1 %v1913_v8 }
 0x64c   : > { %v666_v22 = vpop.f32.mrf.mxu1  ;;  %v711_v23 = vpop.f32.mrf.mxu0 }
 0x64d   : > { %v667_v24 = vadd.f32 %v2068_v49, %v666_v22  ;;  %v723_v25 = vadd.f32 %v711_v23, %v2034_v18  ;;  %v718_v36 = vadd.f32 %v717_v35, %v711_v23 }
 0x64e   : > { %v1714_v26 = vpop.f32.mrf.mxu1  ;;  %v1722_v27 = vpop.f32.mrf.mxu0 }
 0x64f   : > { %v672_v28 = vpack.c.bf16 %v667_v24, %v667_v24  ;;  %v731_v29 = vrot.slane %v723_v25, %v2036_v19  ;;  %v719_v37 = vmul.f32 0.5, %v718_v36 }
 0x650   : > { %v669_v30 = vpop.f32.mrf.mxu1  ;;  %v714_v31 = vpop.f32.mrf.mxu0 }
 0x651   : > { %1604 = vst.msk [vmem:[%s1988_s9 + $0x1] sm:$0x1] %vm548_vm3, %v672_v28  ;;  %732 = vrot.lane.b32.xlu0 %v731_v29, %s1915_s23  ;;  %1856 = vtanh.f32 %v719_v37 }
 0x652   : > { %v1715_v32 = vpop.f32.mrf.mxu1  ;;  %v1723_v33 = vpop.f32.mrf.mxu0 }
 0x65e   : > { %v1857_v40 = vpop.eup %1856 }
 0x65f   : > { %v721_v41 = vmul.f32 0.5, %v1857_v40 }
 0x661   : > { %v722_v42 = vadd.f32 0.5, %v721_v41 }
 0x663   : > { %v742_v48 = vsub.f32 1.0, %v722_v42  ;;  %v748_v51 = vmul.f32 %v722_v42, %v624_v17 }
 0x6c3   : > { %v733_v43 = vpop.permute.xlu0 %732 }
 0x6c4   : > { %v735_v44 = vmul.f32 %v733_v43, %v722_v42  ;;  %v1613_v42 = vld [vmem:[%s1983_s30 + $0x4] sm:$0x1] }
 0x6c5   : > { %v967_v43 = vunpack.c.l.bf16 %v1613_v42 }
 0x6c6   : > { %737 = vrot.lane.b32.xlu1 %v735_v44, %s1915_s23 }
 0x738   : > { %v738_v45 = vpop.permute.xlu1 %737 }
 0x739   : > { %v740_v46 = vadd.f32 %v738_v45, %v717_v35 }
 0x73b   : > { %1858 = vtanh.f32 %v740_v46 }
 0x748   : > { %v1859_v47 = vpop.eup %1858 }
 0x749   : > { %744 = vrot.lane.b32.xlu0 %v1859_v47, %s1918_s28 }
 0x7bb   : > { %v745_v50 = vpop.permute.xlu0 %744 }
 0x7bc   : > { %v747_v52 = vmul.f32 %v745_v50, %v742_v48 }
 0x7be   : > { %v749_v53 = vadd.f32 %v748_v51, %v747_v52 }
 0x7c0   : > { %v750_v54 = vpack.c.bf16 %v749_v53, %v749_v53 }
 0x7c2   : > { %752 = vrot.lane.b32.xlu1 %v750_v54, %s1918_s28 }
 0x834   : > { %v753_v55 = vpop.permute.xlu1 %752 }
 0x835   : > { %1729 = vmatmul.mubr.msk.bf16.vlgmr.msra.gmra.mxu1 %vm397_vm2, %v753_v55  ;;  %1737 = vmatmul.mubr.msk.bf16.vlgmr.msra.gmra.mxu0 %vm397_vm2, %v753_v55 }
 0x836   : > { %1749 = vmatpush3.bf16.msra.mxu0 %v2012_v7  ;;  %1741 = vmatpush3.bf16.msra.mxu1 %v2044_v38 }
 0x837   : > { %1750 = vmatprep.subr.bf16.mxu0 %v1913_v8  ;;  %1742 = vmatprep.subr.bf16.mxu1 %v1913_v8 }
 0x838   : > { %1744 = vmatprep.mubr.msk.bf16.mxu1 %vm1914_vm1, %v1913_v8  ;;  %1752 = vmatprep.mubr.msk.bf16.mxu0 %vm1914_vm1, %v1913_v8 }
 0x83a   : > { %1751 = vmatpush3.bf16.msra.mxu0 %v2017_v9  ;;  %1743 = vmatpush3.bf16.msra.mxu1 %v2047_v39 }
 0x83b   : > { %1764 = vmatprep.subr.bf16.mxu0 %v1913_v8  ;;  %1756 = vmatprep.subr.bf16.mxu1 %v1913_v8 }
 0x8f5   : > { %v791_v56 = vpop.f32.mrf.mxu1  ;;  %v836_v57 = vpop.f32.mrf.mxu0 }
 0x8f6   : > { %v792_v58 = vadd.f32 %v2068_v49, %v791_v56  ;;  %v848_v59 = vadd.f32 %v836_v57, %v2034_v18  ;;  %v843_v6 = vadd.f32 %v842_v5, %v836_v57 }
 0x8f7   : > { %v1730_v60 = vpop.f32.mrf.mxu1  ;;  %v1738_v61 = vpop.f32.mrf.mxu0 }
 0x8f8   : > { %v797_v62 = vpack.c.bf16 %v792_v58, %v792_v58  ;;  %v856_v63 = vrot.slane %v848_v59, %v2036_v19  ;;  %v844_v10 = vmul.f32 0.5, %v843_v6 }
 0x8f9   : > { %v794_v0 = vpop.f32.mrf.mxu1  ;;  %v839_v1 = vpop.f32.mrf.mxu0 }
 0x8fa   : > { %1608 = vst.msk [vmem:[%s1988_s9 + $0x2] sm:$0x1] %vm548_vm3, %v797_v62  ;;  %857 = vrot.lane.b32.xlu0 %v856_v63, %s1915_s23  ;;  %1860 = vtanh.f32 %v844_v10 }
 0x8fb   : > { %v1731_v2 = vpop.f32.mrf.mxu1  ;;  %v1739_v3 = vpop.f32.mrf.mxu0 }
 0x907   : > { %v1861_v11 = vpop.eup %1860 }
 0x908   : > { %v846_v12 = vmul.f32 0.5, %v1861_v11 }
 0x90a   : > { %v847_v13 = vadd.f32 0.5, %v846_v12 }
 0x90c   : > { %v867_v21 = vsub.f32 1.0, %v847_v13  ;;  %v873_v23 = vmul.f32 %v847_v13, %v749_v53 }
 0x96c   : > { %v858_v14 = vpop.permute.xlu0 %857 }
 0x96d   : > { %v860_v15 = vmul.f32 %v858_v14, %v847_v13  ;;  %v1617_v13 = vld [vmem:[%s1983_s30 + $0x5] sm:$0x1] }
 0x96e   : > { %v1092_v14 = vunpack.c.l.bf16 %v1617_v13 }
 0x96f   : > { %862 = vrot.lane.b32.xlu1 %v860_v15, %s1915_s23 }
 0x9e1   : > { %v863_v16 = vpop.permute.xlu1 %862 }
 0x9e2   : > { %v865_v17 = vadd.f32 %v863_v16, %v842_v5 }
 0x9e4   : > { %1862 = vtanh.f32 %v865_v17 }
 0x9f1   : > { %v1863_v20 = vpop.eup %1862 }
 0x9f2   : > { %869 = vrot.lane.b32.xlu0 %v1863_v20, %s1918_s28 }
 0xa64   : > { %v870_v22 = vpop.permute.xlu0 %869 }
 0xa65   : > { %v872_v24 = vmul.f32 %v870_v22, %v867_v21 }
 0xa67   : > { %v874_v25 = vadd.f32 %v873_v23, %v872_v24 }
 0xa69   : > { %v875_v26 = vpack.c.bf16 %v874_v25, %v874_v25 }
 0xa6b   : > { %877 = vrot.lane.b32.xlu1 %v875_v26, %s1918_s28 }
 0xadd   : > { %v878_v27 = vpop.permute.xlu1 %877 }
 0xade   : > { %1745 = vmatmul.mubr.msk.bf16.vlgmr.msra.gmra.mxu1 %vm397_vm2, %v878_v27  ;;  %1753 = vmatmul.mubr.msk.bf16.vlgmr.msra.gmra.mxu0 %vm397_vm2, %v878_v27 }
 0xadf   : > { %1765 = vmatpush3.bf16.msra.mxu0 %v2012_v7  ;;  %1757 = vmatpush3.bf16.msra.mxu1 %v2044_v38 }
 0xae0   : > { %1766 = vmatprep.subr.bf16.mxu0 %v1913_v8  ;;  %1758 = vmatprep.subr.bf16.mxu1 %v1913_v8 }
 0xae1   : > { %1760 = vmatprep.mubr.msk.bf16.mxu1 %vm1914_vm1, %v1913_v8  ;;  %1768 = vmatprep.mubr.msk.bf16.mxu0 %vm1914_vm1, %v1913_v8 }
 0xae3   : > { %1767 = vmatpush3.bf16.msra.mxu0 %v2017_v9  ;;  %1759 = vmatpush3.bf16.msra.mxu1 %v2047_v39 }
 0xae4   : > { %1780 = vmatprep.subr.bf16.mxu0 %v1913_v8  ;;  %1772 = vmatprep.subr.bf16.mxu1 %v1913_v8 }
 0xb9e   : > { %v916_v28 = vpop.f32.mrf.mxu1  ;;  %v961_v29 = vpop.f32.mrf.mxu0 }
 0xb9f   : > { %v917_v30 = vadd.f32 %v2068_v49, %v916_v28  ;;  %v973_v31 = vadd.f32 %v961_v29, %v2034_v18  ;;  %v968_v44 = vadd.f32 %v967_v43, %v961_v29 }
 0xba0   : > { %v1746_v32 = vpop.f32.mrf.mxu1  ;;  %v1754_v33 = vpop.f32.mrf.mxu0 }
 0xba1   : > { %v922_v34 = vpack.c.bf16 %v917_v30, %v917_v30  ;;  %v981_v35 = vrot.slane %v973_v31, %v2036_v19  ;;  %v969_v45 = vmul.f32 0.5, %v968_v44 }
 0xba2   : > { %v919_v36 = vpop.f32.mrf.mxu1  ;;  %v964_v37 = vpop.f32.mrf.mxu0 }
 0xba3   : > { %1612 = vst.msk [vmem:[%s1988_s9 + $0x3] sm:$0x1] %vm548_vm3, %v922_v34  ;;  %982 = vrot.lane.b32.xlu0 %v981_v35, %s1915_s23  ;;  %1864 = vtanh.f32 %v969_v45 }
 0xba4   : > { %v1747_v40 = vpop.f32.mrf.mxu1  ;;  %v1755_v41 = vpop.f32.mrf.mxu0 }
 0xbb0   : > { %v1865_v46 = vpop.eup %1864 }
 0xbb1   : > { %v971_v47 = vmul.f32 0.5, %v1865_v46  ;;  %v1621_v46 = vld [vmem:[%s1983_s30 + $0x6] sm:$0x1] }
 0xbb3   : > { %v972_v48 = vadd.f32 0.5, %v971_v47  ;;  %v1217_v47 = vunpack.c.l.bf16 %v1621_v46 }
 0xbb5   : > { %v992_v55 = vsub.f32 1.0, %v972_v48  ;;  %v998_v57 = vmul.f32 %v972_v48, %v874_v25 }
 0xc15   : > { %v983_v50 = vpop.permute.xlu0 %982 }
 0xc16   : > { %v985_v51 = vmul.f32 %v983_v50, %v972_v48 }
 0xc18   : > { %987 = vrot.lane.b32.xlu1 %v985_v51, %s1915_s23 }
 0xc8a   : > { %v988_v52 = vpop.permute.xlu1 %987 }
 0xc8b   : > { %v990_v53 = vadd.f32 %v988_v52, %v967_v43 }
 0xc8d   : > { %1866 = vtanh.f32 %v990_v53 }
 0xc9a   : > { %v1867_v54 = vpop.eup %1866 }
 0xc9b   : > { %994 = vrot.lane.b32.xlu0 %v1867_v54, %s1918_s28 }
 0xd0d   : > { %v995_v56 = vpop.permute.xlu0 %994 }
 0xd0e   : > { %v997_v58 = vmul.f32 %v995_v56, %v992_v55 }
 0xd10   : > { %v999_v59 = vadd.f32 %v998_v57, %v997_v58 }
 0xd12   : > { %v1000_v60 = vpack.c.bf16 %v999_v59, %v999_v59 }
 0xd14   : > { %1002 = vrot.lane.b32.xlu1 %v1000_v60, %s1918_s28 }
 0xd86   : > { %v1003_v61 = vpop.permute.xlu1 %1002 }
 0xd87   : > { %1761 = vmatmul.mubr.msk.bf16.vlgmr.msra.gmra.mxu1 %vm397_vm2, %v1003_v61  ;;  %1769 = vmatmul.mubr.msk.bf16.vlgmr.msra.gmra.mxu0 %vm397_vm2, %v1003_v61 }
 0xd88   : > { %1781 = vmatpush3.bf16.msra.mxu0 %v2012_v7  ;;  %1773 = vmatpush3.bf16.msra.mxu1 %v2044_v38 }
 0xd89   : > { %1782 = vmatprep.subr.bf16.mxu0 %v1913_v8  ;;  %1774 = vmatprep.subr.bf16.mxu1 %v1913_v8 }
 0xd8a   : > { %1776 = vmatprep.mubr.msk.bf16.mxu1 %vm1914_vm1, %v1913_v8  ;;  %1784 = vmatprep.mubr.msk.bf16.mxu0 %vm1914_vm1, %v1913_v8 }
 0xd8c   : > { %1783 = vmatpush3.bf16.msra.mxu0 %v2017_v9  ;;  %1775 = vmatpush3.bf16.msra.mxu1 %v2047_v39 }
 0xd8d   : > { %1796 = vmatprep.subr.bf16.mxu0 %v1913_v8  ;;  %1788 = vmatprep.subr.bf16.mxu1 %v1913_v8 }
 0xe47   : > { %v1041_v62 = vpop.f32.mrf.mxu1  ;;  %v1086_v63 = vpop.f32.mrf.mxu0 }
 0xe48   : > { %v1042_v0 = vadd.f32 %v2068_v49, %v1041_v62  ;;  %v1098_v1 = vadd.f32 %v1086_v63, %v2034_v18  ;;  %v1093_v15 = vadd.f32 %v1092_v14, %v1086_v63 }
 0xe49   : > { %v1762_v2 = vpop.f32.mrf.mxu1  ;;  %v1770_v3 = vpop.f32.mrf.mxu0 }
 0xe4a   : > { %v1047_v4 = vpack.c.bf16 %v1042_v0, %v1042_v0  ;;  %v1106_v5 = vrot.slane %v1098_v1, %v2036_v19  ;;  %v1094_v16 = vmul.f32 0.5, %v1093_v15 }
 0xe4b   : > { %v1044_v6 = vpop.f32.mrf.mxu1  ;;  %v1089_v10 = vpop.f32.mrf.mxu0 }
 0xe4c   : > { %1616 = vst.msk [vmem:[%s1988_s9 + $0x4] sm:$0x1] %vm548_vm3, %v1047_v4  ;;  %1107 = vrot.lane.b32.xlu0 %v1106_v5, %s1915_s23  ;;  %1868 = vtanh.f32 %v1094_v16 }
 0xe4d   : > { %v1763_v11 = vpop.f32.mrf.mxu1  ;;  %v1771_v12 = vpop.f32.mrf.mxu0 }
 0xe59   : > { %v1869_v17 = vpop.eup %1868 }
 0xe5a   : > { %v1096_v20 = vmul.f32 0.5, %v1869_v17 }
 0xe5c   : > { %v1097_v21 = vadd.f32 0.5, %v1096_v20 }
 0xe5e   : > { %v1117_v27 = vsub.f32 1.0, %v1097_v21  ;;  %v1123_v29 = vmul.f32 %v1097_v21, %v999_v59 }
 0xebe   : > { %v1108_v22 = vpop.permute.xlu0 %1107 }
 0xebf   : > { %v1110_v23 = vmul.f32 %v1108_v22, %v1097_v21 }
 0xec1   : > { %1112 = vrot.lane.b32.xlu1 %v1110_v23, %s1915_s23 }
 0xf33   : > { %v1113_v24 = vpop.permute.xlu1 %1112 }
 0xf34   : > { %v1115_v25 = vadd.f32 %v1113_v24, %v1092_v14 }
 0xf36   : > { %1870 = vtanh.f32 %v1115_v25 }
 0xf43   : > { %v1871_v26 = vpop.eup %1870 }
 0xf44   : > { %1119 = vrot.lane.b32.xlu0 %v1871_v26, %s1918_s28 }
 0xfb6   : > { %v1120_v28 = vpop.permute.xlu0 %1119 }
 0xfb7   : > { %v1122_v30 = vmul.f32 %v1120_v28, %v1117_v27 }
 0xfb9   : > { %v1124_v31 = vadd.f32 %v1123_v29, %v1122_v30 }
 0xfbb   : > { %v1125_v32 = vpack.c.bf16 %v1124_v31, %v1124_v31 }
 0xfbd   : > { %1127 = vrot.lane.b32.xlu1 %v1125_v32, %s1918_s28 }
0x102f   : > { %v1128_v33 = vpop.permute.xlu1 %1127 }
0x1030   : > { %1777 = vmatmul.mubr.msk.bf16.vlgmr.msra.gmra.mxu1 %vm397_vm2, %v1128_v33  ;;  %1785 = vmatmul.mubr.msk.bf16.vlgmr.msra.gmra.mxu0 %vm397_vm2, %v1128_v33 }
0x1031   : > { %1797 = vmatpush3.bf16.msra.mxu0 %v2012_v7  ;;  %1789 = vmatpush3.bf16.msra.mxu1 %v2044_v38 }
0x1032   : > { %1798 = vmatprep.subr.bf16.mxu0 %v1913_v8  ;;  %1790 = vmatprep.subr.bf16.mxu1 %v1913_v8 }
0x1033   : > { %1792 = vmatprep.mubr.msk.bf16.mxu1 %vm1914_vm1, %v1913_v8  ;;  %1800 = vmatprep.mubr.msk.bf16.mxu0 %vm1914_vm1, %v1913_v8 }
0x1035   : > { %1799 = vmatpush3.bf16.msra.mxu0 %v2017_v9  ;;  %1791 = vmatpush3.bf16.msra.mxu1 %v2047_v39 }
0x1036   : > { %1804 = vmatprep.subr.bf16.mxu1 %v1913_v8 }
0x10f0   : > { %v1166_v7 = vpop.f32.mrf.mxu1  ;;  %v1211_v34 = vpop.f32.mrf.mxu0 }
0x10f1   : > { %v1167_v35 = vadd.f32 %v2068_v49, %v1166_v7  ;;  %v1223_v36 = vadd.f32 %v1211_v34, %v2034_v18  ;;  %v1218_v48 = vadd.f32 %v1217_v47, %v1211_v34 }
0x10f2   : > { %v1778_v37 = vpop.f32.mrf.mxu1  ;;  %v1786_v40 = vpop.f32.mrf.mxu0 }
0x10f3   : > { %v1172_v41 = vpack.c.bf16 %v1167_v35, %v1167_v35  ;;  %v1231_v42 = vrot.slane %v1223_v36, %v2036_v19  ;;  %v1219_v50 = vmul.f32 0.5, %v1218_v48 }
0x10f4   : > { %v1169_v43 = vpop.f32.mrf.mxu1  ;;  %v1214_v44 = vpop.f32.mrf.mxu0 }
0x10f5   : > { %1620 = vst.msk [vmem:[%s1988_s9 + $0x5] sm:$0x1] %vm548_vm3, %v1172_v41  ;;  %1232 = vrot.lane.b32.xlu0 %v1231_v42, %s1915_s23  ;;  %1872 = vtanh.f32 %v1219_v50 }
0x10f6   : > { %v1779_v9 = vpop.f32.mrf.mxu1  ;;  %v1787_v45 = vpop.f32.mrf.mxu0 }
0x1102   : > { %v1873_v51 = vpop.eup %1872 }
0x1103   : > { %v1221_v52 = vmul.f32 0.5, %v1873_v51 }
0x1105   : > { %v1222_v53 = vadd.f32 0.5, %v1221_v52 }
0x1107   : > { %v1242_v59 = vsub.f32 1.0, %v1222_v53  ;;  %v1248_v61 = vmul.f32 %v1222_v53, %v1124_v31 }
0x1167   : > { %v1233_v54 = vpop.permute.xlu0 %1232 }
0x1168   : > { %v1235_v55 = vmul.f32 %v1233_v54, %v1222_v53 }
0x116a   : > { %1237 = vrot.lane.b32.xlu1 %v1235_v55, %s1915_s23 }
0x11dc   : > { %v1238_v56 = vpop.permute.xlu1 %1237 }
0x11dd   : > { %v1240_v57 = vadd.f32 %v1238_v56, %v1217_v47 }
0x11df   : > { %1874 = vtanh.f32 %v1240_v57 }
0x11ec   : > { %v1875_v58 = vpop.eup %1874 }
0x11ed   : > { %1244 = vrot.lane.b32.xlu0 %v1875_v58, %s1918_s28 }
0x125f   : > { %v1245_v60 = vpop.permute.xlu0 %1244 }
0x1260   : > { %v1247_v62 = vmul.f32 %v1245_v60, %v1242_v59 }
0x1262   : > { %v1249_v63 = vadd.f32 %v1248_v61, %v1247_v62 }
0x1264   : > { %v1250_v0 = vpack.c.bf16 %v1249_v63, %v1249_v63 }
0x1266   : > { %1252 = vrot.lane.b32.xlu1 %v1250_v0, %s1918_s28 }
0x12d8   : > { %v1253_v1 = vpop.permute.xlu1 %1252 }
0x12d9   : > { %1793 = vmatmul.mubr.msk.bf16.vlgmr.msra.gmra.mxu1 %vm397_vm2, %v1253_v1  ;;  %1801 = vmatmul.mubr.msk.bf16.vlgmr.msra.gmra.mxu0 %vm397_vm2, %v1253_v1 }
0x12da   : > { %1805 = vmatpush3.bf16.msra.mxu1 %v2044_v38  ;;  %1808 = vmatprep.mubr.msk.bf16.mxu1 %vm1914_vm1, %v1913_v8 }
0x12db   : > { %1806 = vmatprep.subr.bf16.mxu1 %v1913_v8 }
0x12de   : > { %1807 = vmatpush3.bf16.msra.mxu1 %v2047_v39  ;;  %v1625_v39 = vld [vmem:[%s1983_s30 + $0x7] sm:$0x1] }
0x12df   : > { %v1342_v15 = vunpack.c.l.bf16 %v1625_v39 }
0x1399   : > { %v1291_v2 = vpop.f32.mrf.mxu1  ;;  %v1336_v3 = vpop.f32.mrf.mxu0 }
0x139a   : > { %v1292_v4 = vadd.f32 %v2068_v49, %v1291_v2  ;;  %v1348_v5 = vadd.f32 %v1336_v3, %v2034_v18  ;;  %v1343_v16 = vadd.f32 %v1342_v15, %v1336_v3 }
0x139b   : > { %v1794_v6 = vpop.f32.mrf.mxu1  ;;  %v1802_v10 = vpop.f32.mrf.mxu0 }
0x139c   : > { %v1297_v11 = vpack.c.bf16 %v1292_v4, %v1292_v4  ;;  %v1356_v12 = vrot.slane %v1348_v5, %v2036_v19  ;;  %v1344_v17 = vmul.f32 0.5, %v1343_v16 }
0x139d   : > { %v1294_v38 = vpop.f32.mrf.mxu1  ;;  %v1339_v13 = vpop.f32.mrf.mxu0 }
0x139e   : > { %1624 = vst.msk [vmem:[%s1988_s9 + $0x6] sm:$0x1] %vm548_vm3, %v1297_v11  ;;  %1357 = vrot.lane.b32.xlu0 %v1356_v12, %s1915_s23  ;;  %1876 = vtanh.f32 %v1344_v17 }
0x139f   : > { %v1795_v8 = vpop.f32.mrf.mxu1  ;;  %v1803_v14 = vpop.f32.mrf.mxu0 }
0x13ab   : > { %v1877_v20 = vpop.eup %1876 }
0x13ac   : > { %v1346_v18 = vmul.f32 0.5, %v1877_v20 }
0x13ae   : > { %v1347_v21 = vadd.f32 0.5, %v1346_v18 }
0x13b0   : > { %v1367_v27 = vsub.f32 1.0, %v1347_v21  ;;  %v1373_v29 = vmul.f32 %v1347_v21, %v1249_v63 }
0x1410   : > { %v1358_v22 = vpop.permute.xlu0 %1357 }
0x1411   : > { %v1360_v23 = vmul.f32 %v1358_v22, %v1347_v21 }
0x1413   : > { %1362 = vrot.lane.b32.xlu1 %v1360_v23, %s1915_s23 }
0x1485   : > { %v1363_v24 = vpop.permute.xlu1 %1362 }
0x1486   : > { %v1365_v25 = vadd.f32 %v1363_v24, %v1342_v15 }
0x1488   : > { %1878 = vtanh.f32 %v1365_v25 }
0x1495   : > { %v1879_v26 = vpop.eup %1878 }
0x1496   : > { %1369 = vrot.lane.b32.xlu0 %v1879_v26, %s1918_s28 }
0x1508   : > { %v1370_v28 = vpop.permute.xlu0 %1369 }
0x1509   : > { %v1372_v30 = vmul.f32 %v1370_v28, %v1367_v27 }
0x150b   : > { %v1374_v31 = vadd.f32 %v1373_v29, %v1372_v30 }
0x150d   : > { %v1432_v32 = vrot.slane %v1374_v31, %v2036_v19  ;;  %v1375_v33 = vpack.c.bf16 %v1374_v31, %v1374_v31 }
0x150f   : > { %1433 = vrot.lane.b32.xlu0 %v1432_v32, %s1918_s28  ;;  %1377 = vrot.lane.b32.xlu1 %v1375_v33, %s1918_s28 }
0x1581   : > { %v1434_v7 = vpop.permute.xlu0 %1433  ;;  %v1378_v34 = vpop.permute.xlu1 %1377 }
0x1582   : > { %1437 = vst.msk [vmem:[#allocation2] sm:$0x3] %vm1436_vm4, %v1434_v7  ;;  %1809 = vmatmul.mubr.msk.bf16.vlgmr.msra.gmra.mxu1 %vm397_vm2, %v1378_v34 }
0x1642   : > { %v1416_v35 = vpop.f32.mrf.mxu1 }
0x1643   : > { %v1417_v36 = vadd.f32 %v2068_v49, %v1416_v35 }
0x1644   : > { %v1810_v37 = vpop.f32.mrf.mxu1 }
0x1645   : > { %v1422_v40 = vpack.c.bf16 %v1417_v36, %v1417_v36 }
0x1646   : > { %v1419_v41 = vpop.f32.mrf.mxu1 }
0x1647   : > { %1628 = vst.msk [vmem:[%s1988_s9 + $0x7] sm:$0x1] %vm548_vm3, %v1422_v40 }
0x1648   : > { %v1811_v19 = vpop.f32.mrf.mxu1 }
0x1649 PF: > { %p1629_p7 = scmp.le.s32.totalorder %s1976_s26, %s2008_s22 }
0x164b   : > { %1441 = sbr.rel (%p1629_p7) target bundleno = 5717 (0x1655), region = 164 }
0x1650   : > { %vm1442_vm5 = vcmask 778240   ;;  %v1919_v49 = vmov 0  }
0x1651   : > { %1443 = vst.msk [vmem:[%s1988_s9] sm:$0x1] %vm1442_vm5, %v1919_v49  ;;  %1444 = vst.msk [vmem:[%s1988_s9 + $0x1] sm:$0x1] %vm1442_vm5, %v1919_v49 }
0x1652   : > { %1445 = vst.msk [vmem:[%s1988_s9 + $0x2] sm:$0x1] %vm1442_vm5, %v1919_v49  ;;  %1446 = vst.msk [vmem:[%s1988_s9 + $0x3] sm:$0x1] %vm1442_vm5, %v1919_v49 }
0x1653   : > { %1447 = vst.msk [vmem:[%s1988_s9 + $0x4] sm:$0x1] %vm1442_vm5, %v1919_v49  ;;  %1448 = vst.msk [vmem:[%s1988_s9 + $0x5] sm:$0x1] %vm1442_vm5, %v1919_v49 }
0x1654   : > { %1449 = vst.msk [vmem:[%s1988_s9 + $0x6] sm:$0x1] %vm1442_vm5, %v1919_v49  ;;  %1450 = vst.msk [vmem:[%s1988_s9 + $0x7] sm:$0x1] %vm1442_vm5, %v1919_v49 }
0x1655 PF: > { %s17_s25 = sadd.s32 1, %s1910_s25   ;;  %s2248_s23 = smov %s1906_s24 }
0x1656   : > { %p14_p8 = scmp.ge.s32.totalorder %s17_s25, 5   ;;  %s2249_s24 = smov %s2251_s0 }
0x1658   :  { %16 = sbr.rel (!%p14_p8) target bundleno = 2 (0x2), region = 250 }
0x165d   :  { %1477 = vsyncmov [#allocation7] }
0x1660   :  { %s1478_s26 = vpop.sfrf %1477 }
0x1661   :  { %p1632_p9 = scmp.ne.s32.totalorder %s1478_s26, 0 }
0x1663   :  { %1482 = shalt.err (%p1632_p9)  }
0x1664   :  { %1484 = vsyncmov [#allocation7 + $0x1] }
0x1667   :  { %s1485_s29 = vpop.sfrf %1484 }
0x1668   :  { %p1633_p10 = scmp.ne.s32.totalorder %s1485_s29, 0 }
0x166a   :  { %1489 = shalt.err (%p1633_p10)  }
0x166b   :  { %1491 = vsyncmov [#allocation7 + $0x2] }
0x166e   :  { %s1492_s30 = vpop.sfrf %1491 }
0x166f   :  { %p1634_p11 = scmp.ne.s32.totalorder %s1492_s30, 0 }
0x1671   :  { %1496 = shalt.err (%p1634_p11)  }
0x1672   :  { %1498 = vsyncmov [#allocation7 + $0x3] }
0x1675   :  { %s1499_s7 = vpop.sfrf %1498 }
0x1676   :  { %p1635_p12 = scmp.ne.s32.totalorder %s1499_s7, 0 }
0x1678   :  { %1503 = shalt.err (%p1635_p12)  }

</bundles_post_ra>
